<compile_context>
chip_gen: v5e
topology: v5e:2x2
jax: 0.10.0
libtpu: 0.0.40
codegen_flags: <defaults>
</compile_context>

<pallas_src>
import functools
import numpy as np
import jax
import jax.numpy as jnp
from jax.experimental import pallas as pl
from jax.experimental.pallas import tpu as pltpu

_CONV_K, _CONV_S = 7, 2      # Conv2d(1, 64, 7, stride=2)
_POOL_K, _POOL_S = 3, 2      # MaxPool2d(3, stride=2)


def _vmem():
    return pl.BlockSpec(memory_space=pltpu.MemorySpace.VMEM)


# ----------------------------------------------------------------------------
# Kernel A: char-CNN head (conv-as-matmul + fused max-pool) + fc1 + fused
#           bidirectional LSTM input projection.
# ----------------------------------------------------------------------------
def _char_head_kernel(patches_ref,   # (9, PW*N, 49)  bf16  im2col, grouped by pool window
                      emb_ref,       # (N, E)         bf16  word embeddings (time-major rows)
                      feat_ref,      # (N, F)         bf16  extra features
                      wc_ref,        # (49, 64)       bf16  conv weight
                      bc_ref,        # (1, 64)        f32   conv bias
                      w1_ref,        # (PW, 64, H2)   f32   fc1 weight per pooled position
                      b1_ref,        # (1, H2)        f32
                      wgc_ref,       # (H2, 8*H2)     bf16  input-proj rows for fc1 output
                      wge_ref,       # (E, 8*H2)      bf16  input-proj rows for word emb
                      wgf_ref,       # (F, 8*H2)      bf16  input-proj rows for features
                      bg_ref,        # (1, 8*H2)      f32   b_ih + b_hh, both directions
                      gates_ref):    # (N, 8*H2)      f32   output: pre-computed input gates
    n_tok = emb_ref.shape[0]
    n_win = patches_ref.shape[0]     # 9 conv positions per pool window
    n_pool = w1_ref.shape[0]         # pooled spatial positions (13)

    wc = wc_ref[...]
    # Conv2d as matmul on im2col patches; MaxPool2d is the elementwise max over
    # the 9 conv positions of each pool window (bias added after the max).
    acc = jnp.dot(patches_ref[0], wc, preferred_element_type=jnp.float32)
    for w in range(1, n_win):
        acc = jnp.maximum(
            acc, jnp.dot(patches_ref[w], wc, preferred_element_type=jnp.float32))
    pooled = acc + bc_ref[...]                       # (PW*N, 64), rows ordered j*N + n

    # fc1 (no nonlinearity in the reference module), accumulated per pooled position.
    fc1 = b1_ref[...] + jnp.dot(pooled[0:n_tok], w1_ref[0],
                                preferred_element_type=jnp.float32)
    for j in range(1, n_pool):
        fc1 = fc1 + jnp.dot(pooled[j * n_tok:(j + 1) * n_tok], w1_ref[j],
                            preferred_element_type=jnp.float32)

    # Fused concat([fc1, emb, feat]) @ [W_ih_fwd | W_ih_bwd] + (b_ih + b_hh).
    gates = (bg_ref[...]
             + jnp.dot(fc1.astype(jnp.bfloat16), wgc_ref[...],
                       preferred_element_type=jnp.float32)
             + jnp.dot(emb_ref[...], wge_ref[...],
                       preferred_element_type=jnp.float32)
             + jnp.dot(feat_ref[...], wgf_ref[...],
                       preferred_element_type=jnp.float32))
    gates_ref[...] = gates


# ----------------------------------------------------------------------------
# Kernel B: bidirectional LSTM (directions interleaved) + fused fc3.
# ----------------------------------------------------------------------------
def _bilstm_fc3_kernel(g_ref,        # (T, B, 8*H2) f32  pre-computed input gates, both dirs
                       whh_f_ref,    # (H2, 4*H2)   f32
                       whh_b_ref,    # (H2, 4*H2)   f32
                       w3f_ref,      # (H2, Cpad)   f32  fc3 rows for forward hidden
                       w3b_ref,      # (H2, Cpad)   f32  fc3 rows for backward hidden
                       b3_ref,       # (1, 1, Cpad) f32
                       out_ref,      # (T, B, Cpad) f32  logits (lane-padded)
                       h_f, c_f, h_b, c_b):
    T = g_ref.shape[0]
    H2 = h_f.shape[1]

    whh_f = whh_f_ref[...]
    whh_b = whh_b_ref[...]
    w3f = w3f_ref[...]
    w3b = w3b_ref[...]

    h_f[...] = jnp.zeros_like(h_f)
    c_f[...] = jnp.zeros_like(c_f)
    h_b[...] = jnp.zeros_like(h_b)
    c_b[...] = jnp.zeros_like(c_b)
    # fc3 bias broadcast once; both directions then accumulate into out_ref.
    out_ref[...] = jnp.broadcast_to(b3_ref[...], out_ref.shape)

    def cell(g_pre, h, c, whh):
        gates = g_pre + jnp.dot(h, whh, preferred_element_type=jnp.float32)
        i_g = jax.nn.sigmoid(gates[:, 0 * H2:1 * H2])     # PyTorch gate order i, f, g, o
        f_g = jax.nn.sigmoid(gates[:, 1 * H2:2 * H2])
        g_g = jnp.tanh(gates[:, 2 * H2:3 * H2])
        o_g = jax.nn.sigmoid(gates[:, 3 * H2:4 * H2])
        c_new = f_g * c + i_g * g_g
        h_new = o_g * jnp.tanh(c_new)
        return h_new, c_new

    @pl.loop(0, T)
    def _(s):                              # forward step s and backward step T-1-s
        t_b = T - 1 - s
        g_fwd = g_ref[s]                   # (B, 8*H2); gate slices are 128-aligned
        g_bwd = g_ref[t_b]
        hf_new, cf_new = cell(g_fwd[:, 0:4 * H2], h_f[...], c_f[...], whh_f)
        hb_new, cb_new = cell(g_bwd[:, 4 * H2:8 * H2], h_b[...], c_b[...], whh_b)
        h_f[...] = hf_new
        c_f[...] = cf_new
        h_b[...] = hb_new
        c_b[...] = cb_new
        # Fused fc3: each direction adds its partial product at its own timestep.
        out_ref[s] = out_ref[s] + jnp.dot(hf_new, w3f,
                                          preferred_element_type=jnp.float32)
        out_ref[t_b] = out_ref[t_b] + jnp.dot(hb_new, w3b,
                                              preferred_element_type=jnp.float32)


# ----------------------------------------------------------------------------
# Wrappers (plain-JAX layout glue).
# ----------------------------------------------------------------------------
def _extract_pool_patches(imgs):
    """im2col patches grouped by max-pool window (pure layout glue).

    imgs: (N, Hc, Wc) -> (POOL_K*POOL_K, PW*N, 49), row order j*N + n, where j is
    the pooled position along the conv width axis.  The example configuration
    pools the conv-height axis completely (pool output height == 1).
    """
    n, hc, wc = imgs.shape
    oh = (hc - _CONV_K) // _CONV_S + 1
    ow = (wc - _CONV_K) // _CONV_S + 1
    ph = (oh - _POOL_K) // _POOL_S + 1
    pw = (ow - _POOL_K) // _POOL_S + 1
    assert ph == 1 and oh >= _POOL_K, "char-image height must pool to a single row"
    members = []
    for oy in range(_POOL_K):               # conv row inside the (only) pool window
        for dx in range(_POOL_K):           # conv column offset inside the pool window
            rows = []
            for j in range(pw):
                ox = _POOL_S * j + dx
                patch = imgs[:, _CONV_S * oy:_CONV_S * oy + _CONV_K,
                             _CONV_S * ox:_CONV_S * ox + _CONV_K]
                rows.append(patch.reshape(n, _CONV_K * _CONV_K))
            members.append(jnp.concatenate(rows, axis=0))       # (pw*n, 49)
    return jnp.stack(members, axis=0), pw


def bilstm_char_forward(params, x_idx, cs, feats, n_classes):
    """Mirrors BiLSTMChar.forward(x, cs, f): returns logits of shape (B, T, n_classes)."""
    B, T = x_idx.shape
    N = T * B
    H2 = params["whh_f"].shape[1]            # hidden_size // 2
    E = params["emb"].shape[1]
    Fd = feats.shape[-1]
    C_PAD = 128                              # lane-dense logits output (sliced below)

    # ---- plain-JAX layout glue: gather / transpose / im2col / weight prep ----
    emb = jnp.take(params["emb"], x_idx, axis=0)                     # (B, T, E)
    emb_tm = jnp.transpose(emb, (1, 0, 2)).reshape(N, E)             # time-major rows
    feat_tm = jnp.transpose(feats, (1, 0, 2)).reshape(N, Fd)
    imgs_tm = jnp.transpose(cs[:, :, 0], (1, 0, 2, 3)).reshape(
        N, cs.shape[-2], cs.shape[-1])
    patches, pw = _extract_pool_patches(imgs_tm)                     # (9, pw*N, 49)
    assert 64 * pw == params["fc1_w"].shape[1]                       # fc1 expects 832

    wc = jnp.transpose(params["cnn_w"].reshape(64, _CONV_K * _CONV_K))   # (49, 64)
    bc = params["cnn_b"][None, :]
    # PyTorch flattens the pooled map channel-major (index = channel*pw + j).
    w1 = jnp.transpose(params["fc1_w"].reshape(H2, 64, pw), (2, 1, 0))   # (pw, 64, H2)
    b1 = params["fc1_b"][None, :]
    # LSTM input projection, both directions, split by the concat segments of
    # the reference forward: [fc1_out (H2), word_emb (E), extra feats (Fd)].
    wih = jnp.concatenate([jnp.transpose(params["wih_f"]),
                           jnp.transpose(params["wih_b"])], axis=1)      # (357, 8*H2)
    wgc, wge, wgf = wih[:H2], wih[H2:H2 + E], wih[H2 + E:]
    bg = jnp.concatenate([params["bih_f"] + params["bhh_f"],
                          params["bih_b"] + params["bhh_b"]])[None, :]   # (1, 8*H2)

    bf16 = lambda a: a.astype(jnp.bfloat16)

    gates = pl.pallas_call(
        _char_head_kernel,
        out_shape=jax.ShapeDtypeStruct((N, 8 * H2), jnp.float32),
        in_specs=[_vmem()] * 11,
        out_specs=_vmem(),
        compiler_params=pltpu.CompilerParams(vmem_limit_bytes=32 * 1024 * 1024),
    )(bf16(patches), bf16(emb_tm), bf16(feat_tm),
      bf16(wc), bc, w1, b1, bf16(wgc), bf16(wge), bf16(wgf), bg)

    g_tm = gates.reshape(T, B, 8 * H2)       # pure reshape: rows were built time-major

    whh_f = jnp.transpose(params["whh_f"])                               # (H2, 4*H2)
    whh_b = jnp.transpose(params["whh_b"])
    w3 = jnp.transpose(params["fc3_w"])                                  # (2*H2, C)
    w3 = jnp.pad(w3, ((0, 0), (0, C_PAD - n_classes)))
    w3f, w3b = w3[:H2], w3[H2:]
    b3 = jnp.pad(params["fc3_b"], (0, C_PAD - n_classes)).reshape(1, 1, C_PAD)

    logits_pad = pl.pallas_call(
        _bilstm_fc3_kernel,
        out_shape=jax.ShapeDtypeStruct((T, B, C_PAD), jnp.float32),
        in_specs=[_vmem()] * 6,
        out_specs=_vmem(),
        scratch_shapes=[pltpu.VMEM((B, H2), jnp.float32)] * 4,
        compiler_params=pltpu.CompilerParams(vmem_limit_bytes=32 * 1024 * 1024),
    )(g_tm, whh_f, whh_b, w3f, w3b, b3)

    # back to batch-first, drop the lane padding
    return jnp.transpose(logits_pad, (1, 0, 2))[:, :, :n_classes]


# ----------------------------------------------------------------------------
# Deterministic parameter initialisation (shapes follow BiLSTMChar.__init__
# with hidden_size = 256  =>  lstm_input = 357, fc1: 832 -> 128, fc3: 256 -> C).
# ----------------------------------------------------------------------------
def init_params(key, vocab_size, embed_size, hidden_size, n_classes, feat_size):
    H2 = hidden_size // 2
    lstm_input = H2 + embed_size + feat_size
    ks = jax.random.split(key, 15)

    def u(k, shape, fan_in):
        lim = 1.0 / np.sqrt(fan_in)
        return jax.random.uniform(k, shape, jnp.float32, -lim, lim)

    return dict(
        emb=0.1 * jax.random.normal(ks[0], (vocab_size, embed_size), jnp.float32),
        cnn_w=u(ks[1], (64, 1, _CONV_K, _CONV_K), _CONV_K * _CONV_K),
        cnn_b=u(ks[2], (64,), _CONV_K * _CONV_K),
        fc1_w=u(ks[3], (H2, 832), 832),
        fc1_b=u(ks[4], (H2,), 832),
        wih_f=u(ks[5], (4 * H2, lstm_input), H2),
        whh_f=u(ks[6], (4 * H2, H2), H2),
        bih_f=u(ks[7], (4 * H2,), H2),
        bhh_f=u(ks[8], (4 * H2,), H2),
        wih_b=u(ks[9], (4 * H2, lstm_input), H2),
        whh_b=u(ks[10], (4 * H2, H2), H2),
        bih_b=u(ks[11], (4 * H2,), H2),
        bhh_b=u(ks[12], (4 * H2,), H2),
        fc3_w=u(ks[13], (n_classes, hidden_size), hidden_size),
        fc3_b=u(ks[14], (n_classes,), hidden_size),
    )


if __name__ == "__main__":
    # Shapes implied by the module: fc3 consumes the biLSTM output -> hidden = 256;
    # lstm_input = 357 = 128 (fc1 out) + embed_size + feat_size; the char image must
    # flatten to 832 = 64*13 after conv(7,2) + maxpool(3,2)  ->  image 11 x 60.
    vocab_size, embed_size, hidden_size, n_classes = 50, 200, 256, 9
    feat_size = 357 - hidden_size // 2 - embed_size          # 29
    char_h, char_w = 11, 60                                  # conv (3,27) -> pool (1,13)
    B, T = 2, 8

    key = jax.random.PRNGKey(0)
    kp, kx, kc, kf = jax.random.split(key, 4)
    params = init_params(kp, vocab_size, embed_size, hidden_size, n_classes, feat_size)

    x_idx = jax.random.randint(kx, (B, T), 0, vocab_size, dtype=jnp.int32)
    cs = jax.random.uniform(kc, (B, T, 1, char_h, char_w), jnp.float32)
    feats = jax.random.normal(kf, (B, T, feat_size), jnp.float32)

    fwd = jax.jit(functools.partial(bilstm_char_forward, n_classes=n_classes))
    logits = fwd(params, x_idx, cs, feats)
    jax.block_until_ready(logits)

    assert logits.shape == (B, T, n_classes)
    assert bool(jnp.all(jnp.isfinite(logits)))
    print("KERNEL_OK")
</pallas_src>

<mosaic_0001>
module attributes {stable_mosaic.version = 11 : i64} {
  func.func @_char_head_kernel(%arg0: memref<9x208x49xbf16, #tpu.memory_space<vmem>>, %arg1: memref<16x200xbf16, #tpu.memory_space<vmem>>, %arg2: memref<16x29xbf16, #tpu.memory_space<vmem>>, %arg3: memref<49x64xbf16, #tpu.memory_space<vmem>>, %arg4: memref<1x64xf32, #tpu.memory_space<vmem>>, %arg5: memref<13x64x128xf32, #tpu.memory_space<vmem>>, %arg6: memref<1x128xf32, #tpu.memory_space<vmem>>, %arg7: memref<128x1024xbf16, #tpu.memory_space<vmem>>, %arg8: memref<200x1024xbf16, #tpu.memory_space<vmem>>, %arg9: memref<29x1024xbf16, #tpu.memory_space<vmem>>, %arg10: memref<1x1024xf32, #tpu.memory_space<vmem>>, %arg11: memref<16x1024xf32, #tpu.memory_space<vmem>>) attributes {dimension_semantics = [], scalar_prefetch = 0 : i64, scratch_operands = 0 : i64, tpu.core_type = #tpu.core_type<tc>} {
    %c0 = arith.constant 0 : index
    %c0_0 = arith.constant 0 : index
    %0 = vector.load %arg3[%c0, %c0_0] : memref<49x64xbf16, #tpu.memory_space<vmem>>, vector<49x64xbf16>
    %c0_1 = arith.constant 0 : index
    %c0_2 = arith.constant 0 : index
    %c0_3 = arith.constant 0 : index
    %1 = vector.load %arg0[%c0_1, %c0_2, %c0_3] : memref<9x208x49xbf16, #tpu.memory_space<vmem>>, vector<1x208x49xbf16>
    %2 = vector.shape_cast %1 : vector<1x208x49xbf16> to vector<208x49xbf16>
    %cst = arith.constant dense<0.000000e+00> : vector<208x64xf32>
    %3 = tpu.matmul %2, %0, %cst {dimension_numbers = #tpu.dot_dimension_numbers<[1], [0], [0], [1], [0, 0, 1, 1], [], []>} : vector<208x49xbf16>, vector<49x64xbf16>, vector<208x64xf32> -> vector<208x64xf32>
    %c1 = arith.constant 1 : index
    %c0_4 = arith.constant 0 : index
    %c0_5 = arith.constant 0 : index
    %4 = vector.load %arg0[%c1, %c0_4, %c0_5] : memref<9x208x49xbf16, #tpu.memory_space<vmem>>, vector<1x208x49xbf16>
    %5 = vector.shape_cast %4 : vector<1x208x49xbf16> to vector<208x49xbf16>
    %cst_6 = arith.constant dense<0.000000e+00> : vector<208x64xf32>
    %6 = tpu.matmul %5, %0, %cst_6 {dimension_numbers = #tpu.dot_dimension_numbers<[1], [0], [0], [1], [0, 0, 1, 1], [], []>} : vector<208x49xbf16>, vector<49x64xbf16>, vector<208x64xf32> -> vector<208x64xf32>
    %7 = arith.maximumf %3, %6 : vector<208x64xf32>
    %c2 = arith.constant 2 : index
    %c0_7 = arith.constant 0 : index
    %c0_8 = arith.constant 0 : index
    %8 = vector.load %arg0[%c2, %c0_7, %c0_8] : memref<9x208x49xbf16, #tpu.memory_space<vmem>>, vector<1x208x49xbf16>
    %9 = vector.shape_cast %8 : vector<1x208x49xbf16> to vector<208x49xbf16>
    %cst_9 = arith.constant dense<0.000000e+00> : vector<208x64xf32>
    %10 = tpu.matmul %9, %0, %cst_9 {dimension_numbers = #tpu.dot_dimension_numbers<[1], [0], [0], [1], [0, 0, 1, 1], [], []>} : vector<208x49xbf16>, vector<49x64xbf16>, vector<208x64xf32> -> vector<208x64xf32>
    %11 = arith.maximumf %7, %10 : vector<208x64xf32>
    %c3 = arith.constant 3 : index
    %c0_10 = arith.constant 0 : index
    %c0_11 = arith.constant 0 : index
    %12 = vector.load %arg0[%c3, %c0_10, %c0_11] : memref<9x208x49xbf16, #tpu.memory_space<vmem>>, vector<1x208x49xbf16>
    %13 = vector.shape_cast %12 : vector<1x208x49xbf16> to vector<208x49xbf16>
    %cst_12 = arith.constant dense<0.000000e+00> : vector<208x64xf32>
    %14 = tpu.matmul %13, %0, %cst_12 {dimension_numbers = #tpu.dot_dimension_numbers<[1], [0], [0], [1], [0, 0, 1, 1], [], []>} : vector<208x49xbf16>, vector<49x64xbf16>, vector<208x64xf32> -> vector<208x64xf32>
    %15 = arith.maximumf %11, %14 : vector<208x64xf32>
    %c4 = arith.constant 4 : index
    %c0_13 = arith.constant 0 : index
    %c0_14 = arith.constant 0 : index
    %16 = vector.load %arg0[%c4, %c0_13, %c0_14] : memref<9x208x49xbf16, #tpu.memory_space<vmem>>, vector<1x208x49xbf16>
    %17 = vector.shape_cast %16 : vector<1x208x49xbf16> to vector<208x49xbf16>
    %cst_15 = arith.constant dense<0.000000e+00> : vector<208x64xf32>
    %18 = tpu.matmul %17, %0, %cst_15 {dimension_numbers = #tpu.dot_dimension_numbers<[1], [0], [0], [1], [0, 0, 1, 1], [], []>} : vector<208x49xbf16>, vector<49x64xbf16>, vector<208x64xf32> -> vector<208x64xf32>
    %19 = arith.maximumf %15, %18 : vector<208x64xf32>
    %c5 = arith.constant 5 : index
    %c0_16 = arith.constant 0 : index
    %c0_17 = arith.constant 0 : index
    %20 = vector.load %arg0[%c5, %c0_16, %c0_17] : memref<9x208x49xbf16, #tpu.memory_space<vmem>>, vector<1x208x49xbf16>
    %21 = vector.shape_cast %20 : vector<1x208x49xbf16> to vector<208x49xbf16>
    %cst_18 = arith.constant dense<0.000000e+00> : vector<208x64xf32>
    %22 = tpu.matmul %21, %0, %cst_18 {dimension_numbers = #tpu.dot_dimension_numbers<[1], [0], [0], [1], [0, 0, 1, 1], [], []>} : vector<208x49xbf16>, vector<49x64xbf16>, vector<208x64xf32> -> vector<208x64xf32>
    %23 = arith.maximumf %19, %22 : vector<208x64xf32>
    %c6 = arith.constant 6 : index
    %c0_19 = arith.constant 0 : index
    %c0_20 = arith.constant 0 : index
    %24 = vector.load %arg0[%c6, %c0_19, %c0_20] : memref<9x208x49xbf16, #tpu.memory_space<vmem>>, vector<1x208x49xbf16>
    %25 = vector.shape_cast %24 : vector<1x208x49xbf16> to vector<208x49xbf16>
    %cst_21 = arith.constant dense<0.000000e+00> : vector<208x64xf32>
    %26 = tpu.matmul %25, %0, %cst_21 {dimension_numbers = #tpu.dot_dimension_numbers<[1], [0], [0], [1], [0, 0, 1, 1], [], []>} : vector<208x49xbf16>, vector<49x64xbf16>, vector<208x64xf32> -> vector<208x64xf32>
    %27 = arith.maximumf %23, %26 : vector<208x64xf32>
    %c7 = arith.constant 7 : index
    %c0_22 = arith.constant 0 : index
    %c0_23 = arith.constant 0 : index
    %28 = vector.load %arg0[%c7, %c0_22, %c0_23] : memref<9x208x49xbf16, #tpu.memory_space<vmem>>, vector<1x208x49xbf16>
    %29 = vector.shape_cast %28 : vector<1x208x49xbf16> to vector<208x49xbf16>
    %cst_24 = arith.constant dense<0.000000e+00> : vector<208x64xf32>
    %30 = tpu.matmul %29, %0, %cst_24 {dimension_numbers = #tpu.dot_dimension_numbers<[1], [0], [0], [1], [0, 0, 1, 1], [], []>} : vector<208x49xbf16>, vector<49x64xbf16>, vector<208x64xf32> -> vector<208x64xf32>
    %31 = arith.maximumf %27, %30 : vector<208x64xf32>
    %c8 = arith.constant 8 : index
    %c0_25 = arith.constant 0 : index
    %c0_26 = arith.constant 0 : index
    %32 = vector.load %arg0[%c8, %c0_25, %c0_26] : memref<9x208x49xbf16, #tpu.memory_space<vmem>>, vector<1x208x49xbf16>
    %33 = vector.shape_cast %32 : vector<1x208x49xbf16> to vector<208x49xbf16>
    %cst_27 = arith.constant dense<0.000000e+00> : vector<208x64xf32>
    %34 = tpu.matmul %33, %0, %cst_27 {dimension_numbers = #tpu.dot_dimension_numbers<[1], [0], [0], [1], [0, 0, 1, 1], [], []>} : vector<208x49xbf16>, vector<49x64xbf16>, vector<208x64xf32> -> vector<208x64xf32>
    %35 = arith.maximumf %31, %34 : vector<208x64xf32>
    %c0_28 = arith.constant 0 : index
    %c0_29 = arith.constant 0 : index
    %36 = vector.load %arg4[%c0_28, %c0_29] : memref<1x64xf32, #tpu.memory_space<vmem>>, vector<1x64xf32>
    %37 = vector.broadcast %36 : vector<1x64xf32> to vector<208x64xf32>
    %38 = arith.addf %35, %37 : vector<208x64xf32>
    %c0_30 = arith.constant 0 : index
    %c0_31 = arith.constant 0 : index
    %39 = vector.load %arg6[%c0_30, %c0_31] : memref<1x128xf32, #tpu.memory_space<vmem>>, vector<1x128xf32>
    %40 = vector.extract_strided_slice %38 {offsets = [0, 0], sizes = [16, 64], strides = [1, 1]} : vector<208x64xf32> to vector<16x64xf32>
    %c0_32 = arith.constant 0 : index
    %c0_33 = arith.constant 0 : index
    %c0_34 = arith.constant 0 : index
    %41 = vector.load %arg5[%c0_32, %c0_33, %c0_34] : memref<13x64x128xf32, #tpu.memory_space<vmem>>, vector<1x64x128xf32>
    %42 = vector.shape_cast %41 : vector<1x64x128xf32> to vector<64x128xf32>
    %cst_35 = arith.constant dense<0.000000e+00> : vector<16x128xf32>
    %43 = tpu.matmul %40, %42, %cst_35 {dimension_numbers = #tpu.dot_dimension_numbers<[1], [0], [0], [1], [0, 0, 1, 1], [], []>} : vector<16x64xf32>, vector<64x128xf32>, vector<16x128xf32> -> vector<16x128xf32>
    %44 = vector.broadcast %39 : vector<1x128xf32> to vector<16x128xf32>
    %45 = arith.addf %44, %43 : vector<16x128xf32>
    %46 = vector.extract_strided_slice %38 {offsets = [16, 0], sizes = [16, 64], strides = [1, 1]} : vector<208x64xf32> to vector<16x64xf32>
    %c1_36 = arith.constant 1 : index
    %c0_37 = arith.constant 0 : index
    %c0_38 = arith.constant 0 : index
    %47 = vector.load %arg5[%c1_36, %c0_37, %c0_38] : memref<13x64x128xf32, #tpu.memory_space<vmem>>, vector<1x64x128xf32>
    %48 = vector.shape_cast %47 : vector<1x64x128xf32> to vector<64x128xf32>
    %cst_39 = arith.constant dense<0.000000e+00> : vector<16x128xf32>
    %49 = tpu.matmul %46, %48, %cst_39 {dimension_numbers = #tpu.dot_dimension_numbers<[1], [0], [0], [1], [0, 0, 1, 1], [], []>} : vector<16x64xf32>, vector<64x128xf32>, vector<16x128xf32> -> vector<16x128xf32>
    %50 = arith.addf %45, %49 : vector<16x128xf32>
    %51 = vector.extract_strided_slice %38 {offsets = [32, 0], sizes = [16, 64], strides = [1, 1]} : vector<208x64xf32> to vector<16x64xf32>
    %c2_40 = arith.constant 2 : index
    %c0_41 = arith.constant 0 : index
    %c0_42 = arith.constant 0 : index
    %52 = vector.load %arg5[%c2_40, %c0_41, %c0_42] : memref<13x64x128xf32, #tpu.memory_space<vmem>>, vector<1x64x128xf32>
    %53 = vector.shape_cast %52 : vector<1x64x128xf32> to vector<64x128xf32>
    %cst_43 = arith.constant dense<0.000000e+00> : vector<16x128xf32>
    %54 = tpu.matmul %51, %53, %cst_43 {dimension_numbers = #tpu.dot_dimension_numbers<[1], [0], [0], [1], [0, 0, 1, 1], [], []>} : vector<16x64xf32>, vector<64x128xf32>, vector<16x128xf32> -> vector<16x128xf32>
    %55 = arith.addf %50, %54 : vector<16x128xf32>
    %56 = vector.extract_strided_slice %38 {offsets = [48, 0], sizes = [16, 64], strides = [1, 1]} : vector<208x64xf32> to vector<16x64xf32>
    %c3_44 = arith.constant 3 : index
    %c0_45 = arith.constant 0 : index
    %c0_46 = arith.constant 0 : index
    %57 = vector.load %arg5[%c3_44, %c0_45, %c0_46] : memref<13x64x128xf32, #tpu.memory_space<vmem>>, vector<1x64x128xf32>
    %58 = vector.shape_cast %57 : vector<1x64x128xf32> to vector<64x128xf32>
    %cst_47 = arith.constant dense<0.000000e+00> : vector<16x128xf32>
    %59 = tpu.matmul %56, %58, %cst_47 {dimension_numbers = #tpu.dot_dimension_numbers<[1], [0], [0], [1], [0, 0, 1, 1], [], []>} : vector<16x64xf32>, vector<64x128xf32>, vector<16x128xf32> -> vector<16x128xf32>
    %60 = arith.addf %55, %59 : vector<16x128xf32>
    %61 = vector.extract_strided_slice %38 {offsets = [64, 0], sizes = [16, 64], strides = [1, 1]} : vector<208x64xf32> to vector<16x64xf32>
    %c4_48 = arith.constant 4 : index
    %c0_49 = arith.constant 0 : index
    %c0_50 = arith.constant 0 : index
    %62 = vector.load %arg5[%c4_48, %c0_49, %c0_50] : memref<13x64x128xf32, #tpu.memory_space<vmem>>, vector<1x64x128xf32>
    %63 = vector.shape_cast %62 : vector<1x64x128xf32> to vector<64x128xf32>
    %cst_51 = arith.constant dense<0.000000e+00> : vector<16x128xf32>
    %64 = tpu.matmul %61, %63, %cst_51 {dimension_numbers = #tpu.dot_dimension_numbers<[1], [0], [0], [1], [0, 0, 1, 1], [], []>} : vector<16x64xf32>, vector<64x128xf32>, vector<16x128xf32> -> vector<16x128xf32>
    %65 = arith.addf %60, %64 : vector<16x128xf32>
    %66 = vector.extract_strided_slice %38 {offsets = [80, 0], sizes = [16, 64], strides = [1, 1]} : vector<208x64xf32> to vector<16x64xf32>
    %c5_52 = arith.constant 5 : index
    %c0_53 = arith.constant 0 : index
    %c0_54 = arith.constant 0 : index
    %67 = vector.load %arg5[%c5_52, %c0_53, %c0_54] : memref<13x64x128xf32, #tpu.memory_space<vmem>>, vector<1x64x128xf32>
    %68 = vector.shape_cast %67 : vector<1x64x128xf32> to vector<64x128xf32>
    %cst_55 = arith.constant dense<0.000000e+00> : vector<16x128xf32>
    %69 = tpu.matmul %66, %68, %cst_55 {dimension_numbers = #tpu.dot_dimension_numbers<[1], [0], [0], [1], [0, 0, 1, 1], [], []>} : vector<16x64xf32>, vector<64x128xf32>, vector<16x128xf32> -> vector<16x128xf32>
    %70 = arith.addf %65, %69 : vector<16x128xf32>
    %71 = vector.extract_strided_slice %38 {offsets = [96, 0], sizes = [16, 64], strides = [1, 1]} : vector<208x64xf32> to vector<16x64xf32>
    %c6_56 = arith.constant 6 : index
    %c0_57 = arith.constant 0 : index
    %c0_58 = arith.constant 0 : index
    %72 = vector.load %arg5[%c6_56, %c0_57, %c0_58] : memref<13x64x128xf32, #tpu.memory_space<vmem>>, vector<1x64x128xf32>
    %73 = vector.shape_cast %72 : vector<1x64x128xf32> to vector<64x128xf32>
    %cst_59 = arith.constant dense<0.000000e+00> : vector<16x128xf32>
    %74 = tpu.matmul %71, %73, %cst_59 {dimension_numbers = #tpu.dot_dimension_numbers<[1], [0], [0], [1], [0, 0, 1, 1], [], []>} : vector<16x64xf32>, vector<64x128xf32>, vector<16x128xf32> -> vector<16x128xf32>
    %75 = arith.addf %70, %74 : vector<16x128xf32>
    %76 = vector.extract_strided_slice %38 {offsets = [112, 0], sizes = [16, 64], strides = [1, 1]} : vector<208x64xf32> to vector<16x64xf32>
    %c7_60 = arith.constant 7 : index
    %c0_61 = arith.constant 0 : index
    %c0_62 = arith.constant 0 : index
    %77 = vector.load %arg5[%c7_60, %c0_61, %c0_62] : memref<13x64x128xf32, #tpu.memory_space<vmem>>, vector<1x64x128xf32>
    %78 = vector.shape_cast %77 : vector<1x64x128xf32> to vector<64x128xf32>
    %cst_63 = arith.constant dense<0.000000e+00> : vector<16x128xf32>
    %79 = tpu.matmul %76, %78, %cst_63 {dimension_numbers = #tpu.dot_dimension_numbers<[1], [0], [0], [1], [0, 0, 1, 1], [], []>} : vector<16x64xf32>, vector<64x128xf32>, vector<16x128xf32> -> vector<16x128xf32>
    %80 = arith.addf %75, %79 : vector<16x128xf32>
    %81 = vector.extract_strided_slice %38 {offsets = [128, 0], sizes = [16, 64], strides = [1, 1]} : vector<208x64xf32> to vector<16x64xf32>
    %c8_64 = arith.constant 8 : index
    %c0_65 = arith.constant 0 : index
    %c0_66 = arith.constant 0 : index
    %82 = vector.load %arg5[%c8_64, %c0_65, %c0_66] : memref<13x64x128xf32, #tpu.memory_space<vmem>>, vector<1x64x128xf32>
    %83 = vector.shape_cast %82 : vector<1x64x128xf32> to vector<64x128xf32>
    %cst_67 = arith.constant dense<0.000000e+00> : vector<16x128xf32>
    %84 = tpu.matmul %81, %83, %cst_67 {dimension_numbers = #tpu.dot_dimension_numbers<[1], [0], [0], [1], [0, 0, 1, 1], [], []>} : vector<16x64xf32>, vector<64x128xf32>, vector<16x128xf32> -> vector<16x128xf32>
    %85 = arith.addf %80, %84 : vector<16x128xf32>
    %86 = vector.extract_strided_slice %38 {offsets = [144, 0], sizes = [16, 64], strides = [1, 1]} : vector<208x64xf32> to vector<16x64xf32>
    %c9 = arith.constant 9 : index
    %c0_68 = arith.constant 0 : index
    %c0_69 = arith.constant 0 : index
    %87 = vector.load %arg5[%c9, %c0_68, %c0_69] : memref<13x64x128xf32, #tpu.memory_space<vmem>>, vector<1x64x128xf32>
    %88 = vector.shape_cast %87 : vector<1x64x128xf32> to vector<64x128xf32>
    %cst_70 = arith.constant dense<0.000000e+00> : vector<16x128xf32>
    %89 = tpu.matmul %86, %88, %cst_70 {dimension_numbers = #tpu.dot_dimension_numbers<[1], [0], [0], [1], [0, 0, 1, 1], [], []>} : vector<16x64xf32>, vector<64x128xf32>, vector<16x128xf32> -> vector<16x128xf32>
    %90 = arith.addf %85, %89 : vector<16x128xf32>
    %91 = vector.extract_strided_slice %38 {offsets = [160, 0], sizes = [16, 64], strides = [1, 1]} : vector<208x64xf32> to vector<16x64xf32>
    %c10 = arith.constant 10 : index
    %c0_71 = arith.constant 0 : index
    %c0_72 = arith.constant 0 : index
    %92 = vector.load %arg5[%c10, %c0_71, %c0_72] : memref<13x64x128xf32, #tpu.memory_space<vmem>>, vector<1x64x128xf32>
    %93 = vector.shape_cast %92 : vector<1x64x128xf32> to vector<64x128xf32>
    %cst_73 = arith.constant dense<0.000000e+00> : vector<16x128xf32>
    %94 = tpu.matmul %91, %93, %cst_73 {dimension_numbers = #tpu.dot_dimension_numbers<[1], [0], [0], [1], [0, 0, 1, 1], [], []>} : vector<16x64xf32>, vector<64x128xf32>, vector<16x128xf32> -> vector<16x128xf32>
    %95 = arith.addf %90, %94 : vector<16x128xf32>
    %96 = vector.extract_strided_slice %38 {offsets = [176, 0], sizes = [16, 64], strides = [1, 1]} : vector<208x64xf32> to vector<16x64xf32>
    %c11 = arith.constant 11 : index
    %c0_74 = arith.constant 0 : index
    %c0_75 = arith.constant 0 : index
    %97 = vector.load %arg5[%c11, %c0_74, %c0_75] : memref<13x64x128xf32, #tpu.memory_space<vmem>>, vector<1x64x128xf32>
    %98 = vector.shape_cast %97 : vector<1x64x128xf32> to vector<64x128xf32>
    %cst_76 = arith.constant dense<0.000000e+00> : vector<16x128xf32>
    %99 = tpu.matmul %96, %98, %cst_76 {dimension_numbers = #tpu.dot_dimension_numbers<[1], [0], [0], [1], [0, 0, 1, 1], [], []>} : vector<16x64xf32>, vector<64x128xf32>, vector<16x128xf32> -> vector<16x128xf32>
    %100 = arith.addf %95, %99 : vector<16x128xf32>
    %101 = vector.extract_strided_slice %38 {offsets = [192, 0], sizes = [16, 64], strides = [1, 1]} : vector<208x64xf32> to vector<16x64xf32>
    %c12 = arith.constant 12 : index
    %c0_77 = arith.constant 0 : index
    %c0_78 = arith.constant 0 : index
    %102 = vector.load %arg5[%c12, %c0_77, %c0_78] : memref<13x64x128xf32, #tpu.memory_space<vmem>>, vector<1x64x128xf32>
    %103 = vector.shape_cast %102 : vector<1x64x128xf32> to vector<64x128xf32>
    %cst_79 = arith.constant dense<0.000000e+00> : vector<16x128xf32>
    %104 = tpu.matmul %101, %103, %cst_79 {dimension_numbers = #tpu.dot_dimension_numbers<[1], [0], [0], [1], [0, 0, 1, 1], [], []>} : vector<16x64xf32>, vector<64x128xf32>, vector<16x128xf32> -> vector<16x128xf32>
    %105 = arith.addf %100, %104 : vector<16x128xf32>
    %c0_80 = arith.constant 0 : index
    %c0_81 = arith.constant 0 : index
    %106 = vector.load %arg10[%c0_80, %c0_81] : memref<1x1024xf32, #tpu.memory_space<vmem>>, vector<1x1024xf32>
    %107 = arith.truncf %105 : vector<16x128xf32> to vector<16x128xbf16>
    %c0_82 = arith.constant 0 : index
    %c0_83 = arith.constant 0 : index
    %108 = vector.load %arg7[%c0_82, %c0_83] : memref<128x1024xbf16, #tpu.memory_space<vmem>>, vector<128x1024xbf16>
    %cst_84 = arith.constant dense<0.000000e+00> : vector<16x1024xf32>
    %109 = tpu.matmul %107, %108, %cst_84 {dimension_numbers = #tpu.dot_dimension_numbers<[1], [0], [0], [1], [0, 0, 1, 1], [], []>} : vector<16x128xbf16>, vector<128x1024xbf16>, vector<16x1024xf32> -> vector<16x1024xf32>
    %110 = vector.broadcast %106 : vector<1x1024xf32> to vector<16x1024xf32>
    %111 = arith.addf %110, %109 : vector<16x1024xf32>
    %c0_85 = arith.constant 0 : index
    %c0_86 = arith.constant 0 : index
    %112 = vector.load %arg1[%c0_85, %c0_86] : memref<16x200xbf16, #tpu.memory_space<vmem>>, vector<16x200xbf16>
    %c0_87 = arith.constant 0 : index
    %c0_88 = arith.constant 0 : index
    %113 = vector.load %arg8[%c0_87, %c0_88] : memref<200x1024xbf16, #tpu.memory_space<vmem>>, vector<200x1024xbf16>
    %cst_89 = arith.constant dense<0.000000e+00> : vector<16x1024xf32>
    %114 = tpu.matmul %112, %113, %cst_89 {dimension_numbers = #tpu.dot_dimension_numbers<[1], [0], [0], [1], [0, 0, 1, 1], [], []>} : vector<16x200xbf16>, vector<200x1024xbf16>, vector<16x1024xf32> -> vector<16x1024xf32>
    %115 = arith.addf %111, %114 : vector<16x1024xf32>
    %c0_90 = arith.constant 0 : index
    %c0_91 = arith.constant 0 : index
    %116 = vector.load %arg2[%c0_90, %c0_91] : memref<16x29xbf16, #tpu.memory_space<vmem>>, vector<16x29xbf16>
    %c0_92 = arith.constant 0 : index
    %c0_93 = arith.constant 0 : index
    %117 = vector.load %arg9[%c0_92, %c0_93] : memref<29x1024xbf16, #tpu.memory_space<vmem>>, vector<29x1024xbf16>
    %cst_94 = arith.constant dense<0.000000e+00> : vector<16x1024xf32>
    %118 = tpu.matmul %116, %117, %cst_94 {dimension_numbers = #tpu.dot_dimension_numbers<[1], [0], [0], [1], [0, 0, 1, 1], [], []>} : vector<16x29xbf16>, vector<29x1024xbf16>, vector<16x1024xf32> -> vector<16x1024xf32>
    %119 = arith.addf %115, %118 : vector<16x1024xf32>
    %c0_95 = arith.constant 0 : index
    %c0_96 = arith.constant 0 : index
    %120 = vector.load %arg11[%c0_95, %c0_96] : memref<16x1024xf32, #tpu.memory_space<vmem>>, vector<16x1024xf32>
    tpu.vector_store %arg11[%c0_95, %c0_96], %119 {strides = array<i32>} : memref<16x1024xf32, #tpu.memory_space<vmem>>, vector<16x1024xf32>,
    return
  }
}

module attributes {stable_mosaic.version = 11 : i64} {
  func.func @_bilstm_fc3_kernel(%arg0: memref<8x2x1024xf32, #tpu.memory_space<vmem>>, %arg1: memref<128x512xf32, #tpu.memory_space<vmem>>, %arg2: memref<128x512xf32, #tpu.memory_space<vmem>>, %arg3: memref<128x128xf32, #tpu.memory_space<vmem>>, %arg4: memref<128x128xf32, #tpu.memory_space<vmem>>, %arg5: memref<1x1x128xf32, #tpu.memory_space<vmem>>, %arg6: memref<8x2x128xf32, #tpu.memory_space<vmem>>, %arg7: memref<2x128xf32, #tpu.memory_space<vmem>>, %arg8: memref<2x128xf32, #tpu.memory_space<vmem>>, %arg9: memref<2x128xf32, #tpu.memory_space<vmem>>, %arg10: memref<2x128xf32, #tpu.memory_space<vmem>>) attributes {dimension_semantics = [], scalar_prefetch = 0 : i64, scratch_operands = 4 : i64, tpu.core_type = #tpu.core_type<tc>} {
    %c0 = arith.constant 0 : index
    %c0_0 = arith.constant 0 : index
    %0 = vector.load %arg1[%c0, %c0_0] : memref<128x512xf32, #tpu.memory_space<vmem>>, vector<128x512xf32>
    %c0_1 = arith.constant 0 : index
    %c0_2 = arith.constant 0 : index
    %1 = vector.load %arg2[%c0_1, %c0_2] : memref<128x512xf32, #tpu.memory_space<vmem>>, vector<128x512xf32>
    %c0_3 = arith.constant 0 : index
    %c0_4 = arith.constant 0 : index
    %2 = vector.load %arg3[%c0_3, %c0_4] : memref<128x128xf32, #tpu.memory_space<vmem>>, vector<128x128xf32>
    %c0_5 = arith.constant 0 : index
    %c0_6 = arith.constant 0 : index
    %3 = vector.load %arg4[%c0_5, %c0_6] : memref<128x128xf32, #tpu.memory_space<vmem>>, vector<128x128xf32>
    %cst = arith.constant 0.000000e+00 : f32
    %4 = vector.broadcast %cst : f32 to vector<2x128xf32>
    %c0_7 = arith.constant 0 : index
    %c0_8 = arith.constant 0 : index
    %5 = vector.load %arg7[%c0_7, %c0_8] : memref<2x128xf32, #tpu.memory_space<vmem>>, vector<2x128xf32>
    tpu.vector_store %arg7[%c0_7, %c0_8], %4 {strides = array<i32>} : memref<2x128xf32, #tpu.memory_space<vmem>>, vector<2x128xf32>,
    %cst_9 = arith.constant 0.000000e+00 : f32
    %6 = vector.broadcast %cst_9 : f32 to vector<2x128xf32>
    %c0_10 = arith.constant 0 : index
    %c0_11 = arith.constant 0 : index
    %7 = vector.load %arg8[%c0_10, %c0_11] : memref<2x128xf32, #tpu.memory_space<vmem>>, vector<2x128xf32>
    tpu.vector_store %arg8[%c0_10, %c0_11], %6 {strides = array<i32>} : memref<2x128xf32, #tpu.memory_space<vmem>>, vector<2x128xf32>,
    %cst_12 = arith.constant 0.000000e+00 : f32
    %8 = vector.broadcast %cst_12 : f32 to vector<2x128xf32>
    %c0_13 = arith.constant 0 : index
    %c0_14 = arith.constant 0 : index
    %9 = vector.load %arg9[%c0_13, %c0_14] : memref<2x128xf32, #tpu.memory_space<vmem>>, vector<2x128xf32>
    tpu.vector_store %arg9[%c0_13, %c0_14], %8 {strides = array<i32>} : memref<2x128xf32, #tpu.memory_space<vmem>>, vector<2x128xf32>,
    %cst_15 = arith.constant 0.000000e+00 : f32
    %10 = vector.broadcast %cst_15 : f32 to vector<2x128xf32>
    %c0_16 = arith.constant 0 : index
    %c0_17 = arith.constant 0 : index
    %11 = vector.load %arg10[%c0_16, %c0_17] : memref<2x128xf32, #tpu.memory_space<vmem>>, vector<2x128xf32>
    tpu.vector_store %arg10[%c0_16, %c0_17], %10 {strides = array<i32>} : memref<2x128xf32, #tpu.memory_space<vmem>>, vector<2x128xf32>,
    %c0_18 = arith.constant 0 : index
    %c0_19 = arith.constant 0 : index
    %c0_20 = arith.constant 0 : index
    %12 = vector.load %arg5[%c0_18, %c0_19, %c0_20] : memref<1x1x128xf32, #tpu.memory_space<vmem>>, vector<1x1x128xf32>
    %13 = vector.shape_cast %12 : vector<1x1x128xf32> to vector<1x1x128xf32>
    %14 = vector.broadcast %13 : vector<1x1x128xf32> to vector<8x2x128xf32>
    %c0_21 = arith.constant 0 : index
    %c0_22 = arith.constant 0 : index
    %c0_23 = arith.constant 0 : index
    %15 = vector.load %arg6[%c0_21, %c0_22, %c0_23] : memref<8x2x128xf32, #tpu.memory_space<vmem>>, vector<8x2x128xf32>
    tpu.vector_store %arg6[%c0_21, %c0_22, %c0_23], %14 {strides = array<i32>} : memref<8x2x128xf32, #tpu.memory_space<vmem>>, vector<8x2x128xf32>,
    %c0_i32 = arith.constant 0 : i32
    %c8_i32 = arith.constant 8 : i32
    %16 = arith.addi %c0_i32, %c8_i32 : i32
    %c1_i32 = arith.constant 1 : i32
    scf.for %arg11 = %c0_i32 to %16 step %c1_i32  : i32 {
      %c1_i32_25 = arith.constant 1 : i32
      %17 = arith.muli %arg11, %c1_i32_25 : i32
      %c0_i32_26 = arith.constant 0 : i32
      %18 = arith.addi %c0_i32_26, %17 : i32
      %c7_i32 = arith.constant 7 : i32
      %19 = arith.subi %c7_i32, %18 : i32
      %20 = arith.index_cast %18 : i32 to index
      %c0_27 = arith.constant 0 : index
      %c0_28 = arith.constant 0 : index
      %21 = vector.load %arg0[%20, %c0_27, %c0_28] : memref<8x2x1024xf32, #tpu.memory_space<vmem>>, vector<1x2x1024xf32>
      %22 = vector.shape_cast %21 : vector<1x2x1024xf32> to vector<2x1024xf32>
      %23 = arith.index_cast %19 : i32 to index
      %c0_29 = arith.constant 0 : index
      %c0_30 = arith.constant 0 : index
      %24 = vector.load %arg0[%23, %c0_29, %c0_30] : memref<8x2x1024xf32, #tpu.memory_space<vmem>>, vector<1x2x1024xf32>
      %25 = vector.shape_cast %24 : vector<1x2x1024xf32> to vector<2x1024xf32>
      %26 = vector.extract_strided_slice %22 {offsets = [0, 0], sizes = [2, 512], strides = [1, 1]} : vector<2x1024xf32> to vector<2x512xf32>
      %c0_31 = arith.constant 0 : index
      %c0_32 = arith.constant 0 : index
      %27 = vector.load %arg7[%c0_31, %c0_32] : memref<2x128xf32, #tpu.memory_space<vmem>>, vector<2x128xf32>
      %c0_33 = arith.constant 0 : index
      %c0_34 = arith.constant 0 : index
      %28 = vector.load %arg8[%c0_33, %c0_34] : memref<2x128xf32, #tpu.memory_space<vmem>>, vector<2x128xf32>
      %cst_35 = arith.constant dense<0.000000e+00> : vector<2x512xf32>
      %29 = tpu.matmul %27, %0, %cst_35 {dimension_numbers = #tpu.dot_dimension_numbers<[1], [0], [0], [1], [0, 0, 1, 1], [], []>} : vector<2x128xf32>, vector<128x512xf32>, vector<2x512xf32> -> vector<2x512xf32>
      %30 = arith.addf %26, %29 : vector<2x512xf32>
      %31 = vector.extract_strided_slice %30 {offsets = [0, 0], sizes = [2, 128], strides = [1, 1]} : vector<2x512xf32> to vector<2x128xf32>
      %32 = arith.negf %31 : vector<2x128xf32>
      %33 = math.exp %32 : vector<2x128xf32>
      %cst_36 = arith.constant 1.000000e+00 : f32
      %34 = vector.broadcast %cst_36 : f32 to vector<2x128xf32>
      %35 = arith.addf %34, %33 : vector<2x128xf32>
      %36 = arith.divf %34, %35 : vector<2x128xf32>
      %37 = vector.extract_strided_slice %30 {offsets = [0, 128], sizes = [2, 128], strides = [1, 1]} : vector<2x512xf32> to vector<2x128xf32>
      %38 = arith.negf %37 : vector<2x128xf32>
      %39 = math.exp %38 : vector<2x128xf32>
      %cst_37 = arith.constant 1.000000e+00 : f32
      %40 = vector.broadcast %cst_37 : f32 to vector<2x128xf32>
      %41 = arith.addf %40, %39 : vector<2x128xf32>
      %42 = arith.divf %40, %41 : vector<2x128xf32>
      %43 = vector.extract_strided_slice %30 {offsets = [0, 256], sizes = [2, 128], strides = [1, 1]} : vector<2x512xf32> to vector<2x128xf32>
      %44 = math.tanh %43 : vector<2x128xf32>
      %45 = vector.extract_strided_slice %30 {offsets = [0, 384], sizes = [2, 128], strides = [1, 1]} : vector<2x512xf32> to vector<2x128xf32>
      %46 = arith.negf %45 : vector<2x128xf32>
      %47 = math.exp %46 : vector<2x128xf32>
      %cst_38 = arith.constant 1.000000e+00 : f32
      %48 = vector.broadcast %cst_38 : f32 to vector<2x128xf32>
      %49 = arith.addf %48, %47 : vector<2x128xf32>
      %50 = arith.divf %48, %49 : vector<2x128xf32>
      %51 = arith.mulf %42, %28 : vector<2x128xf32>
      %52 = arith.mulf %36, %44 : vector<2x128xf32>
      %53 = arith.addf %51, %52 : vector<2x128xf32>
      %54 = math.tanh %53 : vector<2x128xf32>
      %55 = arith.mulf %50, %54 : vector<2x128xf32>
      %56 = vector.extract_strided_slice %25 {offsets = [0, 512], sizes = [2, 512], strides = [1, 1]} : vector<2x1024xf32> to vector<2x512xf32>
      %c0_39 = arith.constant 0 : index
      %c0_40 = arith.constant 0 : index
      %57 = vector.load %arg9[%c0_39, %c0_40] : memref<2x128xf32, #tpu.memory_space<vmem>>, vector<2x128xf32>
      %c0_41 = arith.constant 0 : index
      %c0_42 = arith.constant 0 : index
      %58 = vector.load %arg10[%c0_41, %c0_42] : memref<2x128xf32, #tpu.memory_space<vmem>>, vector<2x128xf32>
      %cst_43 = arith.constant dense<0.000000e+00> : vector<2x512xf32>
      %59 = tpu.matmul %57, %1, %cst_43 {dimension_numbers = #tpu.dot_dimension_numbers<[1], [0], [0], [1], [0, 0, 1, 1], [], []>} : vector<2x128xf32>, vector<128x512xf32>, vector<2x512xf32> -> vector<2x512xf32>
      %60 = arith.addf %56, %59 : vector<2x512xf32>
      %61 = vector.extract_strided_slice %60 {offsets = [0, 0], sizes = [2, 128], strides = [1, 1]} : vector<2x512xf32> to vector<2x128xf32>
      %62 = arith.negf %61 : vector<2x128xf32>
      %63 = math.exp %62 : vector<2x128xf32>
      %cst_44 = arith.constant 1.000000e+00 : f32
      %64 = vector.broadcast %cst_44 : f32 to vector<2x128xf32>
      %65 = arith.addf %64, %63 : vector<2x128xf32>
      %66 = arith.divf %64, %65 : vector<2x128xf32>
      %67 = vector.extract_strided_slice %60 {offsets = [0, 128], sizes = [2, 128], strides = [1, 1]} : vector<2x512xf32> to vector<2x128xf32>
      %68 = arith.negf %67 : vector<2x128xf32>
      %69 = math.exp %68 : vector<2x128xf32>
      %cst_45 = arith.constant 1.000000e+00 : f32
      %70 = vector.broadcast %cst_45 : f32 to vector<2x128xf32>
      %71 = arith.addf %70, %69 : vector<2x128xf32>
      %72 = arith.divf %70, %71 : vector<2x128xf32>
      %73 = vector.extract_strided_slice %60 {offsets = [0, 256], sizes = [2, 128], strides = [1, 1]} : vector<2x512xf32> to vector<2x128xf32>
      %74 = math.tanh %73 : vector<2x128xf32>
      %75 = vector.extract_strided_slice %60 {offsets = [0, 384], sizes = [2, 128], strides = [1, 1]} : vector<2x512xf32> to vector<2x128xf32>
      %76 = arith.negf %75 : vector<2x128xf32>
      %77 = math.exp %76 : vector<2x128xf32>
      %cst_46 = arith.constant 1.000000e+00 : f32
      %78 = vector.broadcast %cst_46 : f32 to vector<2x128xf32>
      %79 = arith.addf %78, %77 : vector<2x128xf32>
      %80 = arith.divf %78, %79 : vector<2x128xf32>
      %81 = arith.mulf %72, %58 : vector<2x128xf32>
      %82 = arith.mulf %66, %74 : vector<2x128xf32>
      %83 = arith.addf %81, %82 : vector<2x128xf32>
      %84 = math.tanh %83 : vector<2x128xf32>
      %85 = arith.mulf %80, %84 : vector<2x128xf32>
      %c0_47 = arith.constant 0 : index
      %c0_48 = arith.constant 0 : index
      %86 = vector.load %arg7[%c0_47, %c0_48] : memref<2x128xf32, #tpu.memory_space<vmem>>, vector<2x128xf32>
      tpu.vector_store %arg7[%c0_47, %c0_48], %55 {strides = array<i32>} : memref<2x128xf32, #tpu.memory_space<vmem>>, vector<2x128xf32>,
      %c0_49 = arith.constant 0 : index
      %c0_50 = arith.constant 0 : index
      %87 = vector.load %arg8[%c0_49, %c0_50] : memref<2x128xf32, #tpu.memory_space<vmem>>, vector<2x128xf32>
      tpu.vector_store %arg8[%c0_49, %c0_50], %53 {strides = array<i32>} : memref<2x128xf32, #tpu.memory_space<vmem>>, vector<2x128xf32>,
      %c0_51 = arith.constant 0 : index
      %c0_52 = arith.constant 0 : index
      %88 = vector.load %arg9[%c0_51, %c0_52] : memref<2x128xf32, #tpu.memory_space<vmem>>, vector<2x128xf32>
      tpu.vector_store %arg9[%c0_51, %c0_52], %85 {strides = array<i32>} : memref<2x128xf32, #tpu.memory_space<vmem>>, vector<2x128xf32>,
      %c0_53 = arith.constant 0 : index
      %c0_54 = arith.constant 0 : index
      %89 = vector.load %arg10[%c0_53, %c0_54] : memref<2x128xf32, #tpu.memory_space<vmem>>, vector<2x128xf32>
      tpu.vector_store %arg10[%c0_53, %c0_54], %83 {strides = array<i32>} : memref<2x128xf32, #tpu.memory_space<vmem>>, vector<2x128xf32>,
      %90 = arith.index_cast %18 : i32 to index
      %c0_55 = arith.constant 0 : index
      %c0_56 = arith.constant 0 : index
      %91 = vector.load %arg6[%90, %c0_55, %c0_56] : memref<8x2x128xf32, #tpu.memory_space<vmem>>, vector<1x2x128xf32>
      %92 = vector.shape_cast %91 : vector<1x2x128xf32> to vector<2x128xf32>
      %cst_57 = arith.constant dense<0.000000e+00> : vector<2x128xf32>
      %93 = tpu.matmul %55, %2, %cst_57 {dimension_numbers = #tpu.dot_dimension_numbers<[1], [0], [0], [1], [0, 0, 1, 1], [], []>} : vector<2x128xf32>, vector<128x128xf32>, vector<2x128xf32> -> vector<2x128xf32>
      %94 = arith.addf %92, %93 : vector<2x128xf32>
      %95 = arith.index_cast %18 : i32 to index
      %c0_58 = arith.constant 0 : index
      %c0_59 = arith.constant 0 : index
      %96 = vector.load %arg6[%95, %c0_58, %c0_59] : memref<8x2x128xf32, #tpu.memory_space<vmem>>, vector<1x2x128xf32>
      %97 = vector.shape_cast %96 : vector<1x2x128xf32> to vector<2x128xf32>
      %98 = vector.shape_cast %94 : vector<2x128xf32> to vector<1x2x128xf32>
      tpu.vector_store %arg6[%95, %c0_58, %c0_59], %98 {strides = array<i32>} : memref<8x2x128xf32, #tpu.memory_space<vmem>>, vector<1x2x128xf32>,
      %99 = arith.index_cast %19 : i32 to index
      %c0_60 = arith.constant 0 : index
      %c0_61 = arith.constant 0 : index
      %100 = vector.load %arg6[%99, %c0_60, %c0_61] : memref<8x2x128xf32, #tpu.memory_space<vmem>>, vector<1x2x128xf32>
      %101 = vector.shape_cast %100 : vector<1x2x128xf32> to vector<2x128xf32>
      %cst_62 = arith.constant dense<0.000000e+00> : vector<2x128xf32>
      %102 = tpu.matmul %85, %3, %cst_62 {dimension_numbers = #tpu.dot_dimension_numbers<[1], [0], [0], [1], [0, 0, 1, 1], [], []>} : vector<2x128xf32>, vector<128x128xf32>, vector<2x128xf32> -> vector<2x128xf32>
      %103 = arith.addf %101, %102 : vector<2x128xf32>
      %104 = arith.index_cast %19 : i32 to index
      %c0_63 = arith.constant 0 : index
      %c0_64 = arith.constant 0 : index
      %105 = vector.load %arg6[%104, %c0_63, %c0_64] : memref<8x2x128xf32, #tpu.memory_space<vmem>>, vector<1x2x128xf32>
      %106 = vector.shape_cast %105 : vector<1x2x128xf32> to vector<2x128xf32>
      %107 = vector.shape_cast %103 : vector<2x128xf32> to vector<1x2x128xf32>
      tpu.vector_store %arg6[%104, %c0_63, %c0_64], %107 {strides = array<i32>} : memref<8x2x128xf32, #tpu.memory_space<vmem>>, vector<1x2x128xf32>,
    }
    %c8_i32_24 = arith.constant 8 : i32
    return
  }
}

</mosaic_0001>

<bundles_post_ra>
// kernel: bilstm_char_forward.3
= control target key start
LH: loop header
LB: loop body
LE: loop exit
PB: predicated region body
PF: predicated region fallthrough
CT: control target
= control target key end

     0   :  { %s1543_s8 = smov 0   ;;  %s1775_s0 = inlined_call_operand.vmem [shape: f32[8,2,1024], index: 0, kind: input, shape index: {}]   ;;  %s1776_s1 = inlined_call_operand.vmem [shape: f32[128,512], index: 1, kind: input, shape index: {}]   ;;  %s1777_s2 = inlined_call_operand.vmem [shape: f32[128,512], index: 2, kind: input, shape index: {}]   ;;  %s1778_s3 = inlined_call_operand.vmem [shape: f32[128,128], index: 3, kind: input, shape index: {}]   ;;  %s1779_s4 = inlined_call_operand.vmem [shape: f32[128,128], index: 4, kind: input, shape index: {}]   ;;  %s1780_s5 = inlined_call_operand.vmem [shape: f32[1,1,128], index: 5, kind: input, shape index: {}]   ;;  %s1781_s6 = inlined_call_operand.vmem [shape: f32[8,2,128], index: 6, kind: output, shape index: {}]  }
   0x1   :  { %v719_v0 = vld [vmem:[%s1776_s1] sm:$0xff]  ;;  %v724_v1 = vld [vmem:[%s1776_s1 + $0x8] sm:$0xff]  ;;  %v729_v2 = vld [vmem:[%s1776_s1 + $0x10] sm:$0xff] }
   0x2   :  { %1782 = vst [vmem:[#allocation6_spill] sm:$0xff] %v719_v0  ;;  %v734_v3 = vld [vmem:[%s1776_s1 + $0x18] sm:$0xff]  ;;  %v739_v4 = vld [vmem:[%s1776_s1 + $0x20] sm:$0xff]  ;;  %v744_v5 = vld [vmem:[%s1776_s1 + $0x28] sm:$0xff] }
   0x3   :  { %1783 = vst [vmem:[#allocation7_spill] sm:$0xff] %v724_v1  ;;  %v749_v6 = vld [vmem:[%s1776_s1 + $0x30] sm:$0xff]  ;;  %v754_v7 = vld [vmem:[%s1776_s1 + $0x38] sm:$0xff]  ;;  %v759_v8 = vld [vmem:[%s1776_s1 + $0x40] sm:$0xff] }
   0x4   :  { %1784 = vst [vmem:[#allocation8_spill] sm:$0xff] %v729_v2  ;;  %v764_v9 = vld [vmem:[%s1776_s1 + $0x48] sm:$0xff]  ;;  %v769_v10 = vld [vmem:[%s1776_s1 + $0x50] sm:$0xff]  ;;  %v774_v11 = vld [vmem:[%s1776_s1 + $0x58] sm:$0xff] }
   0x5   :  { %1785 = vst [vmem:[#allocation9_spill] sm:$0xff] %v734_v3  ;;  %v779_v12 = vld [vmem:[%s1776_s1 + $0x60] sm:$0xff]  ;;  %v784_v13 = vld [vmem:[%s1776_s1 + $0x68] sm:$0xff]  ;;  %v789_v14 = vld [vmem:[%s1776_s1 + $0x70] sm:$0xff]  ;;  %v680_v3 = vmov 0.0  }
   0x6   :  { %1786 = vst [vmem:[#allocation10_spill] sm:$0xff] %v739_v4  ;;  %v794_v15 = vld [vmem:[%s1776_s1 + $0x78] sm:$0xff]  ;;  %v799_v16 = vld [vmem:[%s1776_s1 + $0x80] sm:$0xff]  ;;  %v804_v17 = vld [vmem:[%s1776_s1 + $0x88] sm:$0xff] }
   0x7   :  { %1787 = vst [vmem:[#allocation11_spill] sm:$0xff] %v744_v5  ;;  %v809_v18 = vld [vmem:[%s1776_s1 + $0x90] sm:$0xff]  ;;  %v814_v19 = vld [vmem:[%s1776_s1 + $0x98] sm:$0xff]  ;;  %v819_v20 = vld [vmem:[%s1776_s1 + $0xa0] sm:$0xff] }
   0x8   :  { %1788 = vst [vmem:[#allocation12_spill] sm:$0xff] %v749_v6  ;;  %v824_v21 = vld [vmem:[%s1776_s1 + $0xa8] sm:$0xff]  ;;  %v829_v22 = vld [vmem:[%s1776_s1 + $0xb0] sm:$0xff]  ;;  %v834_v23 = vld [vmem:[%s1776_s1 + $0xb8] sm:$0xff] }
   0x9   :  { %1789 = vst [vmem:[#allocation13_spill] sm:$0xff] %v754_v7  ;;  %v839_v24 = vld [vmem:[%s1776_s1 + $0xc0] sm:$0xff]  ;;  %v844_v25 = vld [vmem:[%s1776_s1 + $0xc8] sm:$0xff]  ;;  %v849_v26 = vld [vmem:[%s1776_s1 + $0xd0] sm:$0xff] }
   0xa   :  { %1790 = vst [vmem:[#allocation14_spill] sm:$0xff] %v759_v8  ;;  %v854_v27 = vld [vmem:[%s1776_s1 + $0xd8] sm:$0xff]  ;;  %v859_v28 = vld [vmem:[%s1776_s1 + $0xe0] sm:$0xff]  ;;  %v864_v29 = vld [vmem:[%s1776_s1 + $0xe8] sm:$0xff] }
   0xb   :  { %1791 = vst [vmem:[#allocation15_spill] sm:$0xff] %v764_v9  ;;  %v869_v30 = vld [vmem:[%s1776_s1 + $0xf0] sm:$0xff]  ;;  %v874_v31 = vld [vmem:[%s1776_s1 + $0xf8] sm:$0xff]  ;;  %v879_v32 = vld [vmem:[%s1776_s1 + $0x100] sm:$0xff] }
   0xc   :  { %1792 = vst [vmem:[#allocation16_spill] sm:$0xff] %v769_v10  ;;  %v884_v33 = vld [vmem:[%s1776_s1 + $0x108] sm:$0xff]  ;;  %v889_v34 = vld [vmem:[%s1776_s1 + $0x110] sm:$0xff]  ;;  %v894_v35 = vld [vmem:[%s1776_s1 + $0x118] sm:$0xff] }
   0xd   :  { %1793 = vst [vmem:[#allocation17_spill] sm:$0xff] %v774_v11  ;;  %v899_v36 = vld [vmem:[%s1776_s1 + $0x120] sm:$0xff]  ;;  %v904_v37 = vld [vmem:[%s1776_s1 + $0x128] sm:$0xff]  ;;  %v909_v38 = vld [vmem:[%s1776_s1 + $0x130] sm:$0xff] }
   0xe   :  { %1794 = vst [vmem:[#allocation18_spill] sm:$0xff] %v779_v12  ;;  %v914_v39 = vld [vmem:[%s1776_s1 + $0x138] sm:$0xff]  ;;  %v919_v40 = vld [vmem:[%s1776_s1 + $0x140] sm:$0xff]  ;;  %v924_v41 = vld [vmem:[%s1776_s1 + $0x148] sm:$0xff] }
   0xf   :  { %1795 = vst [vmem:[#allocation19_spill] sm:$0xff] %v784_v13  ;;  %v929_v42 = vld [vmem:[%s1776_s1 + $0x150] sm:$0xff]  ;;  %v934_v43 = vld [vmem:[%s1776_s1 + $0x158] sm:$0xff]  ;;  %v939_v44 = vld [vmem:[%s1776_s1 + $0x160] sm:$0xff] }
  0x10   :  { %1796 = vst [vmem:[#allocation20_spill] sm:$0xff] %v789_v14  ;;  %v944_v45 = vld [vmem:[%s1776_s1 + $0x168] sm:$0xff]  ;;  %v949_v46 = vld [vmem:[%s1776_s1 + $0x170] sm:$0xff]  ;;  %v954_v47 = vld [vmem:[%s1776_s1 + $0x178] sm:$0xff] }
  0x11   :  { %1797 = vst [vmem:[#allocation21_spill] sm:$0xff] %v794_v15  ;;  %v959_v48 = vld [vmem:[%s1776_s1 + $0x180] sm:$0xff]  ;;  %v964_v49 = vld [vmem:[%s1776_s1 + $0x188] sm:$0xff]  ;;  %v969_v50 = vld [vmem:[%s1776_s1 + $0x190] sm:$0xff] }
  0x12   :  { %1798 = vst [vmem:[#allocation22_spill] sm:$0xff] %v799_v16  ;;  %v974_v51 = vld [vmem:[%s1776_s1 + $0x198] sm:$0xff]  ;;  %v979_v52 = vld [vmem:[%s1776_s1 + $0x1a0] sm:$0xff]  ;;  %v984_v53 = vld [vmem:[%s1776_s1 + $0x1a8] sm:$0xff] }
  0x13   :  { %1799 = vst [vmem:[#allocation23_spill] sm:$0xff] %v804_v17  ;;  %v989_v54 = vld [vmem:[%s1776_s1 + $0x1b0] sm:$0xff]  ;;  %v994_v55 = vld [vmem:[%s1776_s1 + $0x1b8] sm:$0xff]  ;;  %v999_v56 = vld [vmem:[%s1776_s1 + $0x1c0] sm:$0xff] }
  0x14   :  { %1800 = vst [vmem:[#allocation24_spill] sm:$0xff] %v809_v18  ;;  %v1004_v57 = vld [vmem:[%s1776_s1 + $0x1c8] sm:$0xff]  ;;  %v1009_v58 = vld [vmem:[%s1776_s1 + $0x1d0] sm:$0xff]  ;;  %v1014_v59 = vld [vmem:[%s1776_s1 + $0x1d8] sm:$0xff] }
  0x15   :  { %1801 = vst [vmem:[#allocation25_spill] sm:$0xff] %v814_v19  ;;  %v1019_v60 = vld [vmem:[%s1776_s1 + $0x1e0] sm:$0xff]  ;;  %v1024_v61 = vld [vmem:[%s1776_s1 + $0x1e8] sm:$0xff]  ;;  %v1029_v62 = vld [vmem:[%s1776_s1 + $0x1f0] sm:$0xff] }
  0x16   :  { %1802 = vst [vmem:[#allocation26_spill] sm:$0xff] %v819_v20  ;;  %v1034_v63 = vld [vmem:[%s1776_s1 + $0x1f8] sm:$0xff]  ;;  %v1039_v0 = vld [vmem:[%s1777_s2] sm:$0xff]  ;;  %v1044_v1 = vld [vmem:[%s1777_s2 + $0x8] sm:$0xff] }
  0x17   :  { %1803 = vst [vmem:[#allocation27_spill] sm:$0xff] %v824_v21  ;;  %v1049_v2 = vld [vmem:[%s1777_s2 + $0x10] sm:$0xff]  ;;  %v1054_v4 = vld [vmem:[%s1777_s2 + $0x18] sm:$0xff] }
  0x18   :  { %1804 = vst [vmem:[#allocation28_spill] sm:$0xff] %v829_v22 }
  0x19   :  { %1805 = vst [vmem:[#allocation29_spill] sm:$0xff] %v834_v23 }
  0x1a   :  { %1806 = vst [vmem:[#allocation30_spill] sm:$0xff] %v839_v24 }
  0x1b   :  { %1807 = vst [vmem:[#allocation31_spill] sm:$0xff] %v844_v25 }
  0x1c   :  { %1808 = vst [vmem:[#allocation32_spill] sm:$0xff] %v849_v26 }
  0x1d   :  { %1809 = vst [vmem:[#allocation33_spill] sm:$0xff] %v854_v27 }
  0x1e   :  { %1810 = vst [vmem:[#allocation34_spill] sm:$0xff] %v859_v28 }
  0x1f   :  { %1811 = vst [vmem:[#allocation35_spill] sm:$0xff] %v1039_v0  ;;  %v1059_v0 = vld [vmem:[%s1777_s2 + $0x20] sm:$0xff] }
  0x20   :  { %1812 = vst [vmem:[#allocation36_spill] sm:$0xff] %v1044_v1  ;;  %v1064_v1 = vld [vmem:[%s1777_s2 + $0x28] sm:$0xff] }
  0x21   :  { %183 = vst [vmem:[#allocation2] sm:$0x3] %v680_v3 }
  0x22   :  { %1813 = vst [vmem:[#allocation37_spill] sm:$0xff] %v1049_v2  ;;  %v1069_v2 = vld [vmem:[%s1777_s2 + $0x30] sm:$0xff] }
  0x23   :  { %1814 = vst [vmem:[#allocation38_spill] sm:$0xff] %v1054_v4  ;;  %v1074_v4 = vld [vmem:[%s1777_s2 + $0x38] sm:$0xff] }
  0x24   :  { %1815 = vst [vmem:[#allocation39_spill] sm:$0xff] %v1059_v0  ;;  %v1079_v0 = vld [vmem:[%s1777_s2 + $0x40] sm:$0xff] }
  0x25   :  { %184 = vst [vmem:[#allocation3] sm:$0x3] %v680_v3 }
  0x26   :  { %1816 = vst [vmem:[#allocation40_spill] sm:$0xff] %v1064_v1  ;;  %v1084_v1 = vld [vmem:[%s1777_s2 + $0x48] sm:$0xff] }
  0x27   :  { %1817 = vst [vmem:[#allocation41_spill] sm:$0xff] %v1069_v2  ;;  %v1089_v2 = vld [vmem:[%s1777_s2 + $0x50] sm:$0xff] }
  0x28   :  { %1818 = vst [vmem:[#allocation42_spill] sm:$0xff] %v1074_v4  ;;  %v1094_v4 = vld [vmem:[%s1777_s2 + $0x58] sm:$0xff] }
  0x29   :  { %185 = vst [vmem:[#allocation4] sm:$0x3] %v680_v3 }
  0x2a   :  { %1819 = vst [vmem:[#allocation43_spill] sm:$0xff] %v1079_v0  ;;  %v1099_v0 = vld [vmem:[%s1777_s2 + $0x60] sm:$0xff] }
  0x2b   :  { %1820 = vst [vmem:[#allocation44_spill] sm:$0xff] %v1084_v1  ;;  %v1104_v1 = vld [vmem:[%s1777_s2 + $0x68] sm:$0xff] }
  0x2c   :  { %1821 = vst [vmem:[#allocation45_spill] sm:$0xff] %v1089_v2  ;;  %v1109_v2 = vld [vmem:[%s1777_s2 + $0x70] sm:$0xff] }
  0x2d   :  { %186 = vst [vmem:[#allocation5] sm:$0x3] %v680_v3  ;;  %v1114_v3 = vld [vmem:[%s1777_s2 + $0x78] sm:$0xff] }
  0x2e   :  { %1822 = vst [vmem:[#allocation46_spill] sm:$0xff] %v1094_v4  ;;  %v1119_v4 = vld [vmem:[%s1777_s2 + $0x80] sm:$0xff] }
  0x2f   :  { %1823 = vst [vmem:[#allocation47_spill] sm:$0xff] %v1099_v0  ;;  %v1124_v0 = vld [vmem:[%s1777_s2 + $0x88] sm:$0xff] }
  0x30   :  { %1824 = vst [vmem:[#allocation48_spill] sm:$0xff] %v1104_v1  ;;  %v1129_v1 = vld [vmem:[%s1777_s2 + $0x90] sm:$0xff] }
  0x31   :  { %1825 = vst [vmem:[#allocation49_spill] sm:$0xff] %v1109_v2  ;;  %v1134_v2 = vld [vmem:[%s1777_s2 + $0x98] sm:$0xff] }
  0x32   :  { %1826 = vst [vmem:[#allocation50_spill] sm:$0xff] %v1114_v3  ;;  %v1139_v3 = vld [vmem:[%s1777_s2 + $0xa0] sm:$0xff] }
  0x33   :  { %1827 = vst [vmem:[#allocation51_spill] sm:$0xff] %v1119_v4  ;;  %v1144_v4 = vld [vmem:[%s1777_s2 + $0xa8] sm:$0xff] }
  0x34   :  { %1828 = vst [vmem:[#allocation52_spill] sm:$0xff] %v1124_v0  ;;  %v1149_v0 = vld [vmem:[%s1777_s2 + $0xb0] sm:$0xff] }
  0x35   :  { %1829 = vst [vmem:[#allocation53_spill] sm:$0xff] %v1129_v1  ;;  %v1154_v1 = vld [vmem:[%s1777_s2 + $0xb8] sm:$0xff] }
  0x36   :  { %1830 = vst [vmem:[#allocation54_spill] sm:$0xff] %v1134_v2  ;;  %v1159_v2 = vld [vmem:[%s1777_s2 + $0xc0] sm:$0xff] }
  0x37   :  { %1831 = vst [vmem:[#allocation55_spill] sm:$0xff] %v1139_v3  ;;  %v1164_v3 = vld [vmem:[%s1777_s2 + $0xc8] sm:$0xff] }
  0x38   :  { %1832 = vst [vmem:[#allocation56_spill] sm:$0xff] %v1144_v4  ;;  %v1169_v4 = vld [vmem:[%s1777_s2 + $0xd0] sm:$0xff] }
  0x39   :  { %1833 = vst [vmem:[#allocation57_spill] sm:$0xff] %v1149_v0  ;;  %v1174_v0 = vld [vmem:[%s1777_s2 + $0xd8] sm:$0xff] }
  0x3a   :  { %1834 = vst [vmem:[#allocation58_spill] sm:$0xff] %v1154_v1  ;;  %v1179_v1 = vld [vmem:[%s1777_s2 + $0xe0] sm:$0xff] }
  0x3b   :  { %1835 = vst [vmem:[#allocation59_spill] sm:$0xff] %v1159_v2  ;;  %v1184_v2 = vld [vmem:[%s1777_s2 + $0xe8] sm:$0xff] }
  0x3c   :  { %1836 = vst [vmem:[#allocation60_spill] sm:$0xff] %v1164_v3  ;;  %v1189_v3 = vld [vmem:[%s1777_s2 + $0xf0] sm:$0xff] }
  0x3d   :  { %1837 = vst [vmem:[#allocation61_spill] sm:$0xff] %v1169_v4  ;;  %v1194_v4 = vld [vmem:[%s1777_s2 + $0xf8] sm:$0xff] }
  0x3e   :  { %1838 = vst [vmem:[#allocation62_spill] sm:$0xff] %v1174_v0  ;;  %v1199_v0 = vld [vmem:[%s1777_s2 + $0x100] sm:$0xff] }
  0x3f   :  { %1839 = vst [vmem:[#allocation63_spill] sm:$0xff] %v1179_v1  ;;  %v1204_v1 = vld [vmem:[%s1777_s2 + $0x108] sm:$0xff] }
  0x40   :  { %1840 = vst [vmem:[#allocation64_spill] sm:$0xff] %v1184_v2  ;;  %v1209_v2 = vld [vmem:[%s1777_s2 + $0x110] sm:$0xff] }
  0x41   :  { %1841 = vst [vmem:[#allocation65_spill] sm:$0xff] %v1189_v3  ;;  %v1214_v3 = vld [vmem:[%s1777_s2 + $0x118] sm:$0xff] }
  0x42   :  { %1842 = vst [vmem:[#allocation66_spill] sm:$0xff] %v1194_v4  ;;  %v1219_v4 = vld [vmem:[%s1777_s2 + $0x120] sm:$0xff] }
  0x43   :  { %1843 = vst [vmem:[#allocation67_spill] sm:$0xff] %v1199_v0  ;;  %v1224_v0 = vld [vmem:[%s1777_s2 + $0x128] sm:$0xff] }
  0x44   :  { %1844 = vst [vmem:[#allocation68_spill] sm:$0xff] %v1204_v1  ;;  %v1229_v1 = vld [vmem:[%s1777_s2 + $0x130] sm:$0xff] }
  0x45   :  { %1845 = vst [vmem:[#allocation69_spill] sm:$0xff] %v1209_v2  ;;  %v1234_v2 = vld [vmem:[%s1777_s2 + $0x138] sm:$0xff] }
  0x46   :  { %1846 = vst [vmem:[#allocation70_spill] sm:$0xff] %v1214_v3  ;;  %v1239_v3 = vld [vmem:[%s1777_s2 + $0x140] sm:$0xff] }
  0x47   :  { %1847 = vst [vmem:[#allocation71_spill] sm:$0xff] %v1219_v4  ;;  %v1244_v4 = vld [vmem:[%s1777_s2 + $0x148] sm:$0xff] }
  0x48   :  { %1848 = vst [vmem:[#allocation72_spill] sm:$0xff] %v1224_v0  ;;  %v1249_v0 = vld [vmem:[%s1777_s2 + $0x150] sm:$0xff] }
  0x49   :  { %1849 = vst [vmem:[#allocation73_spill] sm:$0xff] %v1229_v1  ;;  %v1254_v1 = vld [vmem:[%s1777_s2 + $0x158] sm:$0xff] }
  0x4a   :  { %1850 = vst [vmem:[#allocation74_spill] sm:$0xff] %v1234_v2  ;;  %v1259_v2 = vld [vmem:[%s1777_s2 + $0x160] sm:$0xff] }
  0x4b   :  { %1851 = vst [vmem:[#allocation75_spill] sm:$0xff] %v1239_v3  ;;  %v1264_v3 = vld [vmem:[%s1777_s2 + $0x168] sm:$0xff] }
  0x4c   :  { %1852 = vst [vmem:[#allocation76_spill] sm:$0xff] %v1244_v4  ;;  %v1269_v4 = vld [vmem:[%s1777_s2 + $0x170] sm:$0xff] }
  0x4d   :  { %1853 = vst [vmem:[#allocation77_spill] sm:$0xff] %v1249_v0  ;;  %v1274_v0 = vld [vmem:[%s1777_s2 + $0x178] sm:$0xff] }
  0x4e   :  { %1854 = vst [vmem:[#allocation78_spill] sm:$0xff] %v1254_v1  ;;  %v1279_v1 = vld [vmem:[%s1777_s2 + $0x180] sm:$0xff] }
  0x4f   :  { %1855 = vst [vmem:[#allocation79_spill] sm:$0xff] %v1259_v2  ;;  %v1284_v2 = vld [vmem:[%s1777_s2 + $0x188] sm:$0xff] }
  0x50   :  { %1856 = vst [vmem:[#allocation80_spill] sm:$0xff] %v1264_v3  ;;  %v1289_v3 = vld [vmem:[%s1777_s2 + $0x190] sm:$0xff] }
  0x51   :  { %1857 = vst [vmem:[#allocation81_spill] sm:$0xff] %v1269_v4  ;;  %v1294_v4 = vld [vmem:[%s1777_s2 + $0x198] sm:$0xff] }
  0x52   :  { %1858 = vst [vmem:[#allocation82_spill] sm:$0xff] %v1274_v0  ;;  %v1299_v0 = vld [vmem:[%s1777_s2 + $0x1a0] sm:$0xff] }
  0x53   :  { %1859 = vst [vmem:[#allocation83_spill] sm:$0xff] %v1279_v1  ;;  %v1304_v1 = vld [vmem:[%s1777_s2 + $0x1a8] sm:$0xff] }
  0x54   :  { %1860 = vst [vmem:[#allocation84_spill] sm:$0xff] %v1284_v2  ;;  %v1309_v2 = vld [vmem:[%s1777_s2 + $0x1b0] sm:$0xff] }
  0x55   :  { %1861 = vst [vmem:[#allocation85_spill] sm:$0xff] %v1289_v3  ;;  %v1314_v3 = vld [vmem:[%s1777_s2 + $0x1b8] sm:$0xff] }
  0x56   :  { %1862 = vst [vmem:[#allocation86_spill] sm:$0xff] %v1294_v4  ;;  %v1319_v4 = vld [vmem:[%s1777_s2 + $0x1c0] sm:$0xff] }
  0x57   :  { %1863 = vst [vmem:[#allocation87_spill] sm:$0xff] %v1299_v0  ;;  %v1324_v0 = vld [vmem:[%s1777_s2 + $0x1c8] sm:$0xff] }
  0x58   :  { %1864 = vst [vmem:[#allocation88_spill] sm:$0xff] %v1304_v1  ;;  %v1329_v1 = vld [vmem:[%s1777_s2 + $0x1d0] sm:$0xff] }
  0x59   :  { %1865 = vst [vmem:[#allocation89_spill] sm:$0xff] %v1309_v2  ;;  %v1334_v2 = vld [vmem:[%s1777_s2 + $0x1d8] sm:$0xff] }
  0x5a   :  { %1866 = vst [vmem:[#allocation90_spill] sm:$0xff] %v1314_v3  ;;  %v1339_v3 = vld [vmem:[%s1777_s2 + $0x1e0] sm:$0xff] }
  0x5b   :  { %1867 = vst [vmem:[#allocation91_spill] sm:$0xff] %v1319_v4  ;;  %v1344_v4 = vld [vmem:[%s1777_s2 + $0x1e8] sm:$0xff] }
  0x5c   :  { %1868 = vst [vmem:[#allocation92_spill] sm:$0xff] %v1324_v0  ;;  %v1349_v0 = vld [vmem:[%s1777_s2 + $0x1f0] sm:$0xff] }
  0x5d   :  { %1869 = vst [vmem:[#allocation93_spill] sm:$0xff] %v1329_v1  ;;  %v1354_v1 = vld [vmem:[%s1777_s2 + $0x1f8] sm:$0xff] }
  0x5e   :  { %1870 = vst [vmem:[#allocation94_spill] sm:$0xff] %v1334_v2  ;;  %v1359_v2 = vld [vmem:[%s1778_s3] sm:$0xff] }
  0x5f   :  { %1871 = vst [vmem:[#allocation95_spill] sm:$0xff] %v1339_v3  ;;  %v1364_v3 = vld [vmem:[%s1778_s3 + $0x8] sm:$0xff] }
  0x60   :  { %1872 = vst [vmem:[#allocation96_spill] sm:$0xff] %v1344_v4  ;;  %v1369_v4 = vld [vmem:[%s1778_s3 + $0x10] sm:$0xff] }
  0x61   :  { %1873 = vst [vmem:[#allocation97_spill] sm:$0xff] %v1349_v0  ;;  %v1374_v0 = vld [vmem:[%s1778_s3 + $0x18] sm:$0xff] }
  0x62   :  { %1874 = vst [vmem:[#allocation98_spill] sm:$0xff] %v1354_v1  ;;  %v1379_v1 = vld [vmem:[%s1778_s3 + $0x20] sm:$0xff] }
  0x63   :  { %1875 = vst [vmem:[#allocation99_spill] sm:$0xff] %v1359_v2  ;;  %v1384_v2 = vld [vmem:[%s1778_s3 + $0x28] sm:$0xff] }
  0x64   :  { %1876 = vst [vmem:[#allocation100_spill] sm:$0xff] %v1364_v3  ;;  %v1389_v3 = vld [vmem:[%s1778_s3 + $0x30] sm:$0xff] }
  0x65   :  { %1877 = vst [vmem:[#allocation101_spill] sm:$0xff] %v1369_v4  ;;  %v1394_v4 = vld [vmem:[%s1778_s3 + $0x38] sm:$0xff] }
  0x66   :  { %1878 = vst [vmem:[#allocation102_spill] sm:$0xff] %v1374_v0  ;;  %v1399_v0 = vld [vmem:[%s1778_s3 + $0x40] sm:$0xff] }
  0x67   :  { %1879 = vst [vmem:[#allocation103_spill] sm:$0xff] %v1379_v1  ;;  %v1404_v1 = vld [vmem:[%s1778_s3 + $0x48] sm:$0xff] }
  0x68   :  { %1880 = vst [vmem:[#allocation104_spill] sm:$0xff] %v1384_v2  ;;  %v1409_v2 = vld [vmem:[%s1778_s3 + $0x50] sm:$0xff] }
  0x69   :  { %1881 = vst [vmem:[#allocation105_spill] sm:$0xff] %v1389_v3  ;;  %v1414_v3 = vld [vmem:[%s1778_s3 + $0x58] sm:$0xff] }
  0x6a   :  { %1882 = vst [vmem:[#allocation106_spill] sm:$0xff] %v1394_v4  ;;  %v1419_v4 = vld [vmem:[%s1778_s3 + $0x60] sm:$0xff] }
  0x6b   :  { %1883 = vst [vmem:[#allocation107_spill] sm:$0xff] %v1399_v0  ;;  %v1424_v0 = vld [vmem:[%s1778_s3 + $0x68] sm:$0xff] }
  0x6c   :  { %1884 = vst [vmem:[#allocation108_spill] sm:$0xff] %v1404_v1  ;;  %v1429_v1 = vld [vmem:[%s1778_s3 + $0x70] sm:$0xff] }
  0x6d   :  { %1885 = vst [vmem:[#allocation109_spill] sm:$0xff] %v1409_v2  ;;  %v1434_v2 = vld [vmem:[%s1778_s3 + $0x78] sm:$0xff] }
  0x6e   :  { %1886 = vst [vmem:[#allocation110_spill] sm:$0xff] %v1414_v3  ;;  %v1439_v3 = vld [vmem:[%s1779_s4] sm:$0xff] }
  0x6f   :  { %1887 = vst [vmem:[#allocation111_spill] sm:$0xff] %v1419_v4  ;;  %v1444_v4 = vld [vmem:[%s1779_s4 + $0x8] sm:$0xff] }
  0x70   :  { %1888 = vst [vmem:[#allocation112_spill] sm:$0xff] %v1424_v0  ;;  %v1449_v0 = vld [vmem:[%s1779_s4 + $0x10] sm:$0xff] }
  0x71   :  { %1889 = vst [vmem:[#allocation113_spill] sm:$0xff] %v1429_v1  ;;  %v1454_v1 = vld [vmem:[%s1779_s4 + $0x18] sm:$0xff] }
  0x72   :  { %1890 = vst [vmem:[#allocation114_spill] sm:$0xff] %v1434_v2  ;;  %v1459_v2 = vld [vmem:[%s1779_s4 + $0x20] sm:$0xff] }
  0x73   :  { %1891 = vst [vmem:[#allocation115_spill] sm:$0xff] %v1439_v3  ;;  %v1464_v3 = vld [vmem:[%s1779_s4 + $0x28] sm:$0xff] }
  0x74   :  { %1892 = vst [vmem:[#allocation116_spill] sm:$0xff] %v1444_v4  ;;  %v1469_v4 = vld [vmem:[%s1779_s4 + $0x30] sm:$0xff] }
  0x75   :  { %1893 = vst [vmem:[#allocation117_spill] sm:$0xff] %v1449_v0  ;;  %v1474_v0 = vld [vmem:[%s1779_s4 + $0x38] sm:$0xff] }
  0x76   :  { %1894 = vst [vmem:[#allocation118_spill] sm:$0xff] %v1454_v1  ;;  %v1479_v1 = vld [vmem:[%s1779_s4 + $0x40] sm:$0xff] }
  0x77   :  { %1895 = vst [vmem:[#allocation119_spill] sm:$0xff] %v1459_v2  ;;  %v1484_v2 = vld [vmem:[%s1779_s4 + $0x48] sm:$0xff] }
  0x78   :  { %1896 = vst [vmem:[#allocation120_spill] sm:$0xff] %v1464_v3  ;;  %v1489_v3 = vld [vmem:[%s1779_s4 + $0x50] sm:$0xff] }
  0x79   :  { %1897 = vst [vmem:[#allocation121_spill] sm:$0xff] %v1469_v4  ;;  %v1494_v4 = vld [vmem:[%s1779_s4 + $0x58] sm:$0xff] }
  0x7a   :  { %1898 = vst [vmem:[#allocation122_spill] sm:$0xff] %v1474_v0  ;;  %v1499_v0 = vld [vmem:[%s1779_s4 + $0x60] sm:$0xff] }
  0x7b   :  { %1899 = vst [vmem:[#allocation123_spill] sm:$0xff] %v1479_v1  ;;  %v1504_v1 = vld [vmem:[%s1779_s4 + $0x68] sm:$0xff] }
  0x7c   :  { %1900 = vst [vmem:[#allocation124_spill] sm:$0xff] %v1484_v2  ;;  %v1509_v2 = vld [vmem:[%s1779_s4 + $0x70] sm:$0xff] }
  0x7d   :  { %1901 = vst [vmem:[#allocation125_spill] sm:$0xff] %v1489_v3  ;;  %v1514_v3 = vld [vmem:[%s1779_s4 + $0x78] sm:$0xff] }
  0x7e   :  { %1902 = vst [vmem:[#allocation126_spill] sm:$0xff] %v1494_v4  ;;  %v639_v4 = vld [vmem:[%s1780_s5] ss:$0 sm:$0xff] }
  0x7f   :  { %1903 = vst [vmem:[#allocation127_spill] sm:$0xff] %v1499_v0 }
  0x80   :  { %1904 = vst [vmem:[#allocation128_spill] sm:$0xff] %v1504_v1 }
  0x81   :  { %1905 = vst [vmem:[#allocation129_spill] sm:$0xff] %v1509_v2 }
  0x82   :  { %1906 = vst [vmem:[#allocation130_spill] sm:$0xff] %v1514_v3 }
  0x83   :  { %191 = vst [vmem:[%s1781_s6] sm:$0x3] %v639_v4 }
  0x84   :  { %192 = vst [vmem:[%s1781_s6 + $0x2] sm:$0x3] %v639_v4 }
  0x85   :  { %193 = vst [vmem:[%s1781_s6 + $0x4] sm:$0x3] %v639_v4 }
  0x86   :  { %194 = vst [vmem:[%s1781_s6 + $0x6] sm:$0x3] %v639_v4 }
  0x87   :  { %195 = vst [vmem:[%s1781_s6 + $0x8] sm:$0x3] %v639_v4 }
  0x88   :  { %196 = vst [vmem:[%s1781_s6 + $0xa] sm:$0x3] %v639_v4 }
  0x89   :  { %197 = vst [vmem:[%s1781_s6 + $0xc] sm:$0x3] %v639_v4 }
  0x8a   :  { %198 = vst [vmem:[%s1781_s6 + $0xe] sm:$0x3] %v639_v4 }
  0x8b LB: > { %256 = vmatpush.msra.mxu2 %v1029_v62  ;;  %276 = vmatpush.msra.mxu3 %v1034_v63  ;;  %v1907_v28 = vld [vmem:[#allocation34_spill] sm:$0xff]  ;;  %v1908_v26 = vld [vmem:[#allocation32_spill] sm:$0xff]  ;;  %v1909_v27 = vld [vmem:[#allocation33_spill] sm:$0xff]  ;;  %s628_s9 = sshll.u32 %s678_s8, 4  ;;  %vm303_vm0 = vcmask 1041408   ;;  %vm305_vm1 = vcmask 1045508   ;;  %s678_s8 = sphi %s1543_s8, %s204_s8  }
  0x8c   : > { %236 = vmatpush.msra.mxu1 %v1024_v61  ;;  %216 = vmatpush.msra.mxu0 %v1019_v60  ;;  %v1910_v25 = vld [vmem:[#allocation31_spill] sm:$0xff]  ;;  %v1911_v24 = vld [vmem:[#allocation30_spill] sm:$0xff]  ;;  %v1912_v22 = vld [vmem:[#allocation28_spill] sm:$0xff]  ;;  %s208_s1 = scalar_lea.vmem %s1775_s0, %s628_s9  ;;  %vm307_vm2 = vcmask 1043456   ;;  %s205_s12 = ssub.s32 7, %s678_s8 }
  0x8d   : > { %257 = vmatpush.msra.mxu2 %v1009_v58  ;;  %277 = vmatpush.msra.mxu3 %v1014_v59  ;;  %v1913_v23 = vld [vmem:[#allocation29_spill] sm:$0xff]  ;;  %v1914_v21 = vld [vmem:[#allocation27_spill] sm:$0xff]  ;;  %v1915_v20 = vld [vmem:[#allocation26_spill] sm:$0xff]  ;;  %s629_s13 = sshll.u32 %s205_s12, 4  ;;  %s626_s16 = sshll.u32 %s678_s8, 1 }
  0x8e   : > { %237 = vmatpush.msra.mxu1 %v1004_v57  ;;  %217 = vmatpush.msra.mxu0 %v999_v56  ;;  %v1916_v18 = vld [vmem:[#allocation24_spill] sm:$0xff]  ;;  %v1917_v19 = vld [vmem:[#allocation25_spill] sm:$0xff]  ;;  %v1918_v17 = vld [vmem:[#allocation23_spill] sm:$0xff]  ;;  %s212_s15 = scalar_lea.vmem %s1775_s0, %s629_s13  ;;  %s550_s19 = scalar_lea.vmem %s1781_s6, %s626_s16 }
  0x8f   : > { %258 = vmatpush.msra.mxu2 %v989_v54  ;;  %278 = vmatpush.msra.mxu3 %v994_v55  ;;  %v1919_v16 = vld [vmem:[#allocation22_spill] sm:$0xff]  ;;  %v1920_v14 = vld [vmem:[#allocation20_spill] sm:$0xff]  ;;  %v1921_v15 = vld [vmem:[#allocation21_spill] sm:$0xff]  ;;  %s627_s3 = sshll.u32 %s205_s12, 1  ;;  %s204_s8 = sadd.s32 1, %s678_s8  }
  0x90   : > { %238 = vmatpush.msra.mxu1 %v984_v53  ;;  %218 = vmatpush.msra.mxu0 %v979_v52  ;;  %v1922_v13 = vld [vmem:[#allocation19_spill] sm:$0xff]  ;;  %v1923_v12 = vld [vmem:[#allocation18_spill] sm:$0xff]  ;;  %v1924_v10 = vld [vmem:[#allocation16_spill] sm:$0xff]  ;;  %s575_s22 = scalar_lea.vmem %s1781_s6, %s627_s3  ;;  %p201_p0 = scmp.ge.s32.totalorder %s204_s8, 8  }
  0x91   : > { %259 = vmatpush.msra.mxu2 %v969_v50  ;;  %279 = vmatpush.msra.mxu3 %v974_v51  ;;  %v1925_v11 = vld [vmem:[#allocation17_spill] sm:$0xff]  ;;  %v1926_v9 = vld [vmem:[#allocation15_spill] sm:$0xff]  ;;  %v1927_v8 = vld [vmem:[#allocation14_spill] sm:$0xff] }
  0x92   : > { %239 = vmatpush.msra.mxu1 %v964_v49  ;;  %219 = vmatpush.msra.mxu0 %v959_v48  ;;  %v1928_v6 = vld [vmem:[#allocation12_spill] sm:$0xff]  ;;  %v1929_v7 = vld [vmem:[#allocation13_spill] sm:$0xff]  ;;  %v1930_v5 = vld [vmem:[#allocation11_spill] sm:$0xff] }
  0x93   : > { %260 = vmatpush.msra.mxu2 %v949_v46  ;;  %280 = vmatpush.msra.mxu3 %v954_v47  ;;  %v214_v4 = vld [vmem:[#allocation2] sm:$0x3]  ;;  %v2001_v3 = vld [vmem:[#allocation130_spill] sm:$0xff]  ;;  %v2005_v1 = vld [vmem:[#allocation128_spill] sm:$0xff] }
  0x94   : > { %240 = vmatpush.msra.mxu1 %v944_v45  ;;  %220 = vmatpush.msra.mxu0 %v939_v44  ;;  %v2003_v2 = vld [vmem:[#allocation129_spill] sm:$0xff]  ;;  %v2007_v0 = vld [vmem:[#allocation127_spill] sm:$0xff] }
  0x95   : > { %261 = vmatpush.msra.mxu2 %v929_v42  ;;  %281 = vmatpush.msra.mxu3 %v934_v43 }
  0x96   : > { %241 = vmatpush.msra.mxu1 %v924_v41  ;;  %221 = vmatpush.msra.mxu0 %v919_v40 }
  0x97   : > { %262 = vmatpush.msra.mxu2 %v909_v38  ;;  %282 = vmatpush.msra.mxu3 %v914_v39 }
  0x98   : > { %242 = vmatpush.msra.mxu1 %v904_v37  ;;  %222 = vmatpush.msra.mxu0 %v899_v36 }
  0x99   : > { %263 = vmatpush.msra.mxu2 %v889_v34  ;;  %283 = vmatpush.msra.mxu3 %v894_v35 }
  0x9a   : > { %243 = vmatpush.msra.mxu1 %v884_v33  ;;  %223 = vmatpush.msra.mxu0 %v879_v32 }
  0x9b   : > { %264 = vmatpush.msra.mxu2 %v869_v30  ;;  %284 = vmatpush.msra.mxu3 %v874_v31 }
  0x9c   : > { %244 = vmatpush.msra.mxu1 %v864_v29  ;;  %224 = vmatpush.msra.mxu0 %v1907_v28  ;;  %v213_v28 = vld [vmem:[%s212_s15 + $0x8] sm:$0xff] }
  0x9d   : > { %265 = vmatpush.msra.mxu2 %v1908_v26  ;;  %285 = vmatpush.msra.mxu3 %v1909_v27  ;;  %v215_v26 = vld [vmem:[#allocation3] sm:$0x3] }
  0x9e   : > { %245 = vmatpush.msra.mxu1 %v1910_v25  ;;  %225 = vmatpush.msra.mxu0 %v1911_v24 }
  0x9f   : > { %266 = vmatpush.msra.mxu2 %v1912_v22  ;;  %286 = vmatpush.msra.mxu3 %v1913_v23 }
  0xa0   : > { %246 = vmatpush.msra.mxu1 %v1914_v21  ;;  %226 = vmatpush.msra.mxu0 %v1915_v20 }
  0xa1   : > { %267 = vmatpush.msra.mxu2 %v1916_v18  ;;  %287 = vmatpush.msra.mxu3 %v1917_v19 }
  0xa2   : > { %247 = vmatpush.msra.mxu1 %v1918_v17  ;;  %227 = vmatpush.msra.mxu0 %v1919_v16 }
  0xa3   : > { %268 = vmatpush.msra.mxu2 %v1920_v14  ;;  %288 = vmatpush.msra.mxu3 %v1921_v15  ;;  %v1931_v14 = vld [vmem:[#allocation10_spill] sm:$0xff] }
  0xa4   : > { %248 = vmatpush.msra.mxu1 %v1922_v13  ;;  %228 = vmatpush.msra.mxu0 %v1923_v12  ;;  %v1932_v13 = vld [vmem:[#allocation8_spill] sm:$0xff]  ;;  %v1933_v12 = vld [vmem:[#allocation9_spill] sm:$0xff] }
  0xa5   : > { %269 = vmatpush.msra.mxu2 %v1924_v10  ;;  %289 = vmatpush.msra.mxu3 %v1925_v11  ;;  %v1934_v10 = vld [vmem:[#allocation97_spill] sm:$0xff]  ;;  %v1939_v11 = vld [vmem:[#allocation94_spill] sm:$0xff] }
  0xa6   : > { %249 = vmatpush.msra.mxu1 %v1926_v9  ;;  %229 = vmatpush.msra.mxu0 %v1927_v8  ;;  %v1935_v9 = vld [vmem:[#allocation98_spill] sm:$0xff]  ;;  %v1936_v8 = vld [vmem:[#allocation7_spill] sm:$0xff] }
  0xa7   : > { %270 = vmatpush.msra.mxu2 %v1928_v6  ;;  %290 = vmatpush.msra.mxu3 %v1929_v7  ;;  %v1937_v6 = vld [vmem:[#allocation6_spill] sm:$0xff]  ;;  %v1938_v7 = vld [vmem:[#allocation93_spill] sm:$0xff] }
  0xa8   : > { %250 = vmatpush.msra.mxu1 %v1930_v5  ;;  %230 = vmatpush.msra.mxu0 %v1931_v14  ;;  %v1940_v14 = vld [vmem:[#allocation89_spill] sm:$0xff]  ;;  %v1943_v5 = vld [vmem:[#allocation95_spill] sm:$0xff] }
  0xa9   : > { %271 = vmatpush.msra.mxu2 %v1932_v13  ;;  %291 = vmatpush.msra.mxu3 %v1933_v12  ;;  %v1941_v13 = vld [vmem:[#allocation90_spill] sm:$0xff]  ;;  %v1942_v12 = vld [vmem:[#allocation96_spill] sm:$0xff] }
  0xaa   : > { %272 = vmatmul.f32.vlgmr.msra.gmra.mxu2 %v214_v4  ;;  %292 = vmatmul.f32.vlgmr.msra.gmra.mxu3 %v214_v4 }
  0xab   : > { %423 = vmatpush.msrb.mxu2 %v1934_v10  ;;  %443 = vmatpush.msrb.mxu3 %v1935_v9  ;;  %v1944_v10 = vld [vmem:[#allocation85_spill] sm:$0xff]  ;;  %v1945_v9 = vld [vmem:[#allocation86_spill] sm:$0xff] }
  0xac   : > { %251 = vmatpush.msra.mxu1 %v1936_v8  ;;  %231 = vmatpush.msra.mxu0 %v1937_v6  ;;  %v1946_v8 = vld [vmem:[#allocation92_spill] sm:$0xff]  ;;  %v1947_v6 = vld [vmem:[#allocation91_spill] sm:$0xff] }
  0xad   : > { %424 = vmatpush.msrb.mxu2 %v1938_v7  ;;  %444 = vmatpush.msrb.mxu3 %v1939_v11  ;;  %v1948_v7 = vld [vmem:[#allocation81_spill] sm:$0xff]  ;;  %v1949_v11 = vld [vmem:[#allocation82_spill] sm:$0xff] }
  0xae   : > { %252 = vmatmul.f32.vlgmr.msra.gmra.mxu1 %v214_v4  ;;  %232 = vmatmul.f32.vlgmr.msra.gmra.mxu0 %v214_v4  ;;  %v1950_v4 = vld [vmem:[#allocation88_spill] sm:$0xff] }
  0xaf   : > { %425 = vmatpush.msrb.mxu2 %v1940_v14  ;;  %445 = vmatpush.msrb.mxu3 %v1941_v13  ;;  %v1951_v14 = vld [vmem:[#allocation87_spill] sm:$0xff]  ;;  %v1952_v13 = vld [vmem:[#allocation77_spill] sm:$0xff] }
  0xb0   : > { %403 = vmatpush.msrb.mxu1 %v1942_v12  ;;  %383 = vmatpush.msrb.mxu0 %v1943_v5  ;;  %v1953_v12 = vld [vmem:[#allocation78_spill] sm:$0xff]  ;;  %v1954_v5 = vld [vmem:[#allocation84_spill] sm:$0xff] }
  0xb1   : > { %426 = vmatpush.msrb.mxu2 %v1944_v10  ;;  %446 = vmatpush.msrb.mxu3 %v1945_v9  ;;  %v1955_v10 = vld [vmem:[#allocation83_spill] sm:$0xff]  ;;  %v1956_v9 = vld [vmem:[#allocation73_spill] sm:$0xff] }
  0xb2   : > { %404 = vmatpush.msrb.mxu1 %v1946_v8  ;;  %384 = vmatpush.msrb.mxu0 %v1947_v6  ;;  %v1957_v8 = vld [vmem:[#allocation74_spill] sm:$0xff]  ;;  %v1958_v6 = vld [vmem:[#allocation80_spill] sm:$0xff] }
  0xb3   : > { %427 = vmatpush.msrb.mxu2 %v1948_v7  ;;  %447 = vmatpush.msrb.mxu3 %v1949_v11  ;;  %v1959_v7 = vld [vmem:[#allocation79_spill] sm:$0xff]  ;;  %v1960_v11 = vld [vmem:[#allocation69_spill] sm:$0xff] }
  0xb4   : > { %405 = vmatpush.msrb.mxu1 %v1950_v4  ;;  %385 = vmatpush.msrb.mxu0 %v1951_v14  ;;  %v1961_v4 = vld [vmem:[#allocation70_spill] sm:$0xff]  ;;  %v1962_v14 = vld [vmem:[#allocation76_spill] sm:$0xff] }
  0xb5   : > { %428 = vmatpush.msrb.mxu2 %v1952_v13  ;;  %448 = vmatpush.msrb.mxu3 %v1953_v12  ;;  %v1963_v13 = vld [vmem:[#allocation75_spill] sm:$0xff]  ;;  %v1964_v12 = vld [vmem:[#allocation65_spill] sm:$0xff] }
  0xb6   : > { %406 = vmatpush.msrb.mxu1 %v1954_v5  ;;  %386 = vmatpush.msrb.mxu0 %v1955_v10  ;;  %v1965_v5 = vld [vmem:[#allocation66_spill] sm:$0xff]  ;;  %v1966_v10 = vld [vmem:[#allocation72_spill] sm:$0xff] }
  0xb7   : > { %429 = vmatpush.msrb.mxu2 %v1956_v9  ;;  %449 = vmatpush.msrb.mxu3 %v1957_v8  ;;  %v1967_v9 = vld [vmem:[#allocation71_spill] sm:$0xff]  ;;  %v1968_v8 = vld [vmem:[#allocation61_spill] sm:$0xff] }
  0xb8   : > { %407 = vmatpush.msrb.mxu1 %v1958_v6  ;;  %387 = vmatpush.msrb.mxu0 %v1959_v7  ;;  %v1969_v6 = vld [vmem:[#allocation62_spill] sm:$0xff]  ;;  %v1970_v7 = vld [vmem:[#allocation68_spill] sm:$0xff] }
  0xb9   : > { %430 = vmatpush.msrb.mxu2 %v1960_v11  ;;  %450 = vmatpush.msrb.mxu3 %v1961_v4  ;;  %v1971_v11 = vld [vmem:[#allocation67_spill] sm:$0xff]  ;;  %v1972_v4 = vld [vmem:[#allocation57_spill] sm:$0xff] }
  0xba   : > { %408 = vmatpush.msrb.mxu1 %v1962_v14  ;;  %388 = vmatpush.msrb.mxu0 %v1963_v13  ;;  %v1973_v14 = vld [vmem:[#allocation58_spill] sm:$0xff]  ;;  %v1974_v13 = vld [vmem:[#allocation64_spill] sm:$0xff] }
  0xbb   : > { %431 = vmatpush.msrb.mxu2 %v1964_v12  ;;  %451 = vmatpush.msrb.mxu3 %v1965_v5  ;;  %v1975_v12 = vld [vmem:[#allocation63_spill] sm:$0xff]  ;;  %v1976_v5 = vld [vmem:[#allocation53_spill] sm:$0xff] }
  0xbc   : > { %409 = vmatpush.msrb.mxu1 %v1966_v10  ;;  %389 = vmatpush.msrb.mxu0 %v1967_v9  ;;  %v1977_v10 = vld [vmem:[#allocation54_spill] sm:$0xff]  ;;  %v1978_v9 = vld [vmem:[#allocation60_spill] sm:$0xff] }
  0xbd   : > { %432 = vmatpush.msrb.mxu2 %v1968_v8  ;;  %452 = vmatpush.msrb.mxu3 %v1969_v6  ;;  %v1979_v8 = vld [vmem:[#allocation59_spill] sm:$0xff]  ;;  %v1980_v6 = vld [vmem:[#allocation49_spill] sm:$0xff] }
  0xbe   : > { %410 = vmatpush.msrb.mxu1 %v1970_v7  ;;  %390 = vmatpush.msrb.mxu0 %v1971_v11  ;;  %v1981_v7 = vld [vmem:[#allocation50_spill] sm:$0xff]  ;;  %v1982_v11 = vld [vmem:[#allocation56_spill] sm:$0xff] }
  0xbf   : > { %433 = vmatpush.msrb.mxu2 %v1972_v4  ;;  %453 = vmatpush.msrb.mxu3 %v1973_v14  ;;  %v1983_v4 = vld [vmem:[#allocation55_spill] sm:$0xff]  ;;  %v1984_v14 = vld [vmem:[#allocation45_spill] sm:$0xff] }
  0xc0   : > { %411 = vmatpush.msrb.mxu1 %v1974_v13  ;;  %391 = vmatpush.msrb.mxu0 %v1975_v12  ;;  %v1985_v13 = vld [vmem:[#allocation46_spill] sm:$0xff]  ;;  %v1986_v12 = vld [vmem:[#allocation52_spill] sm:$0xff] }
  0xc1   : > { %434 = vmatpush.msrb.mxu2 %v1976_v5  ;;  %454 = vmatpush.msrb.mxu3 %v1977_v10  ;;  %v1987_v5 = vld [vmem:[#allocation51_spill] sm:$0xff]  ;;  %v1988_v10 = vld [vmem:[#allocation41_spill] sm:$0xff] }
  0xc2   : > { %412 = vmatpush.msrb.mxu1 %v1978_v9  ;;  %392 = vmatpush.msrb.mxu0 %v1979_v8  ;;  %v1989_v9 = vld [vmem:[#allocation42_spill] sm:$0xff]  ;;  %v381_v8 = vld [vmem:[#allocation4] sm:$0x3] }
  0xc3   : > { %435 = vmatpush.msrb.mxu2 %v1980_v6  ;;  %455 = vmatpush.msrb.mxu3 %v1981_v7  ;;  %v1990_v6 = vld [vmem:[#allocation48_spill] sm:$0xff]  ;;  %v1991_v7 = vld [vmem:[#allocation47_spill] sm:$0xff] }
  0xc4   : > { %413 = vmatpush.msrb.mxu1 %v1982_v11  ;;  %393 = vmatpush.msrb.mxu0 %v1983_v4  ;;  %v1992_v11 = vld [vmem:[#allocation37_spill] sm:$0xff]  ;;  %v1993_v4 = vld [vmem:[#allocation38_spill] sm:$0xff] }
  0xc5   : > { %436 = vmatpush.msrb.mxu2 %v1984_v14  ;;  %456 = vmatpush.msrb.mxu3 %v1985_v13  ;;  %v1994_v14 = vld [vmem:[#allocation44_spill] sm:$0xff]  ;;  %v1995_v13 = vld [vmem:[#allocation43_spill] sm:$0xff] }
  0xc6   : > { %414 = vmatpush.msrb.mxu1 %v1986_v12  ;;  %394 = vmatpush.msrb.mxu0 %v1987_v5  ;;  %v1996_v12 = vld [vmem:[#allocation40_spill] sm:$0xff]  ;;  %v1997_v5 = vld [vmem:[#allocation39_spill] sm:$0xff] }
  0xc7   : > { %437 = vmatpush.msrb.mxu2 %v1988_v10  ;;  %457 = vmatpush.msrb.mxu3 %v1989_v9  ;;  %v1998_v10 = vld [vmem:[#allocation36_spill] sm:$0xff]  ;;  %v1999_v9 = vld [vmem:[#allocation35_spill] sm:$0xff] }
  0xc8   : > { %415 = vmatpush.msrb.mxu1 %v1990_v6  ;;  %395 = vmatpush.msrb.mxu0 %v1991_v7  ;;  %v2000_v6 = vld [vmem:[#allocation114_spill] sm:$0xff]  ;;  %v2002_v7 = vld [vmem:[#allocation113_spill] sm:$0xff] }
  0xc9   : > { %438 = vmatpush.msrb.mxu2 %v1992_v11  ;;  %458 = vmatpush.msrb.mxu3 %v1993_v4  ;;  %v2004_v11 = vld [vmem:[#allocation112_spill] sm:$0xff]  ;;  %v2006_v4 = vld [vmem:[#allocation111_spill] sm:$0xff] }
  0xca   : > { %439 = vmatmul.f32.vlgmr.msrb.gmra.mxu2 %v381_v8  ;;  %459 = vmatmul.f32.vlgmr.msrb.gmra.mxu3 %v381_v8 }
  0xcb   : > { %416 = vmatpush.msrb.mxu1 %v1994_v14  ;;  %396 = vmatpush.msrb.mxu0 %v1995_v13  ;;  %v2008_v14 = vld [vmem:[#allocation110_spill] sm:$0xff] }
  0xcc   : > { %v2009_v13 = vld [vmem:[#allocation126_spill] sm:$0xff] }
  0xcd   : > { %417 = vmatpush.msrb.mxu1 %v1996_v12  ;;  %397 = vmatpush.msrb.mxu0 %v1997_v5  ;;  %v2011_v12 = vld [vmem:[#allocation125_spill] sm:$0xff]  ;;  %v2012_v5 = vld [vmem:[#allocation108_spill] sm:$0xff] }
  0xcf   : > { %418 = vmatpush.msrb.mxu1 %v1998_v10  ;;  %398 = vmatpush.msrb.mxu0 %v1999_v9  ;;  %v2013_v10 = vld [vmem:[#allocation124_spill] sm:$0xff]  ;;  %v2014_v9 = vld [vmem:[#allocation107_spill] sm:$0xff] }
  0xd0   : > { %419 = vmatmul.f32.vlgmr.msrb.gmra.mxu1 %v381_v8  ;;  %399 = vmatmul.f32.vlgmr.msrb.gmra.mxu0 %v381_v8  ;;  %v2010_v8 = vld [vmem:[#allocation109_spill] sm:$0xff] }
  0xd1   : > { %552 = vmatpush.msra.mxu0 %v2000_v6  ;;  %577 = vmatpush.msra.mxu1 %v2001_v3  ;;  %v2015_v6 = vld [vmem:[#allocation123_spill] sm:$0xff] }
  0xd3   : > { %553 = vmatpush.msra.mxu0 %v2002_v7  ;;  %578 = vmatpush.msra.mxu1 %v2003_v2  ;;  %v2016_v7 = vld [vmem:[#allocation106_spill] sm:$0xff] }
  0xd5   : > { %554 = vmatpush.msra.mxu0 %v2004_v11  ;;  %579 = vmatpush.msra.mxu1 %v2005_v1  ;;  %v2017_v11 = vld [vmem:[#allocation122_spill] sm:$0xff] }
  0xd7   : > { %555 = vmatpush.msra.mxu0 %v2006_v4  ;;  %580 = vmatpush.msra.mxu1 %v2007_v0  ;;  %v2018_v4 = vld [vmem:[#allocation105_spill] sm:$0xff] }
  0xd9   : > { %556 = vmatpush.msra.mxu0 %v2008_v14  ;;  %581 = vmatpush.msra.mxu1 %v2009_v13  ;;  %v2019_v14 = vld [vmem:[#allocation121_spill] sm:$0xff]  ;;  %v2020_v13 = vld [vmem:[#allocation104_spill] sm:$0xff] }
  0xdb   : > { %557 = vmatpush.msra.mxu0 %v2010_v8  ;;  %582 = vmatpush.msra.mxu1 %v2011_v12  ;;  %v2021_v8 = vld [vmem:[#allocation120_spill] sm:$0xff]  ;;  %v2022_v12 = vld [vmem:[#allocation103_spill] sm:$0xff] }
  0xdd   : > { %558 = vmatpush.msra.mxu0 %v2012_v5  ;;  %583 = vmatpush.msra.mxu1 %v2013_v10  ;;  %v2023_v5 = vld [vmem:[#allocation119_spill] sm:$0xff]  ;;  %v2024_v10 = vld [vmem:[#allocation102_spill] sm:$0xff] }
  0xdf   : > { %559 = vmatpush.msra.mxu0 %v2014_v9  ;;  %584 = vmatpush.msra.mxu1 %v2015_v6  ;;  %v2025_v9 = vld [vmem:[#allocation118_spill] sm:$0xff]  ;;  %v2026_v6 = vld [vmem:[#allocation101_spill] sm:$0xff] }
  0xe1   : > { %560 = vmatpush.msra.mxu0 %v2016_v7  ;;  %585 = vmatpush.msra.mxu1 %v2017_v11  ;;  %v2027_v7 = vld [vmem:[#allocation117_spill] sm:$0xff]  ;;  %v2028_v11 = vld [vmem:[#allocation100_spill] sm:$0xff] }
  0xe3   : > { %561 = vmatpush.msra.mxu0 %v2018_v4  ;;  %586 = vmatpush.msra.mxu1 %v2019_v14  ;;  %v2029_v4 = vld [vmem:[#allocation116_spill] sm:$0xff]  ;;  %v2030_v14 = vld [vmem:[#allocation99_spill] sm:$0xff] }
  0xe5   : > { %562 = vmatpush.msra.mxu0 %v2020_v13  ;;  %587 = vmatpush.msra.mxu1 %v2021_v8  ;;  %v2031_v13 = vld [vmem:[#allocation115_spill] sm:$0xff] }
  0xe7   : > { %563 = vmatpush.msra.mxu0 %v2022_v12  ;;  %588 = vmatpush.msra.mxu1 %v2023_v5 }
  0xe9   : > { %564 = vmatpush.msra.mxu0 %v2024_v10  ;;  %589 = vmatpush.msra.mxu1 %v2025_v9 }
  0xeb   : > { %565 = vmatpush.msra.mxu0 %v2026_v6  ;;  %590 = vmatpush.msra.mxu1 %v2027_v7 }
  0xed   : > { %566 = vmatpush.msra.mxu0 %v2028_v11  ;;  %591 = vmatpush.msra.mxu1 %v2029_v4  ;;  %v209_v4 = vld [vmem:[%s208_s1] sm:$0xff] }
  0xef   : > { %567 = vmatpush.msra.mxu0 %v2030_v14  ;;  %592 = vmatpush.msra.mxu1 %v2031_v13 }
 0x12b   : > { %v253_v8 = vpop.f32.mrf.mxu1  ;;  %v233_v12 = vpop.f32.mrf.mxu0 }
 0x12c   : > { %v300_v5 = vrot.slane %v253_v8, 6 }
 0x12d   : > { %v273_v10 = vpop.f32.mrf.mxu2  ;;  %v293_v9 = vpop.f32.mrf.mxu3 }
 0x12e   : > { %v301_v6 = vrot.slane %v273_v10, 4  ;;  %v302_v7 = vrot.slane %v293_v9, 2  ;;  %v304_v11 = vsel %vm303_vm0, %v233_v12, %v300_v5 }
 0x130   : > { %v306_v14 = vsel %vm305_vm1, %v301_v6, %v302_v7 }
 0x131   : > { %v308_v13 = vsel %vm307_vm2, %v304_v11, %v306_v14 }
 0x132   : > { %v310_v0 = vadd.f32 %v308_v13, %v209_v4 }
 0x134   : > { %v620_v1 = vmul.f32 -1.442695, %v310_v0  ;;  %v331_v8 = vrot.slane %v310_v0, 2  ;;  %v355_v2 = vrot.slane %v310_v0, 6  ;;  %v352_v6 = vrot.slane %v310_v0, 4 }
 0x136   : > { %640 = vpow2.f32 %v620_v1  ;;  %v621_v3 = vmul.f32 -1.442695, %v331_v8  ;;  %v622_v15 = vmul.f32 -1.442695, %v355_v2 }
 0x138   : > { %642 = vpow2.f32 %v621_v3 }
 0x139   : > { %644 = vpow2.f32 %v622_v15 }
 0x13c   : > { %v641_v10 = vpop.eup %640 }
 0x13d   : > { %v314_v9 = vadd.f32 1.0, %v641_v10 }
 0x13e   : > { %v643_v16 = vpop.eup %642 }
 0x13f   : > { %v645_v12 = vpop.eup %644  ;;  %646 = vrcp.f32 %v314_v9  ;;  %v336_v5 = vadd.f32 1.0, %v643_v16  ;;  %vm320_vm3 = vweird.f32 %v314_v9  ;;  %v326_v2 = vand.u32 2147483648, %v314_v9 }
 0x140   : > { %v1715_v17 = vadd.f32 1.0, %v645_v12  ;;  %v324_v16 = vand.u32 2147483647, %v314_v9 }
 0x141   : > { %648 = vrcp.f32 %v336_v5  ;;  %v346_v14 = vand.u32 2147483647, %v336_v5  ;;  %v348_v13 = vand.u32 2147483648, %v336_v5  ;;  %vm342_vm5 = vweird.f32 %v336_v5 }
 0x142   : > { %650 = vrcp.f32 %v1715_v17  ;;  %vm1730_vm8 = vcmp.eq.f32.partialorder %v324_v16, 8.507059e+37  ;;  %vm366_vm11 = vweird.f32 %v1715_v17  ;;  %v370_v18 = vand.u32 2147483647, %v1715_v17 }
 0x143   : > { %652 = vtanh.f32 %v352_v6  ;;  %v327_v6 = vor.u32 1.1754944e-38, %v326_v2  ;;  %vm1741_vm10 = vcmp.eq.f32.partialorder %v346_v14, 8.507059e+37  ;;  %v349_v2 = vor.u32 1.1754944e-38, %v348_v13 }
 0x144   : > { %vm371_vm14 = vcmp.eq.f32.partialorder %v370_v18, 8.507059e+37 }
 0x145   : > { %v647_v7 = vpop.eup %646 }
 0x146   : > { %v316_v1 = vmul.f32 %v647_v7, %v314_v9  ;;  %vm321_vm4 = vweird.f32 %v647_v7 }
 0x147   : > { %v649_v11 = vpop.eup %648  ;;  %vm1726_vm7 = vmor %vm320_vm3, %vm321_vm4 }
 0x148   : > { %v1719_v15 = vpop.eup %650  ;;  %v317_v3 = vsub.f32 1.0, %v316_v1  ;;  %v338_v4 = vmul.f32 %v649_v11, %v336_v5  ;;  %vm343_vm6 = vweird.f32 %v649_v11 }
 0x149   : > { %v362_v8 = vmul.f32 %v1719_v15, %v1715_v17  ;;  %v653_v20 = vpop.eup %652  ;;  %vm1737_vm9 = vmor %vm342_vm5, %vm343_vm6  ;;  %vm367_vm12 = vweird.f32 %v1719_v15 }
 0x14a   : > { %v339_v0 = vsub.f32 1.0, %v338_v4  ;;  %v318_v10 = vmul.f32 %v647_v7, %v317_v3  ;;  %vm368_vm13 = vmor %vm366_vm11, %vm367_vm12 }
 0x14b   : > { %v363_v3 = vsub.f32 1.0, %v362_v8 }
 0x14c   : > { %v319_v1 = vadd.f32 %v647_v7, %v318_v10  ;;  %v340_v19 = vmul.f32 %v649_v11, %v339_v0 }
 0x14d   : > { %v420_v21 = vpop.f32.mrf.mxu1  ;;  %v440_v4 = vpop.f32.mrf.mxu2 }
 0x14e   : > { %v467_v16 = vrot.slane %v420_v21, 6  ;;  %v468_v10 = vrot.slane %v440_v4, 4  ;;  %v460_v0 = vpop.f32.mrf.mxu3  ;;  %v400_v22 = vpop.f32.mrf.mxu0  ;;  %v323_v23 = vsel %vm1726_vm7, %v647_v7, %v319_v1  ;;  %v341_v24 = vadd.f32 %v649_v11, %v340_v19 }
 0x14f   : > { %v469_v25 = vrot.slane %v460_v0, 2  ;;  %v328_v27 = vsel %vm1730_vm8, %v327_v6, %v323_v23  ;;  %v364_v7 = vmul.f32 %v1719_v15, %v363_v3 }
 0x150   : > { %v470_v14 = vsel %vm303_vm0, %v400_v22, %v467_v16  ;;  %v345_v13 = vsel %vm1737_vm9, %v649_v11, %v341_v24  ;;  %v377_v8 = vmul.f32 %v653_v20, %v328_v27  ;;  %v372_v22 = vand.u32 2147483648, %v1715_v17 }
 0x151   : > { %v471_v21 = vsel %vm305_vm1, %v468_v10, %v469_v25  ;;  %v350_v4 = vsel %vm1741_vm10, %v349_v2, %v345_v13  ;;  %v365_v27 = vadd.f32 %v1719_v15, %v364_v7 }
 0x152   : > { %v472_v19 = vsel %vm307_vm2, %v470_v14, %v471_v21  ;;  %v376_v12 = vmul.f32 %v350_v4, %v215_v26  ;;  %v373_v11 = vor.u32 1.1754944e-38, %v372_v22 }
 0x153   : > { %v474_v1 = vadd.f32 %v472_v19, %v213_v28  ;;  %v369_v6 = vsel %vm368_vm13, %v1719_v15, %v365_v27 }
 0x154   : > { %v378_v20 = vadd.f32 %v377_v8, %v376_v12  ;;  %v374_v17 = vsel %vm371_vm14, %v373_v11, %v369_v6 }
 0x155   : > { %v623_v23 = vmul.f32 -1.442695, %v474_v1  ;;  %v495_v24 = vrot.slane %v474_v1, 2  ;;  %v519_v25 = vrot.slane %v474_v1, 6  ;;  %v516_v15 = vrot.slane %v474_v1, 4 }
 0x156   : > { %654 = vtanh.f32 %v378_v20  ;;  %546 = vst [vmem:[#allocation3] sm:$0x3] %v378_v20 }
 0x157   : > { %656 = vpow2.f32 %v623_v23  ;;  %v624_v26 = vmul.f32 -1.442695, %v495_v24  ;;  %v625_v28 = vmul.f32 -1.442695, %v519_v25 }
 0x159   : > { %658 = vpow2.f32 %v624_v26 }
 0x15a   : > { %660 = vpow2.f32 %v625_v28 }
 0x15c   : > { %v655_v9 = vpop.eup %654 }
 0x15d   : > { %v657_v5 = vpop.eup %656  ;;  %v380_v2 = vmul.f32 %v655_v9, %v374_v17  ;;  %v382_v9 = vld [vmem:[#allocation5] sm:$0x3] }
 0x15e   : > { %v478_v3 = vadd.f32 1.0, %v657_v5 }
 0x15f   : > { %v659_v16 = vpop.eup %658  ;;  %545 = vst [vmem:[#allocation2] sm:$0x3] %v380_v2  ;;  %568 = vmatmul.f32.vlgmr.msra.gmra.mxu0 %v380_v2 }
 0x160   : > { %v661_v10 = vpop.eup %660  ;;  %662 = vrcp.f32 %v478_v3  ;;  %v500_v0 = vadd.f32 1.0, %v659_v16  ;;  %v490_v12 = vand.u32 2147483648, %v478_v3  ;;  %v488_v23 = vand.u32 2147483647, %v478_v3 }
 0x161   : > { %v524_v14 = vadd.f32 1.0, %v661_v10  ;;  %vm484_vm0 = vweird.f32 %v478_v3 }
 0x162   : > { %664 = vrcp.f32 %v500_v0  ;;  %v512_v24 = vand.u32 2147483648, %v500_v0  ;;  %v510_v26 = vand.u32 2147483647, %v500_v0  ;;  %v491_v28 = vor.u32 1.1754944e-38, %v490_v12 }
 0x163   : > { %666 = vrcp.f32 %v524_v14  ;;  %vm489_vm3 = vcmp.eq.f32.partialorder %v488_v23, 8.507059e+37  ;;  %vm506_vm4 = vweird.f32 %v500_v0  ;;  %v536_v12 = vand.u32 2147483648, %v524_v14  ;;  %v551_v23 = vld [vmem:[%s550_s19] sm:$0x3] }
 0x164   : > { %668 = vtanh.f32 %v516_v15  ;;  %v513_v5 = vor.u32 1.1754944e-38, %v512_v24  ;;  %vm511_vm6 = vcmp.eq.f32.partialorder %v510_v26, 8.507059e+37  ;;  %vm530_vm8 = vweird.f32 %v524_v14 }
 0x166   : > { %v663_v13 = vpop.eup %662 }
 0x167   : > { %v480_v8 = vmul.f32 %v663_v13, %v478_v3  ;;  %vm485_vm15 = vweird.f32 %v663_v13 }
 0x168   : > { %v665_v21 = vpop.eup %664  ;;  %vm486_vm2 = vmor %vm484_vm0, %vm485_vm15 }
 0x169   : > { %v667_v4 = vpop.eup %666  ;;  %v481_v7 = vsub.f32 1.0, %v480_v8  ;;  %v502_v19 = vmul.f32 %v665_v21, %v500_v0  ;;  %vm507_vm1 = vweird.f32 %v665_v21  ;;  %v534_v0 = vand.u32 2147483647, %v524_v14 }
 0x16a   : > { %v526_v18 = vmul.f32 %v667_v4, %v524_v14  ;;  %vm508_vm5 = vmor %vm506_vm4, %vm507_vm1  ;;  %v669_v16 = vpop.eup %668  ;;  %vm531_vm7 = vweird.f32 %v667_v4 }
 0x16b   : > { %v503_v22 = vsub.f32 1.0, %v502_v19  ;;  %v482_v20 = vmul.f32 %v663_v13, %v481_v7  ;;  %vm532_vm9 = vmor %vm530_vm8, %vm531_vm7  ;;  %vm535_vm10 = vcmp.eq.f32.partialorder %v534_v0, 8.507059e+37 }
 0x16c   : > { %v527_v11 = vsub.f32 1.0, %v526_v18  ;;  %v537_v18 = vor.u32 1.1754944e-38, %v536_v12 }
 0x16d   : > { %v483_v25 = vadd.f32 %v663_v13, %v482_v20  ;;  %v504_v27 = vmul.f32 %v665_v21, %v503_v22 }
 0x16e   : > { %v528_v10 = vmul.f32 %v667_v4, %v527_v11 }
 0x16f   : > { %v487_v1 = vsel %vm486_vm2, %v663_v13, %v483_v25  ;;  %v505_v6 = vadd.f32 %v665_v21, %v504_v27 }
 0x170   : > { %v492_v17 = vsel %vm489_vm3, %v491_v28, %v487_v1  ;;  %v529_v19 = vadd.f32 %v667_v4, %v528_v10 }
 0x171   : > { %v509_v2 = vsel %vm508_vm5, %v665_v21, %v505_v6  ;;  %v541_v15 = vmul.f32 %v669_v16, %v492_v17 }
 0x172   : > { %v514_v3 = vsel %vm511_vm6, %v513_v5, %v509_v2  ;;  %v533_v13 = vsel %vm532_vm9, %v667_v4, %v529_v19 }
 0x173   : > { %v540_v8 = vmul.f32 %v514_v3, %v382_v9  ;;  %v538_v22 = vsel %vm535_vm10, %v537_v18, %v533_v13 }
 0x175   : > { %v542_v7 = vadd.f32 %v541_v15, %v540_v8 }
 0x177   : > { %670 = vtanh.f32 %v542_v7  ;;  %548 = vst [vmem:[#allocation5] sm:$0x3] %v542_v7 }
 0x17d   : > { %v671_v21 = vpop.eup %670 }
 0x17e   : > { %v544_v20 = vmul.f32 %v671_v21, %v538_v22 }
 0x180   : > { %547 = vst [vmem:[#allocation4] sm:$0x3] %v544_v20  ;;  %593 = vmatmul.f32.vlgmr.msra.gmra.mxu1 %v544_v20 }
 0x1dc   : > { %v569_v24 = vpop.f32.mrf.mxu0 }
 0x1dd   : > { %v572_v25 = vadd.f32 %v569_v24, %v551_v23 }
 0x1df   : > { %573 = vst [vmem:[%s550_s19] sm:$0x3] %v572_v25 }
 0x1e6   : > { %v576_v14 = vld [vmem:[%s575_s22] sm:$0x3] }
 0x1fc   :  { %203 = sbr.rel (!%p201_p0) target bundleno = 139 (0x8b), region = 55 }
 0x1fd   : > { %v594_v4 = vpop.f32.mrf.mxu1 }
 0x1fe   : > { %v597_v27 = vadd.f32 %v594_v4, %v576_v14 }
 0x200   : > { %598 = vst [vmem:[%s575_s22] sm:$0x3] %v597_v27 }

// kernel: bilstm_char_forward.2
= control target key start
LH: loop header
LB: loop body
LE: loop exit
PB: predicated region body
PF: predicated region fallthrough
CT: control target
= control target key end

     0   :  { %vm198_vm0 = vcmask 1040384   ;;  %v6328_v2 = vmov 0   ;;  %vm158_vm1 = vcmask 400384   ;;  %vm2165_vm2 = vcmask 523264   ;;  %s9008_s3 = inlined_call_operand.vmem [shape: bf16[49,64], index: 3, kind: input, shape index: {}]   ;;  %s9009_s0 = inlined_call_operand.vmem [shape: bf16[9,208,49], index: 0, kind: input, shape index: {}]   ;;  %s9010_s4 = inlined_call_operand.vmem [shape: f32[1,64], index: 4, kind: input, shape index: {}]   ;;  %s9011_s5 = inlined_call_operand.vmem [shape: f32[13,64,128], index: 5, kind: input, shape index: {}]   ;;  %s9012_s6 = inlined_call_operand.vmem [shape: f32[1,128], index: 6, kind: input, shape index: {}]   ;;  %s9013_s8 = inlined_call_operand.vmem [shape: bf16[200,1024], index: 8, kind: input, shape index: {}]   ;;  %s9014_s7 = inlined_call_operand.vmem [shape: bf16[128,1024], index: 7, kind: input, shape index: {}]   ;;  %s9015_s1 = inlined_call_operand.vmem [shape: bf16[16,200], index: 1, kind: input, shape index: {}]   ;;  %s9016_s9 = inlined_call_operand.vmem [shape: bf16[29,1024], index: 9, kind: input, shape index: {}]   ;;  %s9017_s2 = inlined_call_operand.vmem [shape: bf16[16,29], index: 2, kind: input, shape index: {}]   ;;  %s9018_s10 = inlined_call_operand.vmem [shape: f32[1,1024], index: 10, kind: input, shape index: {}]   ;;  %s9019_s11 = inlined_call_operand.vmem [shape: f32[16,1024], index: 11, kind: output, shape index: {}]  }
   0x1   :  { %v45_v0 = vld [vmem:[%s9008_s3 + $0x18] sm:$0x1]  ;;  %v200_v3 = vsel %vm198_vm0, 65535, %v6328_v2  ;;  %v6027_v6 = vld [vmem:[%s9008_s3 + $0x10] sm:$0xff]  ;;  %v6026_v7 = vld [vmem:[%s9008_s3 + $0x8] sm:$0xff]  ;;  %vm3826_vm3 = vcmask 1043456  }
   0x2   :  { %v150_v1 = vunpack.c.l.b16 %v45_v0  ;;  %v6025_v8 = vld [vmem:[%s9008_s3] sm:$0xff]  ;;  %v6041_v10 = vld [vmem:[%s9009_s0 + $0x68] sm:$0xff]  ;;  %v6054_v11 = vld [vmem:[%s9009_s0 + $0xd0] sm:$0xff]  ;;  %vm3822_vm4 = vcmask 588800   ;;  %vm4190_vm5 = vcmask 1045504   ;;  %vm4191_vm6 = vcmask 1046528  }
   0x3   :  { %v6028_v9 = vld [vmem:[%s9009_s0] sm:$0xff]  ;;  %v6067_v12 = vld [vmem:[%s9009_s0 + $0x138] sm:$0xff]  ;;  %v6029_v13 = vld [vmem:[%s9009_s0 + $0x8] sm:$0xff]  ;;  %vm4186_vm7 = vcmask 236544  }
   0x4   :  { %v154_v4 = vpack.c.b16 %v150_v1, %v150_v1  ;;  %v6042_v14 = vld [vmem:[%s9009_s0 + $0x70] sm:$0xff]  ;;  %v6055_v15 = vld [vmem:[%s9009_s0 + $0xd8] sm:$0xff]  ;;  %v6068_v16 = vld [vmem:[%s9009_s0 + $0x140] sm:$0xff] }
   0x5   :  { %v6030_v17 = vld [vmem:[%s9009_s0 + $0x10] sm:$0xff]  ;;  %v6043_v18 = vld [vmem:[%s9009_s0 + $0x78] sm:$0xff]  ;;  %v6056_v19 = vld [vmem:[%s9009_s0 + $0xe0] sm:$0xff] }
   0x6   :  { %v202_v5 = vand.u32 %v200_v3, %v154_v4  ;;  %v6069_v20 = vld [vmem:[%s9009_s0 + $0x148] sm:$0xff]  ;;  %v6031_v21 = vld [vmem:[%s9009_s0 + $0x18] sm:$0xff]  ;;  %v6044_v22 = vld [vmem:[%s9009_s0 + $0x80] sm:$0xff] }
   0x7   :  { %v6057_v23 = vld [vmem:[%s9009_s0 + $0xe8] sm:$0xff]  ;;  %v6070_v24 = vld [vmem:[%s9009_s0 + $0x150] sm:$0xff]  ;;  %v6032_v25 = vld [vmem:[%s9009_s0 + $0x20] sm:$0xff] }
   0x8   :  { %208 = vmatpush.bf16.msra.mxu0 %v202_v5  ;;  %413 = vmatpush.bf16.msra.mxu1 %v202_v5  ;;  %v6045_v26 = vld [vmem:[%s9009_s0 + $0x88] sm:$0xff]  ;;  %v6058_v27 = vld [vmem:[%s9009_s0 + $0xf0] sm:$0xff]  ;;  %v6071_v28 = vld [vmem:[%s9009_s0 + $0x158] sm:$0xff] }
   0x9   :  { %644 = vmatpush.bf16.msra.mxu2 %v202_v5  ;;  %875 = vmatpush.bf16.msra.mxu3 %v202_v5  ;;  %v6033_v29 = vld [vmem:[%s9009_s0 + $0x28] sm:$0xff]  ;;  %v6046_v30 = vld [vmem:[%s9009_s0 + $0x90] sm:$0xff]  ;;  %v6059_v31 = vld [vmem:[%s9009_s0 + $0xf8] sm:$0xff] }
   0xa   :  { %v6072_v32 = vld [vmem:[%s9009_s0 + $0x160] sm:$0xff]  ;;  %v6034_v33 = vld [vmem:[%s9009_s0 + $0x30] sm:$0xff]  ;;  %v6047_v34 = vld [vmem:[%s9009_s0 + $0x98] sm:$0xff] }
   0xb   :  { %v6060_v35 = vld [vmem:[%s9009_s0 + $0x100] sm:$0xff]  ;;  %v6073_v36 = vld [vmem:[%s9009_s0 + $0x168] sm:$0xff]  ;;  %v6035_v37 = vld [vmem:[%s9009_s0 + $0x38] sm:$0xff] }
   0xc   :  { %209 = vmatpush.bf16.msra.mxu0 %v6027_v6  ;;  %414 = vmatpush.bf16.msra.mxu1 %v6027_v6  ;;  %v6048_v38 = vld [vmem:[%s9009_s0 + $0xa0] sm:$0xff]  ;;  %v6061_v39 = vld [vmem:[%s9009_s0 + $0x108] sm:$0xff]  ;;  %v6074_v40 = vld [vmem:[%s9009_s0 + $0x170] sm:$0xff] }
   0xd   :  { %645 = vmatpush.bf16.msra.mxu2 %v6027_v6  ;;  %876 = vmatpush.bf16.msra.mxu3 %v6027_v6  ;;  %v6036_v41 = vld [vmem:[%s9009_s0 + $0x40] sm:$0xff]  ;;  %v6049_v42 = vld [vmem:[%s9009_s0 + $0xa8] sm:$0xff]  ;;  %v6062_v45 = vld [vmem:[%s9009_s0 + $0x110] sm:$0xff] }
   0xe   :  { %v6075_v46 = vld [vmem:[%s9009_s0 + $0x178] sm:$0xff]  ;;  %v6037_v57 = vld [vmem:[%s9009_s0 + $0x48] sm:$0xff]  ;;  %v6050_v58 = vld [vmem:[%s9009_s0 + $0xb0] sm:$0xff] }
   0xf   :  { %v6063_v62 = vld [vmem:[%s9009_s0 + $0x118] sm:$0xff]  ;;  %v6076_v63 = vld [vmem:[%s9009_s0 + $0x180] sm:$0xff] }
  0x10   :  { %210 = vmatpush.bf16.msra.mxu0 %v6026_v7  ;;  %415 = vmatpush.bf16.msra.mxu1 %v6026_v7 }
  0x11   :  { %646 = vmatpush.bf16.msra.mxu2 %v6026_v7  ;;  %877 = vmatpush.bf16.msra.mxu3 %v6026_v7 }
  0x14   :  { %211 = vmatpush.bf16.msra.mxu0 %v6025_v8  ;;  %416 = vmatpush.bf16.msra.mxu1 %v6025_v8 }
  0x15   :  { %647 = vmatpush.bf16.msra.mxu2 %v6025_v8  ;;  %878 = vmatpush.bf16.msra.mxu3 %v6025_v8 }
  0x17   :  { %4430 = vmatmul.msk.bf16.vlgmr.msra.gmra.mxu0 %vm158_vm1, %v6028_v9  ;;  %4521 = vmatmul.msk.bf16.vlgmr.msra.gmra.mxu1 %vm158_vm1, %v6041_v10 }
  0x18   :  { %1106 = vmatpush.bf16.msrb.mxu0 %v202_v5  ;;  %4612 = vmatmul.msk.bf16.vlgmr.msra.gmra.mxu2 %vm158_vm1, %v6054_v11  ;;  %v6038_v11 = vld [vmem:[%s9009_s0 + $0x50] sm:$0xff] }
  0x19   :  { %1568 = vmatpush.bf16.msrb.mxu2 %v202_v5  ;;  %4703 = vmatmul.msk.bf16.vlgmr.msra.gmra.mxu3 %vm158_vm1, %v6067_v12  ;;  %v6051_v12 = vld [vmem:[%s9009_s0 + $0xb8] sm:$0xff] }
  0x1a   :  { %1337 = vmatpush.bf16.msrb.mxu1 %v202_v5  ;;  %1799 = vmatpush.bf16.msrb.mxu3 %v202_v5 }
  0x1c   :  { %1107 = vmatpush.bf16.msrb.mxu0 %v6027_v6 }
  0x1d   :  { %1569 = vmatpush.bf16.msrb.mxu2 %v6027_v6 }
  0x1e   :  { %1338 = vmatpush.bf16.msrb.mxu1 %v6027_v6  ;;  %1800 = vmatpush.bf16.msrb.mxu3 %v6027_v6 }
  0x20   :  { %1108 = vmatpush.bf16.msrb.mxu0 %v6026_v7 }
  0x21   :  { %1570 = vmatpush.bf16.msrb.mxu2 %v6026_v7 }
  0x22   :  { %1339 = vmatpush.bf16.msrb.mxu1 %v6026_v7  ;;  %1801 = vmatpush.bf16.msrb.mxu3 %v6026_v7 }
  0x24   :  { %1109 = vmatpush.bf16.msrb.mxu0 %v6025_v8 }
  0x25   :  { %1571 = vmatpush.bf16.msrb.mxu2 %v6025_v8 }
  0x26   :  { %1340 = vmatpush.bf16.msrb.mxu1 %v6025_v8  ;;  %1802 = vmatpush.bf16.msrb.mxu3 %v6025_v8 }
  0x27   :  { %4431 = vmatmul.msk.bf16.gmra.mxu0 %vm158_vm1, %v6029_v13  ;;  %4522 = vmatmul.msk.bf16.gmra.mxu1 %vm158_vm1, %v6042_v14 }
  0x28   :  { %2030 = vmatpush.bf16.msra.mxu0 %v202_v5  ;;  %4613 = vmatmul.msk.bf16.gmra.mxu2 %vm158_vm1, %v6055_v15 }
  0x29   :  { %4704 = vmatmul.msk.bf16.gmra.mxu3 %vm158_vm1, %v6068_v16  ;;  %v6064_v16 = vld [vmem:[%s9009_s0 + $0x120] sm:$0xff] }
  0x2c   :  { %2031 = vmatpush.bf16.msra.mxu0 %v6027_v6 }
  0x30   :  { %2032 = vmatpush.bf16.msra.mxu0 %v6026_v7 }
  0x34   :  { %2033 = vmatpush.bf16.msra.mxu0 %v6025_v8 }
  0x37   :  { %4432 = vmatmul.msk.bf16.gmra.mxu0 %vm158_vm1, %v6030_v17  ;;  %4523 = vmatmul.msk.bf16.gmra.mxu1 %vm158_vm1, %v6043_v18  ;;  %v6077_v17 = vld [vmem:[%s9009_s0 + $0x188] sm:$0xff] }
  0x38   :  { %4614 = vmatmul.msk.bf16.gmra.mxu2 %vm158_vm1, %v6056_v19 }
  0x39   :  { %4705 = vmatmul.msk.bf16.gmra.mxu3 %vm158_vm1, %v6069_v20 }
  0x47   :  { %4433 = vmatmul.msk.bf16.gmra.mxu0 %vm158_vm1, %v6031_v21  ;;  %4524 = vmatmul.msk.bf16.gmra.mxu1 %vm158_vm1, %v6044_v22 }
  0x48   :  { %4615 = vmatmul.msk.bf16.gmra.mxu2 %vm158_vm1, %v6057_v23 }
  0x49   :  { %4706 = vmatmul.msk.bf16.gmra.mxu3 %vm158_vm1, %v6070_v24 }
  0x57   :  { %4434 = vmatmul.msk.bf16.gmra.mxu0 %vm158_vm1, %v6032_v25  ;;  %4525 = vmatmul.msk.bf16.gmra.mxu1 %vm158_vm1, %v6045_v26 }
  0x58   :  { %4616 = vmatmul.msk.bf16.gmra.mxu2 %vm158_vm1, %v6058_v27 }
  0x59   :  { %4707 = vmatmul.msk.bf16.gmra.mxu3 %vm158_vm1, %v6071_v28 }
  0x67   :  { %4435 = vmatmul.msk.bf16.gmra.mxu0 %vm158_vm1, %v6033_v29  ;;  %4526 = vmatmul.msk.bf16.gmra.mxu1 %vm158_vm1, %v6046_v30  ;;  %v6039_v29 = vld [vmem:[%s9009_s0 + $0x58] sm:$0xff]  ;;  %v6052_v30 = vld [vmem:[%s9009_s0 + $0xc0] sm:$0xff] }
  0x68   :  { %4617 = vmatmul.msk.bf16.gmra.mxu2 %vm158_vm1, %v6059_v31 }
  0x69   :  { %4708 = vmatmul.msk.bf16.gmra.mxu3 %vm158_vm1, %v6072_v32 }
  0x77   :  { %4436 = vmatmul.msk.bf16.gmra.mxu0 %vm158_vm1, %v6034_v33  ;;  %4527 = vmatmul.msk.bf16.gmra.mxu1 %vm158_vm1, %v6047_v34  ;;  %v6065_v34 = vld [vmem:[%s9009_s0 + $0x128] sm:$0xff] }
  0x78   :  { %4618 = vmatmul.msk.bf16.gmra.mxu2 %vm158_vm1, %v6060_v35  ;;  %v6078_v35 = vld [vmem:[%s9009_s0 + $0x190] sm:$0xff] }
  0x79   :  { %4709 = vmatmul.msk.bf16.gmra.mxu3 %vm158_vm1, %v6073_v36 }
  0x87   :  { %4437 = vmatmul.msk.bf16.gmra.mxu0 %vm158_vm1, %v6035_v37  ;;  %4528 = vmatmul.msk.bf16.gmra.mxu1 %vm158_vm1, %v6048_v38 }
  0x88   :  { %4619 = vmatmul.msk.bf16.gmra.mxu2 %vm158_vm1, %v6061_v39 }
  0x89   :  { %4710 = vmatmul.msk.bf16.gmra.mxu3 %vm158_vm1, %v6074_v40 }
  0x94   :  { %v213_v43 = vpop.f32.mrf.mxu0  ;;  %v418_v44 = vpop.f32.mrf.mxu1 }
  0x95   :  { %v483_v47 = vmax.f32 %v213_v43, %v418_v44 }
  0x97   :  { %4438 = vmatmul.msk.bf16.gmra.mxu0 %vm158_vm1, %v6036_v41  ;;  %4529 = vmatmul.msk.bf16.gmra.mxu1 %vm158_vm1, %v6049_v42 }
  0x98   :  { %4620 = vmatmul.msk.bf16.gmra.mxu2 %vm158_vm1, %v6062_v45 }
  0x99   :  { %4711 = vmatmul.msk.bf16.gmra.mxu3 %vm158_vm1, %v6075_v46 }
  0x9b   :  { %v649_v48 = vpop.f32.mrf.mxu2 }
  0x9c   :  { %v6546_v49 = vpop.f32.mrf.mxu3  ;;  %v6548_v50 = vmax.f32 %v483_v47, %v649_v48  ;;  %v215_v51 = vpop.f32.mrf.mxu0  ;;  %v6040_v47 = vld [vmem:[%s9009_s0 + $0x60] sm:$0xff]  ;;  %v6053_v48 = vld [vmem:[%s9009_s0 + $0xc8] sm:$0xff] }
  0x9d   :  { %v420_v52 = vpop.f32.mrf.mxu1 }
  0x9e   :  { %v484_v53 = vmax.f32 %v215_v51, %v420_v52  ;;  %v945_v54 = vmax.f32 %v6548_v50, %v6546_v49 }
  0xa3   :  { %v651_v55 = vpop.f32.mrf.mxu2 }
  0xa4   :  { %v6552_v56 = vpop.f32.mrf.mxu3  ;;  %v6560_v59 = vmax.f32 %v484_v53, %v651_v55  ;;  %v218_v60 = vpop.f32.mrf.mxu0  ;;  %v6066_v55 = vld [vmem:[%s9009_s0 + $0x130] sm:$0xff] }
  0xa5   :  { %v423_v61 = vpop.f32.mrf.mxu1 }
  0xa6   :  { %v485_v0 = vmax.f32 %v218_v60, %v423_v61  ;;  %v9024_v50 = vmax.f32 %v6560_v59, %v6552_v56  ;;  %v6115_v56 = vld [vmem:[%s9009_s0 + $0x2b8] sm:$0xff]  ;;  %v6128_v59 = vld [vmem:[%s9009_s0 + $0x320] sm:$0xff] }
  0xa7   :  { %4439 = vmatmul.msk.bf16.gmra.mxu0 %vm158_vm1, %v6037_v57  ;;  %4530 = vmatmul.msk.bf16.gmra.mxu1 %vm158_vm1, %v6050_v58  ;;  %v6079_v57 = vld [vmem:[%s9009_s0 + $0x198] sm:$0xff] }
  0xa8   :  { %4621 = vmatmul.msk.bf16.gmra.mxu2 %vm158_vm1, %v6063_v62 }
  0xa9   :  { %4712 = vmatmul.msk.bf16.gmra.mxu3 %vm158_vm1, %v6076_v63 }
  0xab   :  { %v654_v2 = vpop.f32.mrf.mxu2 }
  0xac   :  { %v6574_v3 = vpop.f32.mrf.mxu3  ;;  %v6576_v4 = vmax.f32 %v485_v0, %v654_v2  ;;  %v220_v5 = vpop.f32.mrf.mxu0 }
  0xad   :  { %v425_v6 = vpop.f32.mrf.mxu1 }
  0xae   :  { %v486_v7 = vmax.f32 %v220_v5, %v425_v6 }
  0xb3   :  { %v656_v9 = vpop.f32.mrf.mxu2 }
  0xb4   :  { %v6580_v10 = vpop.f32.mrf.mxu3  ;;  %v6588_v13 = vmax.f32 %v486_v7, %v656_v9  ;;  %v223_v14 = vpop.f32.mrf.mxu0 }
  0xb5   :  { %v428_v15 = vpop.f32.mrf.mxu1 }
  0xb6   :  { %v487_v18 = vmax.f32 %v223_v14, %v428_v15 }
  0xb7   :  { %4440 = vmatmul.msk.bf16.gmra.mxu0 %vm158_vm1, %v6038_v11  ;;  %4531 = vmatmul.msk.bf16.gmra.mxu1 %vm158_vm1, %v6051_v12  ;;  %v6080_v11 = vld [vmem:[%s9009_s0 + $0x1a0] sm:$0xff]  ;;  %v6093_v12 = vld [vmem:[%s9009_s0 + $0x208] sm:$0xff] }
  0xb8   :  { %4622 = vmatmul.msk.bf16.gmra.mxu2 %vm158_vm1, %v6064_v16 }
  0xb9   :  { %4713 = vmatmul.msk.bf16.gmra.mxu3 %vm158_vm1, %v6077_v17  ;;  %v6106_v17 = vld [vmem:[%s9009_s0 + $0x270] sm:$0xff] }
  0xbb   :  { %v659_v20 = vpop.f32.mrf.mxu2 }
  0xbc   :  { %v6602_v21 = vpop.f32.mrf.mxu3  ;;  %v6604_v22 = vmax.f32 %v487_v18, %v659_v20  ;;  %v225_v23 = vpop.f32.mrf.mxu0  ;;  %v6119_v18 = vld [vmem:[%s9009_s0 + $0x2d8] sm:$0xff] }
  0xbd   :  { %v430_v24 = vpop.f32.mrf.mxu1 }
  0xbe   :  { %v488_v25 = vmax.f32 %v225_v23, %v430_v24 }
  0xc3   :  { %v661_v27 = vpop.f32.mrf.mxu2 }
  0xc4   :  { %v6608_v28 = vpop.f32.mrf.mxu3  ;;  %v6616_v31 = vmax.f32 %v488_v25, %v661_v27  ;;  %v228_v32 = vpop.f32.mrf.mxu0 }
  0xc5   :  { %v433_v33 = vpop.f32.mrf.mxu1 }
  0xc6   :  { %v489_v36 = vmax.f32 %v228_v32, %v433_v33 }
  0xc7   :  { %4441 = vmatmul.msk.bf16.gmra.mxu0 %vm158_vm1, %v6039_v29  ;;  %4532 = vmatmul.msk.bf16.gmra.mxu1 %vm158_vm1, %v6052_v30 }
  0xc8   :  { %4623 = vmatmul.msk.bf16.gmra.mxu2 %vm158_vm1, %v6065_v34 }
  0xc9   :  { %4714 = vmatmul.msk.bf16.gmra.mxu3 %vm158_vm1, %v6078_v35 }
  0xcb   :  { %v664_v38 = vpop.f32.mrf.mxu2 }
  0xcc   :  { %v6630_v39 = vpop.f32.mrf.mxu3  ;;  %v6632_v40 = vmax.f32 %v489_v36, %v664_v38  ;;  %v230_v41 = vpop.f32.mrf.mxu0  ;;  %v6081_v36 = vld [vmem:[%s9009_s0 + $0x1a8] sm:$0xff]  ;;  %v6094_v38 = vld [vmem:[%s9009_s0 + $0x210] sm:$0xff] }
  0xcd   :  { %v435_v42 = vpop.f32.mrf.mxu1 }
  0xce   :  { %v490_v43 = vmax.f32 %v230_v41, %v435_v42 }
  0xd3   :  { %v666_v45 = vpop.f32.mrf.mxu2 }
  0xd4   :  { %v6636_v46 = vpop.f32.mrf.mxu3  ;;  %v6644_v51 = vmax.f32 %v490_v43, %v666_v45  ;;  %v233_v52 = vpop.f32.mrf.mxu0  ;;  %v6107_v45 = vld [vmem:[%s9009_s0 + $0x278] sm:$0xff] }
  0xd5   :  { %v438_v53 = vpop.f32.mrf.mxu1 }
  0xd6   :  { %v491_v58 = vmax.f32 %v233_v52, %v438_v53 }
  0xd7   :  { %4442 = vmatmul.msk.bf16.gmra.mxu0 %vm158_vm1, %v6040_v47  ;;  %4533 = vmatmul.msk.bf16.gmra.mxu1 %vm158_vm1, %v6053_v48  ;;  %v6120_v47 = vld [vmem:[%s9009_s0 + $0x2e0] sm:$0xff] }
  0xd8   :  { %4624 = vmatmul.msk.bf16.gmra.mxu2 %vm158_vm1, %v6066_v55 }
  0xd9   :  { %4715 = vmatmul.msk.bf16.gmra.mxu3 %vm158_vm1, %v6079_v57 }
  0xdb   :  { %v669_v61 = vpop.f32.mrf.mxu2 }
  0xdc   :  { %v6658_v62 = vpop.f32.mrf.mxu3  ;;  %v6660_v63 = vmax.f32 %v491_v58, %v669_v61  ;;  %v235_v0 = vpop.f32.mrf.mxu0 }
  0xdd   :  { %v440_v2 = vpop.f32.mrf.mxu1 }
  0xde   :  { %v492_v5 = vmax.f32 %v235_v0, %v440_v2 }
  0xe3   :  { %v671_v7 = vpop.f32.mrf.mxu2 }
  0xe4   :  { %v6664_v9 = vpop.f32.mrf.mxu3  ;;  %v6672_v14 = vmax.f32 %v492_v5, %v671_v7  ;;  %v238_v15 = vpop.f32.mrf.mxu0 }
  0xe5   :  { %v443_v16 = vpop.f32.mrf.mxu1 }
  0xe6   :  { %v493_v20 = vmax.f32 %v238_v15, %v443_v16 }
  0xe7   :  { %4794 = vmatmul.msk.bf16.vlgmr.msrb.gmra.mxu0 %vm158_vm1, %v6080_v11  ;;  %4885 = vmatmul.msk.bf16.vlgmr.msrb.gmra.mxu1 %vm158_vm1, %v6093_v12  ;;  %v6082_v11 = vld [vmem:[%s9009_s0 + $0x1b0] sm:$0xff]  ;;  %v6095_v12 = vld [vmem:[%s9009_s0 + $0x218] sm:$0xff] }
  0xe8   :  { %4976 = vmatmul.msk.bf16.vlgmr.msrb.gmra.mxu2 %vm158_vm1, %v6106_v17 }
  0xe9   :  { %5067 = vmatmul.msk.bf16.vlgmr.msrb.gmra.mxu3 %vm158_vm1, %v6119_v18  ;;  %v6108_v18 = vld [vmem:[%s9009_s0 + $0x280] sm:$0xff] }
  0xeb   :  { %v674_v24 = vpop.f32.mrf.mxu2 }
  0xec   :  { %v6686_v25 = vpop.f32.mrf.mxu3  ;;  %v6688_v27 = vmax.f32 %v493_v20, %v674_v24  ;;  %v240_v29 = vpop.f32.mrf.mxu0  ;;  %v6121_v20 = vld [vmem:[%s9009_s0 + $0x2e8] sm:$0xff] }
  0xed   :  { %v445_v30 = vpop.f32.mrf.mxu1 }
  0xee   :  { %v494_v32 = vmax.f32 %v240_v29, %v445_v30 }
  0xf3   :  { %v676_v34 = vpop.f32.mrf.mxu2 }
  0xf4   :  { %v6692_v35 = vpop.f32.mrf.mxu3  ;;  %v6700_v41 = vmax.f32 %v494_v32, %v676_v34  ;;  %v243_v42 = vpop.f32.mrf.mxu0 }
  0xf5   :  { %v448_v43 = vpop.f32.mrf.mxu1 }
  0xf6   :  { %v495_v48 = vmax.f32 %v243_v42, %v448_v43 }
  0xf7   :  { %4795 = vmatmul.msk.bf16.gmra.mxu0 %vm158_vm1, %v6081_v36  ;;  %4886 = vmatmul.msk.bf16.gmra.mxu1 %vm158_vm1, %v6094_v38 }
  0xf8   :  { %4977 = vmatmul.msk.bf16.gmra.mxu2 %vm158_vm1, %v6107_v45 }
  0xf9   :  { %5068 = vmatmul.msk.bf16.gmra.mxu3 %vm158_vm1, %v6120_v47 }
  0xfb   :  { %v679_v53 = vpop.f32.mrf.mxu2 }
  0xfc   :  { %v6714_v55 = vpop.f32.mrf.mxu3  ;;  %v6716_v57 = vmax.f32 %v495_v48, %v679_v53  ;;  %v245_v58 = vpop.f32.mrf.mxu0  ;;  %v6083_v48 = vld [vmem:[%s9009_s0 + $0x1b8] sm:$0xff]  ;;  %v6096_v53 = vld [vmem:[%s9009_s0 + $0x220] sm:$0xff] }
  0xfd   :  { %v450_v61 = vpop.f32.mrf.mxu1 }
  0xfe   :  { %v496_v0 = vmax.f32 %v245_v58, %v450_v61 }
 0x103   :  { %v681_v5 = vpop.f32.mrf.mxu2 }
 0x104   :  { %v6720_v7 = vpop.f32.mrf.mxu3  ;;  %v6728_v15 = vmax.f32 %v496_v0, %v681_v5  ;;  %v248_v16 = vpop.f32.mrf.mxu0  ;;  %v6109_v5 = vld [vmem:[%s9009_s0 + $0x288] sm:$0xff] }
 0x105   :  { %v453_v17 = vpop.f32.mrf.mxu1 }
 0x106   :  { %v497_v24 = vmax.f32 %v248_v16, %v453_v17 }
 0x107   :  { %4796 = vmatmul.msk.bf16.gmra.mxu0 %vm158_vm1, %v6082_v11  ;;  %4887 = vmatmul.msk.bf16.gmra.mxu1 %vm158_vm1, %v6095_v12  ;;  %v6122_v11 = vld [vmem:[%s9009_s0 + $0x2f0] sm:$0xff] }
 0x108   :  { %4978 = vmatmul.msk.bf16.gmra.mxu2 %vm158_vm1, %v6108_v18 }
 0x109   :  { %5069 = vmatmul.msk.bf16.gmra.mxu3 %vm158_vm1, %v6121_v20 }
 0x10b   :  { %v684_v30 = vpop.f32.mrf.mxu2 }
 0x10c   :  { %v6742_v32 = vpop.f32.mrf.mxu3  ;;  %v6744_v34 = vmax.f32 %v497_v24, %v684_v30  ;;  %v250_v36 = vpop.f32.mrf.mxu0 }
 0x10d   :  { %v455_v38 = vpop.f32.mrf.mxu1 }
 0x10e   :  { %v498_v42 = vmax.f32 %v250_v36, %v455_v38 }
 0x113   :  { %v686_v45 = vpop.f32.mrf.mxu2 }
 0x114   :  { %v6748_v47 = vpop.f32.mrf.mxu3  ;;  %v6756_v58 = vmax.f32 %v498_v42, %v686_v45  ;;  %v253_v61 = vpop.f32.mrf.mxu0 }
 0x115   :  { %v458_v0 = vpop.f32.mrf.mxu1 }
 0x116   :  { %v499_v12 = vmax.f32 %v253_v61, %v458_v0 }
 0x117   :  { %4797 = vmatmul.msk.bf16.gmra.mxu0 %vm158_vm1, %v6083_v48  ;;  %4888 = vmatmul.msk.bf16.gmra.mxu1 %vm158_vm1, %v6096_v53  ;;  %v6084_v48 = vld [vmem:[%s9009_s0 + $0x1c0] sm:$0xff]  ;;  %v6097_v53 = vld [vmem:[%s9009_s0 + $0x228] sm:$0xff] }
 0x118   :  { %4979 = vmatmul.msk.bf16.gmra.mxu2 %vm158_vm1, %v6109_v5 }
 0x119   :  { %5070 = vmatmul.msk.bf16.gmra.mxu3 %vm158_vm1, %v6122_v11  ;;  %v6110_v11 = vld [vmem:[%s9009_s0 + $0x290] sm:$0xff] }
 0x11b   :  { %v689_v17 = vpop.f32.mrf.mxu2 }
 0x11c   :  { %v6770_v18 = vpop.f32.mrf.mxu3  ;;  %v6772_v20 = vmax.f32 %v499_v12, %v689_v17  ;;  %v255_v24 = vpop.f32.mrf.mxu0  ;;  %v6123_v12 = vld [vmem:[%s9009_s0 + $0x2f8] sm:$0xff] }
 0x11d   :  { %v460_v30 = vpop.f32.mrf.mxu1 }
 0x11e   :  { %v500_v36 = vmax.f32 %v255_v24, %v460_v30 }
 0x123   :  { %v691_v42 = vpop.f32.mrf.mxu2 }
 0x124   :  { %v6776_v45 = vpop.f32.mrf.mxu3  ;;  %v6784_v61 = vmax.f32 %v500_v36, %v691_v42  ;;  %v258_v0 = vpop.f32.mrf.mxu0 }
 0x125   :  { %v463_v5 = vpop.f32.mrf.mxu1 }
 0x126   :  { %v501_v17 = vmax.f32 %v258_v0, %v463_v5 }
 0x127   :  { %4798 = vmatmul.msk.bf16.gmra.mxu0 %vm158_vm1, %v6084_v48  ;;  %4889 = vmatmul.msk.bf16.gmra.mxu1 %vm158_vm1, %v6097_v53  ;;  %v6085_v48 = vld [vmem:[%s9009_s0 + $0x1c8] sm:$0xff]  ;;  %v6098_v53 = vld [vmem:[%s9009_s0 + $0x230] sm:$0xff] }
 0x128   :  { %4980 = vmatmul.msk.bf16.gmra.mxu2 %vm158_vm1, %v6110_v11 }
 0x129   :  { %5071 = vmatmul.msk.bf16.gmra.mxu3 %vm158_vm1, %v6123_v12 }
 0x12b   :  { %v694_v30 = vpop.f32.mrf.mxu2 }
 0x12c   :  { %v6798_v36 = vpop.f32.mrf.mxu3  ;;  %v6800_v42 = vmax.f32 %v501_v17, %v694_v30  ;;  %v260_v38 = vpop.f32.mrf.mxu0 }
 0x12d   :  { %v465_v16 = vpop.f32.mrf.mxu1 }
 0x12e   :  { %v502_v43 = vmax.f32 %v260_v38, %v465_v16  ;;  %v6111_v16 = vld [vmem:[%s9009_s0 + $0x298] sm:$0xff]  ;;  %v6124_v38 = vld [vmem:[%s9009_s0 + $0x300] sm:$0xff] }
 0x133   :  { %v696_v5 = vpop.f32.mrf.mxu2 }
 0x134   :  { %v6804_v24 = vpop.f32.mrf.mxu3  ;;  %v6812_v11 = vmax.f32 %v502_v43, %v696_v5  ;;  %v263_v12 = vpop.f32.mrf.mxu0 }
 0x135   :  { %v468_v17 = vpop.f32.mrf.mxu1 }
 0x136   :  { %v503_v30 = vmax.f32 %v263_v12, %v468_v17 }
 0x137   :  { %4799 = vmatmul.msk.bf16.gmra.mxu0 %vm158_vm1, %v6085_v48  ;;  %4890 = vmatmul.msk.bf16.gmra.mxu1 %vm158_vm1, %v6098_v53  ;;  %v6086_v48 = vld [vmem:[%s9009_s0 + $0x1d0] sm:$0xff]  ;;  %v6099_v53 = vld [vmem:[%s9009_s0 + $0x238] sm:$0xff] }
 0x138   :  { %4981 = vmatmul.msk.bf16.gmra.mxu2 %vm158_vm1, %v6111_v16 }
 0x139   :  { %5072 = vmatmul.msk.bf16.gmra.mxu3 %vm158_vm1, %v6124_v38 }
 0x13b   :  { %v699_v43 = vpop.f32.mrf.mxu2 }
 0x13c   :  { %v6826_v5 = vpop.f32.mrf.mxu3  ;;  %v6828_v29 = vmax.f32 %v503_v30, %v699_v43  ;;  %v265_v2 = vpop.f32.mrf.mxu0 }
 0x13d   :  { %v470_v52 = vpop.f32.mrf.mxu1 }
 0x13e   :  { %v504_v33 = vmax.f32 %v265_v2, %v470_v52  ;;  %v6112_v52 = vld [vmem:[%s9009_s0 + $0x2a0] sm:$0xff]  ;;  %v6125_v2 = vld [vmem:[%s9009_s0 + $0x308] sm:$0xff] }
 0x143   :  { %v701_v17 = vpop.f32.mrf.mxu2 }
 0x144   :  { %v6832_v0 = vpop.f32.mrf.mxu3  ;;  %v6840_v16 = vmax.f32 %v504_v33, %v701_v17  ;;  %v268_v38 = vpop.f32.mrf.mxu0 }
 0x145   :  { %v473_v30 = vpop.f32.mrf.mxu1 }
 0x146   :  { %v505_v43 = vmax.f32 %v268_v38, %v473_v30 }
 0x147   :  { %4800 = vmatmul.msk.bf16.gmra.mxu0 %vm158_vm1, %v6086_v48  ;;  %4891 = vmatmul.msk.bf16.gmra.mxu1 %vm158_vm1, %v6099_v53  ;;  %v6087_v48 = vld [vmem:[%s9009_s0 + $0x1d8] sm:$0xff]  ;;  %v6100_v53 = vld [vmem:[%s9009_s0 + $0x240] sm:$0xff] }
 0x148   :  { %4982 = vmatmul.msk.bf16.gmra.mxu2 %vm158_vm1, %v6112_v52 }
 0x149   :  { %5073 = vmatmul.msk.bf16.gmra.mxu3 %vm158_vm1, %v6125_v2 }
 0x14b   :  { %v704_v33 = vpop.f32.mrf.mxu2 }
 0x14c   :  { %v6854_v17 = vpop.f32.mrf.mxu3  ;;  %v6856_v23 = vmax.f32 %v505_v43, %v704_v33  ;;  %v270_v6 = vpop.f32.mrf.mxu0 }
 0x14d   :  { %v475_v60 = vpop.f32.mrf.mxu1 }
 0x14e   :  { %v506_v44 = vmax.f32 %v270_v6, %v475_v60  ;;  %v6113_v60 = vld [vmem:[%s9009_s0 + $0x2a8] sm:$0xff]  ;;  %v6126_v6 = vld [vmem:[%s9009_s0 + $0x310] sm:$0xff] }
 0x153   :  { %v706_v30 = vpop.f32.mrf.mxu2 }
 0x154   :  { %v6860_v12 = vpop.f32.mrf.mxu3  ;;  %v6868_v52 = vmax.f32 %v506_v44, %v706_v30  ;;  %v273_v2 = vpop.f32.mrf.mxu0 }
 0x155   :  { %v478_v43 = vpop.f32.mrf.mxu1 }
 0x156   :  { %v507_v33 = vmax.f32 %v273_v2, %v478_v43 }
 0x157   :  { %4801 = vmatmul.msk.bf16.gmra.mxu0 %vm158_vm1, %v6087_v48  ;;  %4892 = vmatmul.msk.bf16.gmra.mxu1 %vm158_vm1, %v6100_v53  ;;  %v6088_v48 = vld [vmem:[%s9009_s0 + $0x1e0] sm:$0xff]  ;;  %v6101_v53 = vld [vmem:[%s9009_s0 + $0x248] sm:$0xff] }
 0x158   :  { %4983 = vmatmul.msk.bf16.gmra.mxu2 %vm158_vm1, %v6113_v60 }
 0x159   :  { %5074 = vmatmul.msk.bf16.gmra.mxu3 %vm158_vm1, %v6126_v6 }
 0x15b   :  { %v709_v44 = vpop.f32.mrf.mxu2 }
 0x15c   :  { %v6882_v30 = vpop.f32.mrf.mxu3  ;;  %v6884_v37 = vmax.f32 %v507_v33, %v709_v44  ;;  %v275_v26 = vpop.f32.mrf.mxu0 }
 0x15d   :  { %9022 = vst [vmem:[#allocation2_spill] sm:$0xff] %v6882_v30  ;;  %v480_v19 = vpop.f32.mrf.mxu1 }
 0x15e   :  { %9023 = vst [vmem:[#allocation3_spill] sm:$0xff] %v6884_v37  ;;  %v508_v8 = vmax.f32 %v275_v26, %v480_v19  ;;  %v6114_v19 = vld [vmem:[%s9009_s0 + $0x2b0] sm:$0xff]  ;;  %v6127_v26 = vld [vmem:[%s9009_s0 + $0x318] sm:$0xff] }
 0x163   :  { %v711_v43 = vpop.f32.mrf.mxu2 }
 0x164   :  { %v6888_v38 = vpop.f32.mrf.mxu3  ;;  %v6896_v60 = vmax.f32 %v508_v8, %v711_v43  ;;  %v1111_v6 = vpop.f32.mrf.mxu0 }
 0x165   :  { %v1342_v33 = vpop.f32.mrf.mxu1  ;;  %v1176_v44 = vmax.f32 %v945_v54, %v1111_v6 }
 0x166   :  { %v970_v2 = vmax.f32 %v6896_v60, %v6888_v38  ;;  %v7234_v38 = vld [vmem:[%s9010_s4] ss:$0 sm:$0xff] }
 0x167   :  { %v1407_v1 = vmax.f32 %v1176_v44, %v1342_v33  ;;  %4802 = vmatmul.msk.bf16.gmra.mxu0 %vm158_vm1, %v6088_v48  ;;  %4893 = vmatmul.msk.bf16.gmra.mxu1 %vm158_vm1, %v6101_v53 }
 0x168   :  { %4984 = vmatmul.msk.bf16.gmra.mxu2 %vm158_vm1, %v6114_v19  ;;  %v6089_v19 = vld [vmem:[%s9009_s0 + $0x1e8] sm:$0xff] }
 0x169   :  { %5075 = vmatmul.msk.bf16.gmra.mxu3 %vm158_vm1, %v6127_v26 }
 0x16b   :  { %v1573_v8 = vpop.f32.mrf.mxu2 }
 0x16c   :  { %v6913_v43 = vpop.f32.mrf.mxu3  ;;  %v6915_v30 = vmax.f32 %v1407_v1, %v1573_v8  ;;  %v1113_v37 = vpop.f32.mrf.mxu0  ;;  %v6102_v1 = vld [vmem:[%s9009_s0 + $0x250] sm:$0xff] }
 0x16d   :  { %v1344_v49 = vpop.f32.mrf.mxu1  ;;  %v1177_v54 = vmax.f32 %v9024_v50, %v1113_v37  ;;  %v9025_v37 = vmax.f32 %v6576_v4, %v6574_v3  ;;  %v6090_v3 = vld [vmem:[%s9009_s0 + $0x1f0] sm:$0xff]  ;;  %v6103_v4 = vld [vmem:[%s9009_s0 + $0x258] sm:$0xff] }
 0x16e   :  { %v1869_v48 = vmax.f32 %v6915_v30, %v6913_v43  ;;  %v5200_v30 = vld [vmem:[%s9011_s5 + $0xf8] sm:$0xff] }
 0x16f   :  { %v1408_v6 = vmax.f32 %v1177_v54, %v1344_v49  ;;  %v9026_v54 = vmax.f32 %v6588_v13, %v6580_v10  ;;  %v9027_v10 = vmax.f32 %v6604_v22, %v6602_v21  ;;  %v6091_v21 = vld [vmem:[%s9009_s0 + $0x1f8] sm:$0xff]  ;;  %v6104_v22 = vld [vmem:[%s9009_s0 + $0x260] sm:$0xff] }
 0x173   :  { %v1575_v53 = vpop.f32.mrf.mxu2 }
 0x174   :  { %v6922_v33 = vpop.f32.mrf.mxu3  ;;  %v6930_v26 = vmax.f32 %v1408_v6, %v1575_v53  ;;  %v1116_v44 = vpop.f32.mrf.mxu0 }
 0x175   :  { %v6941_v8 = vmax.f32 %v9025_v37, %v1116_v44 }
 0x176   :  { %v1870_v49 = vmax.f32 %v6930_v26, %v6922_v33  ;;  %v5196_v33 = vld [vmem:[%s9011_s5 + $0xd8] sm:$0xff] }
 0x177   :  { %4803 = vmatmul.msk.bf16.gmra.mxu0 %vm158_vm1, %v6089_v19  ;;  %4894 = vmatmul.msk.bf16.gmra.mxu1 %vm158_vm1, %v6102_v1  ;;  %v6116_v19 = vld [vmem:[%s9009_s0 + $0x2c0] sm:$0xff]  ;;  %v6129_v1 = vld [vmem:[%s9009_s0 + $0x328] sm:$0xff] }
 0x178   :  { %4985 = vmatmul.msk.bf16.gmra.mxu2 %vm158_vm1, %v6115_v56  ;;  %v9028_v56 = vmax.f32 %v6616_v31, %v6608_v28  ;;  %v9029_v28 = vmax.f32 %v6632_v40, %v6630_v39  ;;  %v6092_v39 = vld [vmem:[%s9009_s0 + $0x200] sm:$0xff]  ;;  %v6105_v40 = vld [vmem:[%s9009_s0 + $0x268] sm:$0xff] }
 0x179   :  { %5076 = vmatmul.msk.bf16.gmra.mxu3 %vm158_vm1, %v6128_v59 }
 0x17c   :  { %v1118_v50 = vpop.f32.mrf.mxu0 }
 0x17d   :  { %v6952_v6 = vmax.f32 %v9026_v54, %v1118_v50  ;;  %v6117_v50 = vld [vmem:[%s9009_s0 + $0x2c8] sm:$0xff]  ;;  %v6130_v54 = vld [vmem:[%s9009_s0 + $0x330] sm:$0xff] }
 0x184   :  { %v1121_v53 = vpop.f32.mrf.mxu0 }
 0x185   :  { %v6969_v13 = vmax.f32 %v9027_v10, %v1121_v53  ;;  %v6131_v10 = vld [vmem:[%s9009_s0 + $0x338] sm:$0xff] }
 0x187   :  { %4804 = vmatmul.msk.bf16.gmra.mxu0 %vm158_vm1, %v6090_v3  ;;  %4895 = vmatmul.msk.bf16.gmra.mxu1 %vm158_vm1, %v6103_v4  ;;  %v9030_v4 = vmax.f32 %v6644_v51, %v6636_v46  ;;  %v9031_v46 = vmax.f32 %v6660_v63, %v6658_v62  ;;  %v6132_v62 = vld [vmem:[%s9009_s0 + $0x340] sm:$0xff] }
 0x188   :  { %4986 = vmatmul.msk.bf16.gmra.mxu2 %vm158_vm1, %v6116_v19 }
 0x189   :  { %5077 = vmatmul.msk.bf16.gmra.mxu3 %vm158_vm1, %v6129_v1  ;;  %v6118_v1 = vld [vmem:[%s9009_s0 + $0x2d0] sm:$0xff] }
 0x18c   :  { %v1123_v44 = vpop.f32.mrf.mxu0 }
 0x18d   :  { %v6978_v59 = vmax.f32 %v9028_v56, %v1123_v44  ;;  %v9032_v56 = vmax.f32 %v6672_v14, %v6664_v9  ;;  %v6133_v9 = vld [vmem:[%s9009_s0 + $0x348] sm:$0xff] }
 0x194   :  { %v1126_v37 = vpop.f32.mrf.mxu0 }
 0x195   :  { %v6995_v31 = vmax.f32 %v9029_v28, %v1126_v37 }
 0x197   :  { %4805 = vmatmul.msk.bf16.gmra.mxu0 %vm158_vm1, %v6091_v21  ;;  %4896 = vmatmul.msk.bf16.gmra.mxu1 %vm158_vm1, %v6104_v22  ;;  %v9033_v22 = vmax.f32 %v6688_v27, %v6686_v25  ;;  %v9036_v27 = vmax.f32 %v6728_v15, %v6720_v7  ;;  %v6135_v7 = vld [vmem:[%s9009_s0 + $0x358] sm:$0xff] }
 0x198   :  { %4987 = vmatmul.msk.bf16.gmra.mxu2 %vm158_vm1, %v6117_v50 }
 0x199   :  { %5078 = vmatmul.msk.bf16.gmra.mxu3 %vm158_vm1, %v6130_v54  ;;  %v9034_v54 = vmax.f32 %v6700_v41, %v6692_v35  ;;  %v6134_v35 = vld [vmem:[%s9009_s0 + $0x350] sm:$0xff] }
 0x19c   :  { %v1128_v3 = vpop.f32.mrf.mxu0 }
 0x19d   :  { %v7004_v53 = vmax.f32 %v9030_v4, %v1128_v3  ;;  %v9035_v3 = vmax.f32 %v6716_v57, %v6714_v55  ;;  %v9038_v57 = vmax.f32 %v6756_v58, %v6748_v47  ;;  %v2164_v47 = vld [vmem:[%s9011_s5 + $0x38] sm:$0xff]  ;;  %v6136_v58 = vld [vmem:[%s9009_s0 + $0x360] sm:$0xff] }
 0x19e   :  { %2180 = vmatpush.msra.mxu1 %v2164_v47  ;;  %v9046_v47 = vmax.f32 %v6868_v52, %v6860_v12  ;;  %v6139_v12 = vld [vmem:[%s9009_s0 + $0x378] sm:$0xff] }
 0x1a4   :  { %v1131_v19 = vpop.f32.mrf.mxu0 }
 0x1a5   :  { %v7021_v51 = vmax.f32 %v9031_v46, %v1131_v19 }
 0x1a7   :  { %4806 = vmatmul.msk.bf16.gmra.mxu0 %vm158_vm1, %v6092_v39  ;;  %4897 = vmatmul.msk.bf16.gmra.mxu1 %vm158_vm1, %v6105_v40  ;;  %v9037_v40 = vmax.f32 %v6744_v34, %v6742_v32  ;;  %v9040_v34 = vmax.f32 %v6784_v61, %v6776_v45  ;;  %v5180_v45 = vld [vmem:[%s9011_s5 + $0x78] sm:$0xff] }
 0x1a8   :  { %4988 = vmatmul.msk.bf16.gmra.mxu2 %vm158_vm1, %v6118_v1  ;;  %v5190_v61 = vld [vmem:[%s9011_s5 + $0xb8] sm:$0xff] }
 0x1a9   :  { %5079 = vmatmul.msk.bf16.gmra.mxu3 %vm158_vm1, %v6131_v10  ;;  %v9039_v10 = vmax.f32 %v6772_v20, %v6770_v18  ;;  %v9041_v20 = vmax.f32 %v6800_v42, %v6798_v36  ;;  %2223 = vmatpush.msra.mxu2 %v5180_v45  ;;  %v6137_v36 = vld [vmem:[%s9009_s0 + $0x368] sm:$0xff] }
 0x1aa   :  { %2263 = vmatpush.msra.mxu3 %v5190_v61  ;;  %v5176_v61 = vld [vmem:[%s9011_s5 + $0x58] sm:$0xff] }
 0x1ac   :  { %v1133_v44 = vpop.f32.mrf.mxu0 }
 0x1ad   :  { %v7030_v21 = vmax.f32 %v9032_v56, %v1133_v44 }
 0x1b4   :  { %v1136_v63 = vpop.f32.mrf.mxu0 }
 0x1b5   :  { %v7038_v37 = vmax.f32 %v9033_v22, %v1136_v63  ;;  %v9042_v63 = vmax.f32 %v6812_v11, %v6804_v24  ;;  %v2163_v24 = vld [vmem:[%s9011_s5 + $0x30] sm:$0xff]  ;;  %v9044_v11 = vmax.f32 %v6840_v16, %v6832_v0  ;;  %v7141_v0 = vpop.f32.mrf.mxu3  ;;  %v2160_v16 = vld [vmem:[%s9011_s5 + $0x18] sm:$0xff] }
 0x1b6   :  { %2181 = vmatpush.msra.mxu1 %v2163_v24 }
 0x1b7   :  { %5158 = vmatmul.msk.bf16.vlgmr.msra.gmra.mxu0 %vm158_vm1, %v6132_v62 }
 0x1bc   :  { %v1138_v50 = vpop.f32.mrf.mxu0 }
 0x1bd   :  { %v7044_v28 = vmax.f32 %v9034_v54, %v1138_v50  ;;  %v9043_v50 = vmax.f32 %v6828_v29, %v6826_v5  ;;  %v2162_v29 = vld [vmem:[%s9011_s5 + $0x28] sm:$0xff]  ;;  %v2161_v5 = vld [vmem:[%s9011_s5 + $0x20] sm:$0xff] }
 0x1be   :  { %2182 = vmatpush.msra.mxu1 %v2162_v29  ;;  %v5173_v29 = vld [vmem:[%s9011_s5 + $0x40] sm:$0xff] }
 0x1c0   :  { %2183 = vmatpush.msra.mxu1 %v2161_v5 }
 0x1c2   :  { %2184 = vmatpush.msra.mxu1 %v2160_v16 }
 0x1c4   :  { %v1141_v14 = vpop.f32.mrf.mxu0 }
 0x1c5   :  { %v7052_v4 = vmax.f32 %v9035_v3, %v1141_v14 }
 0x1c7   :  { %5159 = vmatmul.msk.bf16.gmra.mxu0 %vm158_vm1, %v6133_v9  ;;  %v7120_v9 = vpop.f32.mrf.mxu1 }
 0x1cc   :  { %v1143_v25 = vpop.f32.mrf.mxu0 }
 0x1cd   :  { %v7058_v39 = vmax.f32 %v9036_v27, %v1143_v25  ;;  %v7130_v25 = vpop.f32.mrf.mxu2  ;;  %v5179_v27 = vld [vmem:[%s9011_s5 + $0x70] sm:$0xff] }
 0x1ce   :  { %2224 = vmatpush.msra.mxu2 %v5179_v27 }
 0x1d4   :  { %v1146_v41 = vpop.f32.mrf.mxu0 }
 0x1d5   :  { %v7066_v19 = vmax.f32 %v9037_v40, %v1146_v41  ;;  %v5189_v40 = vld [vmem:[%s9011_s5 + $0xb0] sm:$0xff] }
 0x1d6   :  { %2264 = vmatpush.msra.mxu3 %v5189_v40  ;;  %v5187_v40 = vld [vmem:[%s9011_s5 + $0xa0] sm:$0xff] }
 0x1d7   :  { %5160 = vmatmul.msk.bf16.gmra.mxu0 %vm158_vm1, %v6134_v35  ;;  %v6138_v35 = vld [vmem:[%s9009_s0 + $0x370] sm:$0xff] }
 0x1dc   :  { %v1148_v55 = vpop.f32.mrf.mxu0 }
 0x1dd   :  { %v7072_v1 = vmax.f32 %v9038_v57, %v1148_v55  ;;  %v2159_v55 = vld [vmem:[%s9011_s5 + $0x10] sm:$0xff]  ;;  %v9045_v57 = vmax.f32 %v6856_v23, %v6854_v17  ;;  %v7171_v23 = vpop.f32.mrf.mxu3 }
 0x1de   :  { %2185 = vmatpush.msra.mxu1 %v2159_v55 }
 0x1e4   :  { %v1151_v15 = vpop.f32.mrf.mxu0 }
 0x1e5   :  { %v7080_v46 = vmax.f32 %v9039_v10, %v1151_v15  ;;  %v7160_v15 = vpop.f32.mrf.mxu1  ;;  %v2158_v10 = vld [vmem:[%s9011_s5 + $0x8] sm:$0xff]  ;;  %v7202_v24 = vpop.f32.mrf.mxu3 }
 0x1e6   :  { %2186 = vmatpush.msra.mxu1 %v2158_v10 }
 0x1e7   :  { %5161 = vmatmul.msk.bf16.gmra.mxu0 %vm158_vm1, %v6135_v7 }
 0x1ec   :  { %v1153_v32 = vpop.f32.mrf.mxu0 }
 0x1ed   :  { %v7086_v44 = vmax.f32 %v9040_v34, %v1153_v32  ;;  %v2157_v32 = vld [vmem:[%s9011_s5] sm:$0xff]  ;;  %v7169_v34 = vpop.f32.mrf.mxu2  ;;  %v7184_v45 = vpop.f32.mrf.mxu1 }
 0x1ee   :  { %2187 = vmatpush.msra.mxu1 %v2157_v32  ;;  %v7226_v55 = vpop.f32.mrf.mxu3  ;;  %v5185_v32 = vld [vmem:[%s9011_s5 + $0x90] sm:$0xff] }
 0x1f0   :  { %2303 = vmatpush.msrb.mxu1 %v5200_v30 }
 0x1f4   :  { %v1156_v18 = vpop.f32.mrf.mxu0 }
 0x1f5   :  { %v7097_v56 = vmax.f32 %v9041_v20, %v1156_v18  ;;  %v5178_v18 = vld [vmem:[%s9011_s5 + $0x68] sm:$0xff]  ;;  %v5177_v20 = vld [vmem:[%s9011_s5 + $0x60] sm:$0xff]  ;;  %v7211_v5 = vpop.f32.mrf.mxu1 }
 0x1f6   :  { %2225 = vmatpush.msra.mxu2 %v5178_v18  ;;  %v5184_v18 = vld [vmem:[%s9011_s5 + $0x88] sm:$0xff]  ;;  %v7261_v43 = vpop.f32.mrf.mxu3 }
 0x1f7   :  { %5162 = vmatmul.msk.bf16.gmra.mxu0 %vm158_vm1, %v6136_v58 }
 0x1f8   :  { %2226 = vmatpush.msra.mxu2 %v5177_v20 }
 0x1fa   :  { %2227 = vmatpush.msra.mxu2 %v5176_v61  ;;  %v5183_v61 = vld [vmem:[%s9011_s5 + $0x80] sm:$0xff] }
 0x1fc   :  { %v1158_v62 = vpop.f32.mrf.mxu0 }
 0x1fd   :  { %v7109_v22 = vmax.f32 %v9042_v63, %v1158_v62  ;;  %v7189_v62 = vpop.f32.mrf.mxu2  ;;  %v5175_v63 = vld [vmem:[%s9011_s5 + $0x50] sm:$0xff]  ;;  %v7239_v60 = vpop.f32.mrf.mxu1 }
 0x1fe   :  { %2228 = vmatpush.msra.mxu2 %v5175_v63 }
 0x204   :  { %v1161_v42 = vpop.f32.mrf.mxu0 }
 0x205   :  { %v7117_v54 = vmax.f32 %v9043_v50, %v1161_v42  ;;  %v9048_v42 = vld [vmem:[#allocation2_spill] sm:$0xff]  ;;  %v7213_v27 = vpop.f32.mrf.mxu2 }
 0x207   :  { %5163 = vmatmul.msk.bf16.gmra.mxu0 %vm158_vm1, %v6137_v36  ;;  %v9047_v36 = vld [vmem:[#allocation3_spill] sm:$0xff] }
 0x208   :  { %v9049_v50 = vmax.f32 %v9047_v36, %v9048_v42  ;;  %v7271_v36 = vpop.f32.mrf.mxu1  ;;  %v5198_v42 = vld [vmem:[%s9011_s5 + $0xe8] sm:$0xff] }
 0x20c   :  { %v1163_v14 = vpop.f32.mrf.mxu0 }
 0x20d   :  { %v7128_v3 = vmax.f32 %v9044_v11, %v1163_v14  ;;  %v5174_v11 = vld [vmem:[%s9011_s5 + $0x48] sm:$0xff] }
 0x20e   :  { %2229 = vmatpush.msra.mxu2 %v5174_v11 }
 0x210   :  { %2230 = vmatpush.msra.mxu2 %v5173_v29 }
 0x214   :  { %v1166_v41 = vpop.f32.mrf.mxu0 }
 0x215   :  { %v7158_v7 = vmax.f32 %v9045_v57, %v1166_v41  ;;  %v5188_v41 = vld [vmem:[%s9011_s5 + $0xa8] sm:$0xff]  ;;  %v5186_v57 = vld [vmem:[%s9011_s5 + $0x98] sm:$0xff] }
 0x216   :  { %2265 = vmatpush.msra.mxu3 %v5188_v41  ;;  %v1410_v41 = vmax.f32 %v6952_v6, %v7160_v15  ;;  %v5210_v6 = vld [vmem:[%s9011_s5 + $0x138] sm:$0xff] }
 0x217   :  { %5164 = vmatmul.msk.bf16.gmra.mxu0 %vm158_vm1, %v6138_v35  ;;  %2343 = vmatpush.msrb.mxu2 %v5210_v6 }
 0x218   :  { %2266 = vmatpush.msra.mxu3 %v5187_v40 }
 0x21a   :  { %2267 = vmatpush.msra.mxu3 %v5186_v57  ;;  %v1641_v57 = vmax.f32 %v1410_v41, %v7169_v34 }
 0x21c   :  { %v1168_v17 = vpop.f32.mrf.mxu0  ;;  %2268 = vmatpush.msra.mxu3 %v5185_v32  ;;  %v7307_v32 = vpop.f32.mrf.mxu1  ;;  %v1872_v34 = vmax.f32 %v1641_v57, %v7171_v23 }
 0x21d   :  { %v7176_v58 = vmax.f32 %v9046_v47, %v1168_v17  ;;  %v7247_v47 = vpop.f32.mrf.mxu2 }
 0x21e   :  { %2269 = vmatpush.msra.mxu3 %v5184_v18  ;;  %v5209_v18 = vld [vmem:[%s9011_s5 + $0x130] sm:$0xff] }
 0x21f   :  { %2344 = vmatpush.msrb.mxu2 %v5209_v18 }
 0x220   :  { %2270 = vmatpush.msra.mxu3 %v5183_v61 }
 0x224   :  { %v1171_v52 = vpop.f32.mrf.mxu0 }
 0x225   :  { %v7200_v14 = vmax.f32 %v9049_v50, %v1171_v52  ;;  %v1409_v52 = vmax.f32 %v6941_v8, %v7120_v9  ;;  %v5197_v8 = vld [vmem:[%s9011_s5 + $0xe0] sm:$0xff]  ;;  %v7281_v9 = vpop.f32.mrf.mxu2 }
 0x227   :  { %5165 = vmatmul.msk.bf16.gmra.mxu0 %vm158_vm1, %v6139_v12  ;;  %v5199_v12 = vld [vmem:[%s9011_s5 + $0xf0] sm:$0xff]  ;;  %v1640_v50 = vmax.f32 %v1409_v52, %v7130_v25  ;;  %v7291_v25 = vpop.f32.mrf.mxu3  ;;  %v5207_v52 = vld [vmem:[%s9011_s5 + $0x120] sm:$0xff] }
 0x228   :  { %2304 = vmatpush.msrb.mxu1 %v5199_v12 }
 0x229   :  { %v1871_v26 = vmax.f32 %v1640_v50, %v7141_v0  ;;  %v5194_v0 = vld [vmem:[%s9011_s5 + $0xc8] sm:$0xff] }
 0x22a   :  { %2305 = vmatpush.msrb.mxu1 %v5198_v42 }
 0x22c   :  { %v1173_v16 = vpop.f32.mrf.mxu0  ;;  %2306 = vmatpush.msrb.mxu1 %v5197_v8  ;;  %v1412_v8 = vmax.f32 %v6978_v59, %v7211_v5  ;;  %v5220_v59 = vld [vmem:[%s9011_s5 + $0x178] sm:$0xff] }
 0x22d   :  { %v7218_v35 = vmax.f32 %v970_v2, %v1173_v16  ;;  %v6140_v2 = vld [vmem:[%s9009_s0 + $0x380] sm:$0xff]  ;;  %v5195_v16 = vld [vmem:[%s9011_s5 + $0xd0] sm:$0xff]  ;;  %v7313_v15 = vpop.f32.mrf.mxu2  ;;  %2383 = vmatpush.msrb.mxu3 %v5220_v59 }
 0x22e   :  { %2307 = vmatpush.msrb.mxu1 %v5196_v33 }
 0x22f   :  { %v7321_v30 = vpop.f32.mrf.mxu3 }
 0x230   :  { %2308 = vmatpush.msrb.mxu1 %v5195_v16 }
 0x232   :  { %2309 = vmatpush.msrb.mxu1 %v5194_v0  ;;  %v1413_v0 = vmax.f32 %v6995_v31, %v7239_v60  ;;  %v5216_v31 = vld [vmem:[%s9011_s5 + $0x158] sm:$0xff] }
 0x234   :  { %v2035_v10 = vpop.f32.mrf.mxu0 }
 0x235   :  { %v2100_v17 = vmax.f32 %v1869_v48, %v2035_v10  ;;  %v5193_v10 = vld [vmem:[%s9011_s5 + $0xc0] sm:$0xff]  ;;  %v7341_v42 = vpop.f32.mrf.mxu2 }
 0x236   :  { %2310 = vmatpush.msrb.mxu1 %v5193_v10  ;;  %v5218_v10 = vld [vmem:[%s9011_s5 + $0x168] sm:$0xff] }
 0x237   :  { %v2130_v20 = vadd.f32 %v7234_v38, %v2100_v17  ;;  %5166 = vmatmul.msk.bf16.gmra.mxu0 %vm158_vm1, %v6140_v2  ;;  %v7357_v16 = vpop.f32.mrf.mxu3 }
 0x239   :  { %5171 = vmatmul.msk.f32.vlgmr.msra.gmra.mxu1 %vm2165_vm2, %v2130_v20  ;;  %v1411_v20 = vmax.f32 %v6969_v13, %v7184_v45  ;;  %v5206_v13 = vld [vmem:[%s9011_s5 + $0x118] sm:$0xff]  ;;  %v7335_v45 = vpop.f32.mrf.mxu1 }
 0x23b   :  { %v1642_v12 = vmax.f32 %v1411_v20, %v7189_v62  ;;  %v6142_v62 = vld [vmem:[%s9009_s0 + $0x390] sm:$0xff] }
 0x23c   :  { %v2037_v48 = vpop.f32.mrf.mxu0  ;;  %v5215_v20 = vld [vmem:[%s9011_s5 + $0x150] sm:$0xff] }
 0x23d   :  { %v2101_v63 = vmax.f32 %v1870_v49, %v2037_v48  ;;  %v6141_v49 = vld [vmem:[%s9009_s0 + $0x388] sm:$0xff] }
 0x23e   :  { %v5208_v48 = vld [vmem:[%s9011_s5 + $0x128] sm:$0xff] }
 0x23f   :  { %v2131_v11 = vadd.f32 %v7234_v38, %v2101_v63  ;;  %2345 = vmatpush.msrb.mxu2 %v5208_v48  ;;  %v1873_v63 = vmax.f32 %v1642_v12, %v7202_v24  ;;  %v5204_v24 = vld [vmem:[%s9011_s5 + $0x108] sm:$0xff]  ;;  %v7385_v60 = vpop.f32.mrf.mxu3 }
 0x241   :  { %5172 = vmatmul.msk.f32.gmra.mxu1 %vm2165_vm2, %v2131_v11  ;;  %2346 = vmatpush.msrb.mxu2 %v5207_v52  ;;  %v5205_v11 = vld [vmem:[%s9011_s5 + $0x110] sm:$0xff] }
 0x243   :  { %2347 = vmatpush.msrb.mxu2 %v5206_v13  ;;  %v5213_v13 = vld [vmem:[%s9011_s5 + $0x140] sm:$0xff] }
 0x244   :  { %v2040_v29 = vpop.f32.mrf.mxu0 }
 0x245   :  { %v2102_v40 = vmax.f32 %v1871_v26, %v2040_v29  ;;  %2348 = vmatpush.msrb.mxu2 %v5205_v11  ;;  %v1643_v26 = vmax.f32 %v1412_v8, %v7213_v27  ;;  %v5203_v29 = vld [vmem:[%s9011_s5 + $0x100] sm:$0xff]  ;;  %v7364_v27 = vpop.f32.mrf.mxu1  ;;  %v1415_v11 = vmax.f32 %v7021_v51, %v7307_v32  ;;  %v5226_v51 = vld [vmem:[%s9011_s5 + $0x198] sm:$0xff] }
 0x247   :  { %v2132_v2 = vadd.f32 %v7234_v38, %v2102_v40  ;;  %5167 = vmatmul.msk.bf16.gmra.mxu0 %vm158_vm1, %v6141_v49  ;;  %2349 = vmatpush.msrb.mxu2 %v5204_v24  ;;  %v1874_v5 = vmax.f32 %v1643_v26, %v7226_v55  ;;  %v5219_v40 = vld [vmem:[%s9011_s5 + $0x170] sm:$0xff]  ;;  %v1644_v55 = vmax.f32 %v1413_v0, %v7247_v47  ;;  %v6143_v47 = vld [vmem:[%s9009_s0 + $0x398] sm:$0xff]  ;;  %v5227_v26 = vld [vmem:[%s9011_s5 + $0x1a0] sm:$0xff] }
 0x248   :  { %2384 = vmatpush.msrb.mxu3 %v5219_v40  ;;  %v1646_v24 = vmax.f32 %v1415_v11, %v7313_v15 }
 0x249   :  { %5181 = vmatmul.msk.f32.vlgmr.msra.gmra.mxu2 %vm2165_vm2, %v2132_v2  ;;  %v7371_v2 = vpop.f32.mrf.mxu2 }
 0x24a   :  { %2350 = vmatpush.msrb.mxu2 %v5203_v29  ;;  %2385 = vmatpush.msrb.mxu3 %v5218_v10  ;;  %v1877_v15 = vmax.f32 %v1646_v24, %v7321_v30  ;;  %v6144_v29 = vld [vmem:[%s9009_s0 + $0x3a0] sm:$0xff]  ;;  %v5224_v30 = vld [vmem:[%s9011_s5 + $0x188] sm:$0xff] }
 0x24c   :  { %v2042_v17 = vpop.f32.mrf.mxu0 }
 0x24d   :  { %v2103_v61 = vmax.f32 %v1872_v34, %v2042_v17  ;;  %v5217_v34 = vld [vmem:[%s9011_s5 + $0x160] sm:$0xff]  ;;  %v1875_v17 = vmax.f32 %v1644_v55, %v7261_v43  ;;  %v7396_v12 = vpop.f32.mrf.mxu1  ;;  %v5214_v43 = vld [vmem:[%s9011_s5 + $0x148] sm:$0xff] }
 0x24e   :  { %2386 = vmatpush.msrb.mxu3 %v5217_v34  ;;  %v5223_v55 = vld [vmem:[%s9011_s5 + $0x180] sm:$0xff] }
 0x24f   :  { %v2133_v23 = vadd.f32 %v7234_v38, %v2103_v61  ;;  %v1414_v61 = vmax.f32 %v7004_v53, %v7271_v36  ;;  %v5230_v53 = vld [vmem:[%s9011_s5 + $0x1b8] sm:$0xff] }
 0x250   :  { %2387 = vmatpush.msrb.mxu3 %v5216_v31  ;;  %2423 = vmatpush.msra.mxu1 %v5230_v53  ;;  %v5239_v31 = vld [vmem:[%s9011_s5 + $0x1f0] sm:$0xff] }
 0x251   :  { %5182 = vmatmul.msk.f32.gmra.mxu2 %vm2165_vm2, %v2133_v23  ;;  %v1645_v23 = vmax.f32 %v1414_v61, %v7281_v9  ;;  %v7414_v9 = vpop.f32.mrf.mxu3 }
 0x252   :  { %2388 = vmatpush.msrb.mxu3 %v5215_v20 }
 0x253   :  { %v1876_v36 = vmax.f32 %v1645_v23, %v7291_v25  ;;  %v5235_v23 = vld [vmem:[%s9011_s5 + $0x1d0] sm:$0xff] }
 0x254   :  { %v2045_v50 = vpop.f32.mrf.mxu0  ;;  %2389 = vmatpush.msrb.mxu3 %v5214_v43 }
 0x255   :  { %v2104_v33 = vmax.f32 %v1873_v63, %v2045_v50  ;;  %v7407_v63 = vpop.f32.mrf.mxu2  ;;  %v5229_v50 = vld [vmem:[%s9011_s5 + $0x1b0] sm:$0xff] }
 0x256   :  { %2390 = vmatpush.msrb.mxu3 %v5213_v13  ;;  %2424 = vmatpush.msra.mxu1 %v5229_v50  ;;  %v5233_v50 = vld [vmem:[%s9011_s5 + $0x1c0] sm:$0xff] }
 0x257   :  { %v2134_v49 = vadd.f32 %v7234_v38, %v2104_v33  ;;  %5168 = vmatmul.msk.bf16.gmra.mxu0 %vm158_vm1, %v6142_v62  ;;  %v5228_v33 = vld [vmem:[%s9011_s5 + $0x1a8] sm:$0xff] }
 0x258   :  { %2425 = vmatpush.msra.mxu1 %v5228_v33 }
 0x259   :  { %5191 = vmatmul.msk.f32.vlgmr.msra.gmra.mxu3 %vm2165_vm2, %v2134_v49  ;;  %v7429_v49 = vpop.f32.mrf.mxu1  ;;  %v7446_v0 = vpop.f32.mrf.mxu3 }
 0x25a   :  { %2426 = vmatpush.msra.mxu1 %v5227_v26  ;;  %v1419_v33 = vmax.f32 %v7052_v4, %v7429_v49  ;;  %v5248_v26 = vld [vmem:[%s9011_s5 + $0x228] sm:$0xff]  ;;  %v5246_v4 = vld [vmem:[%s9011_s5 + $0x218] sm:$0xff] }
 0x25c   :  { %v2047_v41 = vpop.f32.mrf.mxu0  ;;  %2427 = vmatpush.msra.mxu1 %v5226_v51 }
 0x25d   :  { %v2105_v57 = vmax.f32 %v1874_v5, %v2047_v41  ;;  %v7435_v32 = vpop.f32.mrf.mxu2  ;;  %v5225_v5 = vld [vmem:[%s9011_s5 + $0x190] sm:$0xff]  ;;  %v1416_v41 = vmax.f32 %v7030_v21, %v7335_v45  ;;  %v5240_v21 = vld [vmem:[%s9011_s5 + $0x1f8] sm:$0xff] }
 0x25e   :  { %2428 = vmatpush.msra.mxu1 %v5225_v5  ;;  %2463 = vmatpush.msra.mxu2 %v5240_v21  ;;  %v1650_v51 = vmax.f32 %v1419_v33, %v7435_v32  ;;  %v5245_v32 = vld [vmem:[%s9011_s5 + $0x210] sm:$0xff]  ;;  %v5268_v33 = vld [vmem:[%s9011_s5 + $0x2a8] sm:$0xff] }
 0x25f   :  { %v2135_v6 = vadd.f32 %v7234_v38, %v2105_v57  ;;  %v1647_v57 = vmax.f32 %v1416_v41, %v7341_v42 }
 0x260   :  { %2429 = vmatpush.msra.mxu1 %v5224_v30  ;;  %2464 = vmatpush.msra.mxu2 %v5239_v31  ;;  %v1881_v49 = vmax.f32 %v1650_v51, %v7446_v0  ;;  %v5244_v30 = vld [vmem:[%s9011_s5 + $0x208] sm:$0xff]  ;;  %v5243_v0 = vld [vmem:[%s9011_s5 + $0x200] sm:$0xff] }
 0x261   :  { %5192 = vmatmul.msk.f32.gmra.mxu3 %vm2165_vm2, %v2135_v6  ;;  %v7461_v45 = vpop.f32.mrf.mxu1  ;;  %v1878_v42 = vmax.f32 %v1647_v57, %v7357_v16  ;;  %v5237_v16 = vld [vmem:[%s9011_s5 + $0x1e0] sm:$0xff] }
 0x262   :  { %2430 = vmatpush.msra.mxu1 %v5223_v55  ;;  %v1420_v41 = vmax.f32 %v7058_v39, %v7461_v45  ;;  %v5260_v39 = vld [vmem:[%s9011_s5 + $0x278] sm:$0xff] }
 0x264   :  { %v2050_v18 = vpop.f32.mrf.mxu0 }
 0x265   :  { %v2106_v48 = vmax.f32 %v1875_v17, %v2050_v18  ;;  %v1605_v6 = vpop.f32.mrf.mxu2  ;;  %v1417_v17 = vmax.f32 %v7038_v37, %v7364_v27  ;;  %v5238_v18 = vld [vmem:[%s9011_s5 + $0x1e8] sm:$0xff]  ;;  %v5236_v37 = vld [vmem:[%s9011_s5 + $0x1d8] sm:$0xff] }
 0x266   :  { %2465 = vmatpush.msra.mxu2 %v5238_v18  ;;  %v1651_v57 = vmax.f32 %v1420_v41, %v1605_v6  ;;  %v5259_v6 = vld [vmem:[%s9011_s5 + $0x270] sm:$0xff] }
 0x267   :  { %v2136_v52 = vadd.f32 %v7234_v38, %v2106_v48  ;;  %5169 = vmatmul.msk.bf16.gmra.mxu0 %vm158_vm1, %v6143_v47  ;;  %v1648_v20 = vmax.f32 %v1417_v17, %v7371_v2  ;;  %v7477_v48 = vpop.f32.mrf.mxu3 }
 0x268   :  { %2466 = vmatpush.msra.mxu2 %v5237_v16  ;;  %v1882_v45 = vmax.f32 %v1651_v57, %v7477_v48 }
 0x269   :  { %5201 = vmatmul.msk.f32.vlgmr.msrb.gmra.mxu1 %vm2165_vm2, %v2136_v52  ;;  %v1879_v27 = vmax.f32 %v1648_v20, %v7385_v60  ;;  %v1377_v43 = vpop.f32.mrf.mxu1  ;;  %v1418_v52 = vmax.f32 %v7044_v28, %v7396_v12  ;;  %v5250_v28 = vld [vmem:[%s9011_s5 + $0x238] sm:$0xff] }
 0x26a   :  { %2467 = vmatpush.msra.mxu2 %v5236_v37  ;;  %2503 = vmatpush.msra.mxu3 %v5250_v28 }
 0x26b   :  { %2543 = vmatpush.msrb.mxu1 %v5260_v39 }
 0x26c   :  { %v2052_v62 = vpop.f32.mrf.mxu0  ;;  %2468 = vmatpush.msra.mxu2 %v5235_v23 }
 0x26d   :  { %v2107_v8 = vmax.f32 %v1876_v36, %v2052_v62  ;;  %v1608_v53 = vpop.f32.mrf.mxu2  ;;  %v5234_v36 = vld [vmem:[%s9011_s5 + $0x1c8] sm:$0xff]  ;;  %v1649_v62 = vmax.f32 %v1418_v52, %v7407_v63  ;;  %v5249_v63 = vld [vmem:[%s9011_s5 + $0x230] sm:$0xff]  ;;  %2544 = vmatpush.msrb.mxu1 %v5259_v6 }
 0x26e   :  { %2469 = vmatpush.msra.mxu2 %v5234_v36  ;;  %2504 = vmatpush.msra.mxu3 %v5249_v63  ;;  %v5254_v52 = vld [vmem:[%s9011_s5 + $0x248] sm:$0xff]  ;;  %v5253_v36 = vld [vmem:[%s9011_s5 + $0x240] sm:$0xff] }
 0x26f   :  { %v2137_v25 = vadd.f32 %v7234_v38, %v2107_v8  ;;  %v1839_v12 = vpop.f32.mrf.mxu3  ;;  %v1880_v11 = vmax.f32 %v1649_v62, %v7414_v9  ;;  %v5247_v9 = vld [vmem:[%s9011_s5 + $0x220] sm:$0xff] }
 0x270   :  { %2470 = vmatpush.msra.mxu2 %v5233_v50  ;;  %2505 = vmatpush.msra.mxu3 %v5248_v26  ;;  %v5267_v26 = vld [vmem:[%s9011_s5 + $0x2a0] sm:$0xff] }
 0x271   :  { %5202 = vmatmul.msk.f32.gmra.mxu1 %vm2165_vm2, %v2137_v25  ;;  %v1379_v25 = vpop.f32.mrf.mxu1 }
 0x272   :  { %2506 = vmatpush.msra.mxu3 %v5247_v9 }
 0x274   :  { %v2055_v59 = vpop.f32.mrf.mxu0  ;;  %2507 = vmatpush.msra.mxu3 %v5246_v4 }
 0x275   :  { %v2108_v40 = vmax.f32 %v1877_v15, %v2055_v59 }
 0x276   :  { %2508 = vmatpush.msra.mxu3 %v5245_v32 }
 0x277   :  { %v2138_v10 = vadd.f32 %v7234_v38, %v2108_v40  ;;  %5170 = vmatmul.msk.bf16.gmra.mxu0 %vm158_vm1, %v6144_v29  ;;  %v1610_v29 = vpop.f32.mrf.mxu2  ;;  %v1841_v59 = vpop.f32.mrf.mxu3 }
 0x278   :  { %2509 = vmatpush.msra.mxu3 %v5244_v30 }
 0x279   :  { %5211 = vmatmul.msk.f32.vlgmr.msrb.gmra.mxu2 %vm2165_vm2, %v2138_v10  ;;  %v1382_v55 = vpop.f32.mrf.mxu1 }
 0x27a   :  { %2510 = vmatpush.msra.mxu3 %v5243_v0 }
 0x27c   :  { %v2057_v34 = vpop.f32.mrf.mxu0 }
 0x27d   :  { %v2109_v47 = vmax.f32 %v1878_v42, %v2057_v34  ;;  %v1421_v34 = vmax.f32 %v7066_v19, %v1377_v43  ;;  %v5256_v19 = vld [vmem:[%s9011_s5 + $0x258] sm:$0xff]  ;;  %v5255_v43 = vld [vmem:[%s9011_s5 + $0x250] sm:$0xff] }
 0x27f   :  { %v2139_v61 = vadd.f32 %v7234_v38, %v2109_v47  ;;  %v1613_v21 = vpop.f32.mrf.mxu2  ;;  %v1844_v17 = vpop.f32.mrf.mxu3  ;;  %v5258_v47 = vld [vmem:[%s9011_s5 + $0x268] sm:$0xff]  ;;  %v1652_v18 = vmax.f32 %v1421_v34, %v1608_v53  ;;  %v5277_v34 = vld [vmem:[%s9011_s5 + $0x2e0] sm:$0xff] }
 0x280   :  { %2545 = vmatpush.msrb.mxu1 %v5258_v47 }
 0x281   :  { %5212 = vmatmul.msk.f32.gmra.mxu2 %vm2165_vm2, %v2139_v61  ;;  %v5257_v61 = vld [vmem:[%s9011_s5 + $0x260] sm:$0xff]  ;;  %v1384_v16 = vpop.f32.mrf.mxu1  ;;  %v1883_v48 = vmax.f32 %v1652_v18, %v1839_v12  ;;  %v5269_v12 = vld [vmem:[%s9011_s5 + $0x2b0] sm:$0xff] }
 0x282   :  { %2546 = vmatpush.msrb.mxu1 %v5257_v61  ;;  %v1424_v4 = vmax.f32 %v7086_v44, %v1384_v16  ;;  %v5280_v44 = vld [vmem:[%s9011_s5 + $0x2f8] sm:$0xff] }
 0x284   :  { %v2060_v2 = vpop.f32.mrf.mxu0  ;;  %2547 = vmatpush.msrb.mxu1 %v5256_v19 }
 0x285   :  { %v2110_v13 = vmax.f32 %v1879_v27, %v2060_v2  ;;  %v1422_v2 = vmax.f32 %v7072_v1, %v1379_v25  ;;  %v5270_v1 = vld [vmem:[%s9011_s5 + $0x2b8] sm:$0xff] }
 0x286   :  { %2548 = vmatpush.msrb.mxu1 %v5255_v43  ;;  %2583 = vmatpush.msrb.mxu2 %v5270_v1  ;;  %v5273_v43 = vld [vmem:[%s9011_s5 + $0x2c0] sm:$0xff]  ;;  %v5288_v1 = vld [vmem:[%s9011_s5 + $0x328] sm:$0xff] }
 0x287   :  { %v2140_v60 = vadd.f32 %v7234_v38, %v2110_v13  ;;  %v1615_v37 = vpop.f32.mrf.mxu2  ;;  %v1653_v13 = vmax.f32 %v1422_v2, %v1610_v29  ;;  %v1846_v62 = vpop.f32.mrf.mxu3  ;;  %v5265_v29 = vld [vmem:[%s9011_s5 + $0x290] sm:$0xff] }
 0x288   :  { %2549 = vmatpush.msrb.mxu1 %v5254_v52  ;;  %2584 = vmatpush.msrb.mxu2 %v5269_v12  ;;  %v1655_v32 = vmax.f32 %v1424_v4, %v1615_v37 }
 0x289   :  { %5221 = vmatmul.msk.f32.vlgmr.msrb.gmra.mxu3 %vm2165_vm2, %v2140_v60  ;;  %v1884_v60 = vmax.f32 %v1653_v13, %v1841_v59  ;;  %v1387_v50 = vpop.f32.mrf.mxu1 }
 0x28a   :  { %2550 = vmatpush.msrb.mxu1 %v5253_v36  ;;  %2585 = vmatpush.msrb.mxu2 %v5268_v33  ;;  %v1886_v57 = vmax.f32 %v1655_v32, %v1846_v62  ;;  %v1425_v39 = vmax.f32 %v7097_v56, %v1387_v50  ;;  %v5276_v56 = vld [vmem:[%s9011_s5 + $0x2d8] sm:$0xff]  ;;  %v5285_v33 = vld [vmem:[%s9011_s5 + $0x310] sm:$0xff] }
 0x28b   :  { %2623 = vmatpush.msrb.mxu3 %v5280_v44 }
 0x28c   :  { %v2062_v8 = vpop.f32.mrf.mxu0  ;;  %2586 = vmatpush.msrb.mxu2 %v5267_v26 }
 0x28d   :  { %v2111_v24 = vmax.f32 %v1880_v11, %v2062_v8  ;;  %v1423_v11 = vmax.f32 %v7080_v46, %v1382_v55  ;;  %v5266_v46 = vld [vmem:[%s9011_s5 + $0x298] sm:$0xff]  ;;  %v5279_v55 = vld [vmem:[%s9011_s5 + $0x2f0] sm:$0xff] }
 0x28e   :  { %2587 = vmatpush.msrb.mxu2 %v5266_v46  ;;  %2624 = vmatpush.msrb.mxu3 %v5279_v55  ;;  %v5284_v46 = vld [vmem:[%s9011_s5 + $0x308] sm:$0xff] }
 0x28f   :  { %v2141_v15 = vadd.f32 %v7234_v38, %v2111_v24  ;;  %v1618_v63 = vpop.f32.mrf.mxu2  ;;  %v1654_v24 = vmax.f32 %v1423_v11, %v1613_v21  ;;  %v1849_v51 = vpop.f32.mrf.mxu3 }
 0x290   :  { %2588 = vmatpush.msrb.mxu2 %v5265_v29 }
 0x291   :  { %5222 = vmatmul.msk.f32.gmra.mxu3 %vm2165_vm2, %v2141_v15  ;;  %v1885_v15 = vmax.f32 %v1654_v24, %v1844_v17  ;;  %v1389_v59 = vpop.f32.mrf.mxu1 }
 0x292   :  { %v1426_v61 = vmax.f32 %v7109_v22, %v1389_v59  ;;  %v5290_v22 = vld [vmem:[%s9011_s5 + $0x338] sm:$0xff] }
 0x294   :  { %v2065_v5 = vpop.f32.mrf.mxu0 }
 0x295   :  { %v2112_v40 = vmax.f32 %v1881_v49, %v2065_v5  ;;  %v5264_v5 = vld [vmem:[%s9011_s5 + $0x288] sm:$0xff] }
 0x296   :  { %2589 = vmatpush.msrb.mxu2 %v5264_v5 }
 0x297   :  { %v2142_v10 = vadd.f32 %v7234_v38, %v2112_v40  ;;  %v5263_v40 = vld [vmem:[%s9011_s5 + $0x280] sm:$0xff]  ;;  %v1620_v30 = vpop.f32.mrf.mxu2 }
 0x298   :  { %2590 = vmatpush.msrb.mxu2 %v5263_v40  ;;  %v1657_v37 = vmax.f32 %v1426_v61, %v1620_v30 }
 0x299   :  { %5231 = vmatmul.msk.f32.vlgmr.msra.gmra.mxu1 %vm2165_vm2, %v2142_v10  ;;  %v1851_v10 = vpop.f32.mrf.mxu3 }
 0x29a   :  { %2663 = vmatpush.msra.mxu1 %v5290_v22 }
 0x29c   :  { %v2067_v42 = vpop.f32.mrf.mxu0 }
 0x29d   :  { %v2113_v31 = vmax.f32 %v1882_v45, %v2067_v42  ;;  %v5278_v45 = vld [vmem:[%s9011_s5 + $0x2e8] sm:$0xff]  ;;  %v1656_v42 = vmax.f32 %v1425_v39, %v1618_v63 }
 0x29e   :  { %2625 = vmatpush.msrb.mxu3 %v5278_v45 }
 0x29f   :  { %v2143_v20 = vadd.f32 %v7234_v38, %v2113_v31  ;;  %v1392_v31 = vpop.f32.mrf.mxu1  ;;  %v1623_v17 = vpop.f32.mrf.mxu2  ;;  %v1887_v47 = vmax.f32 %v1656_v42, %v1849_v51 }
 0x2a0   :  { %2626 = vmatpush.msrb.mxu3 %v5277_v34  ;;  %v1427_v36 = vmax.f32 %v7117_v54, %v1392_v31  ;;  %v5286_v54 = vld [vmem:[%s9011_s5 + $0x318] sm:$0xff] }
 0x2a1   :  { %5232 = vmatmul.msk.f32.gmra.mxu1 %vm2165_vm2, %v2143_v20  ;;  %v5275_v20 = vld [vmem:[%s9011_s5 + $0x2d0] sm:$0xff]  ;;  %v1854_v16 = vpop.f32.mrf.mxu3 }
 0x2a2   :  { %2627 = vmatpush.msrb.mxu3 %v5276_v56 }
 0x2a4   :  { %v2070_v27 = vpop.f32.mrf.mxu0  ;;  %2628 = vmatpush.msrb.mxu3 %v5275_v20 }
 0x2a5   :  { %v2114_v23 = vmax.f32 %v1883_v48, %v2070_v27  ;;  %v5274_v48 = vld [vmem:[%s9011_s5 + $0x2c8] sm:$0xff] }
 0x2a6   :  { %2629 = vmatpush.msrb.mxu3 %v5274_v48 }
 0x2a7   :  { %v2144_v53 = vadd.f32 %v7234_v38, %v2114_v23  ;;  %v1394_v2 = vpop.f32.mrf.mxu1  ;;  %v1888_v23 = vmax.f32 %v1657_v37, %v1851_v10  ;;  %v1625_v52 = vpop.f32.mrf.mxu2 }
 0x2a8   :  { %2630 = vmatpush.msrb.mxu3 %v5273_v43  ;;  %v1428_v24 = vmax.f32 %v7128_v3, %v1394_v2  ;;  %v6268_v2 = vld [vmem:[%s9013_s8 + $0x1cc] sm:$0xf] }
 0x2a9   :  { %5241 = vmatmul.msk.f32.vlgmr.msra.gmra.mxu2 %vm2165_vm2, %v2144_v53  ;;  %v5289_v53 = vld [vmem:[%s9011_s5 + $0x330] sm:$0xff]  ;;  %v1856_v12 = vpop.f32.mrf.mxu3 }
 0x2aa   :  { %2664 = vmatpush.msra.mxu1 %v5289_v53  ;;  %v1659_v51 = vmax.f32 %v1428_v24, %v1625_v52  ;;  %v6260_v52 = vld [vmem:[%s9013_s8 + $0x18c] sm:$0xf]  ;;  %v5519_v53 = vld [vmem:[%s9014_s7 + $0x1c0] sm:$0xf]  ;;  %v5489_v24 = vld [vmem:[%s9014_s7 + $0x1a0] sm:$0xf0] }
 0x2ac   :  { %v2072_v28 = vpop.f32.mrf.mxu0  ;;  %2665 = vmatpush.msra.mxu1 %v5288_v1  ;;  %v1890_v3 = vmax.f32 %v1659_v51, %v1856_v12 }
 0x2ad   :  { %v2115_v8 = vmax.f32 %v1884_v60, %v2072_v28  ;;  %v1658_v60 = vmax.f32 %v1427_v36, %v1623_v17  ;;  %v5287_v28 = vld [vmem:[%s9011_s5 + $0x320] sm:$0xff] }
 0x2ae   :  { %2666 = vmatpush.msra.mxu1 %v5287_v28  ;;  %v6205_v36 = vld [vmem:[%s9014_s7 + $0x1dc] sm:$0xf0]  ;;  %v6206_v28 = vld [vmem:[%s9014_s7 + $0x1e4] sm:$0xf0] }
 0x2af   :  { %v2145_v25 = vadd.f32 %v7234_v38, %v2115_v8  ;;  %v1889_v11 = vmax.f32 %v1658_v60, %v1854_v16  ;;  %v1397_v8 = vpop.f32.mrf.mxu1  ;;  %v1628_v26 = vpop.f32.mrf.mxu2  ;;  %v5520_v1 = vor.u32 %v6205_v36, %v5519_v53  ;;  %v5521_v60 = vld [vmem:[%s9014_s7 + $0x1e0] sm:$0xf0] }
 0x2b0   :  { %2667 = vmatpush.msra.mxu1 %v5286_v54  ;;  %v5329_v36 = vld [vmem:[%s9014_s7 + $0x60] sm:$0xf0] }
 0x2b1   :  { %5242 = vmatmul.msk.f32.gmra.mxu2 %vm2165_vm2, %v2145_v25  ;;  %v1859_v29 = vpop.f32.mrf.mxu3 }
 0x2b2   :  { %2668 = vmatpush.msra.mxu1 %v5285_v33  ;;  %3066 = vmatpush.bf16.msra.mxu2 %v5520_v1  ;;  %v6158_v1 = vld [vmem:[%s9014_s7 + $0x64] sm:$0xf0] }
 0x2b4   :  { %v2075_v9 = vpop.f32.mrf.mxu0  ;;  %2669 = vmatpush.msra.mxu1 %v5284_v46 }
 0x2b5   :  { %v2116_v49 = vmax.f32 %v1885_v15, %v2075_v9  ;;  %v5283_v9 = vld [vmem:[%s9011_s5 + $0x300] sm:$0xff] }
 0x2b6   :  { %2670 = vmatpush.msra.mxu1 %v5283_v9  ;;  %v5455_v9 = vld [vmem:[%s9014_s7 + $0x140] sm:$0xf] }
 0x2b7   :  { %v2146_v41 = vadd.f32 %v7234_v38, %v2116_v49  ;;  %v1429_v49 = vmax.f32 %v7158_v7, %v1397_v8  ;;  %v1399_v5 = vpop.f32.mrf.mxu1  ;;  %v1630_v40 = vpop.f32.mrf.mxu2  ;;  %v6197_v8 = vld [vmem:[%s9014_s7 + $0x19c] sm:$0xf0] }
 0x2b8   :  { %v1430_v10 = vmax.f32 %v7176_v58, %v1399_v5  ;;  %v6190_v5 = vld [vmem:[%s9014_s7 + $0x164] sm:$0xf0] }
 0x2b9   :  { %5251 = vmatmul.msk.f32.vlgmr.msra.gmra.mxu3 %vm2165_vm2, %v2146_v41  ;;  %v1660_v32 = vmax.f32 %v1429_v49, %v1628_v26  ;;  %v1861_v44 = vpop.f32.mrf.mxu3  ;;  %v6198_v26 = vld [vmem:[%s9014_s7 + $0x1a4] sm:$0xf0]  ;;  %v5457_v49 = vld [vmem:[%s9014_s7 + $0x160] sm:$0xf0] }
 0x2ba   :  { %v1661_v55 = vmax.f32 %v1430_v10, %v1630_v40  ;;  %v6252_v40 = vld [vmem:[%s9013_s8 + $0x14c] sm:$0xf]  ;;  %v6181_v10 = vld [vmem:[%s9014_s7 + $0x11c] sm:$0xf0] }
 0x2bb   :  { %v1891_v30 = vmax.f32 %v1660_v32, %v1859_v29  ;;  %v6189_v29 = vld [vmem:[%s9014_s7 + $0x15c] sm:$0xf0] }
 0x2bc   :  { %v2077_v0 = vpop.f32.mrf.mxu0  ;;  %v1892_v45 = vmax.f32 %v1661_v55, %v1861_v44  ;;  %v5423_v44 = vld [vmem:[%s9014_s7 + $0x100] sm:$0xf]  ;;  %v5425_v55 = vld [vmem:[%s9014_s7 + $0x120] sm:$0xf0] }
 0x2bd   :  { %v2117_v21 = vmax.f32 %v1886_v57, %v2077_v0 }
 0x2bf   :  { %v2147_v6 = vadd.f32 %v7234_v38, %v2117_v21  ;;  %v1402_v21 = vpop.f32.mrf.mxu1  ;;  %v1633_v7 = vpop.f32.mrf.mxu2 }
 0x2c1   :  { %5252 = vmatmul.msk.f32.gmra.mxu3 %vm2165_vm2, %v2147_v6  ;;  %v1431_v6 = vmax.f32 %v7200_v14, %v1402_v21  ;;  %v1864_v31 = vpop.f32.mrf.mxu3 }
 0x2c3   :  { %v1662_v56 = vmax.f32 %v1431_v6, %v1633_v7  ;;  %v5431_v7 = vld [vmem:[%s9014_s7 + $0x108] sm:$0xf] }
 0x2c4   :  { %v2080_v18 = vpop.f32.mrf.mxu0 }
 0x2c5   :  { %v2118_v19 = vmax.f32 %v1887_v47, %v2080_v18  ;;  %v1893_v47 = vmax.f32 %v1662_v56, %v1864_v31  ;;  %v6169_v31 = vld [vmem:[%s9014_s7 + $0xc4] sm:$0xf] }
 0x2c6   :  { %v5393_v56 = vld [vmem:[%s9014_s7 + $0xe0] sm:$0xf0] }
 0x2c7   :  { %v2148_v27 = vadd.f32 %v7234_v38, %v2118_v19  ;;  %v1404_v58 = vpop.f32.mrf.mxu1  ;;  %v1635_v18 = vpop.f32.mrf.mxu2 }
 0x2c8   :  { %v1432_v61 = vmax.f32 %v7218_v35, %v1404_v58  ;;  %v5793_v35 = vld [vmem:[%s9013_s8 + $0x1e8] sm:$0xf0]  ;;  %v6174_v58 = vld [vmem:[%s9014_s7 + $0xe4] sm:$0xf0] }
 0x2c9   :  { %5261 = vmatmul.msk.f32.vlgmr.msrb.gmra.mxu1 %vm2165_vm2, %v2148_v27  ;;  %v1866_v37 = vpop.f32.mrf.mxu3 }
 0x2ca   :  { %v1663_v16 = vmax.f32 %v1432_v61, %v1635_v18  ;;  %v5396_v18 = vor.u32 %v6169_v31, %v5393_v56  ;;  %v5471_v31 = vld [vmem:[%s9014_s7 + $0x150] sm:$0xf] }
 0x2cc   :  { %v2082_v13 = vpop.f32.mrf.mxu0  ;;  %v1894_v14 = vmax.f32 %v1663_v16, %v1866_v37  ;;  %v6165_v37 = vld [vmem:[%s9014_s7 + $0x9c] sm:$0xf0] }
 0x2cd   :  { %v2119_v62 = vmax.f32 %v1888_v23, %v2082_v13  ;;  %v5796_v23 = vor.u32 %v6268_v2, %v5793_v35  ;;  %v6166_v2 = vld [vmem:[%s9014_s7 + $0xa4] sm:$0xf0] }
 0x2cf   :  { %v2149_v50 = vadd.f32 %v7234_v38, %v2119_v62  ;;  %3935 = vmatpush.bf16.msrb.mxu0 %v5796_v23  ;;  %v6201_v62 = vld [vmem:[%s9014_s7 + $0x1c4] sm:$0xf] }
 0x2d0   :  { %v5524_v12 = vor.u32 %v6201_v62, %v5521_v60  ;;  %v5335_v62 = vld [vmem:[%s9014_s7 + $0x48] sm:$0xf] }
 0x2d1   :  { %5262 = vmatmul.msk.f32.gmra.mxu1 %vm2165_vm2, %v2149_v50  ;;  %v5527_v50 = vld [vmem:[%s9014_s7 + $0x1c8] sm:$0xf] }
 0x2d2   :  { %v5528_v54 = vor.u32 %v6206_v28, %v5527_v50  ;;  %3080 = vmatpush.bf16.msra.mxu3 %v5524_v12  ;;  %v5336_v50 = vor.u32 %v6158_v1, %v5335_v62  ;;  %v6170_v62 = vld [vmem:[%s9014_s7 + $0xcc] sm:$0xf] }
 0x2d3   :  { %v5401_v1 = vld [vmem:[%s9014_s7 + $0xe8] sm:$0xf0] }
 0x2d4   :  { %v2085_v63 = vpop.f32.mrf.mxu0  ;;  %3094 = vmatpush.bf16.msrb.mxu1 %v5528_v54  ;;  %v5295_v54 = vld [vmem:[%s9014_s7] sm:$0xf] }
 0x2d5   :  { %v2120_v25 = vmax.f32 %v1889_v11, %v2085_v63  ;;  %v5487_v11 = vld [vmem:[%s9014_s7 + $0x180] sm:$0xf]  ;;  %v6193_v63 = vld [vmem:[%s9014_s7 + $0x184] sm:$0xf] }
 0x2d6   :  { %v5488_v33 = vor.u32 %v6197_v8, %v5487_v11  ;;  %v5492_v46 = vor.u32 %v6193_v63, %v5489_v24  ;;  %v6149_v11 = vld [vmem:[%s9014_s7 + $0x1c] sm:$0xf0]  ;;  %v6145_v8 = vld [vmem:[%s9014_s7 + $0x4] sm:$0xf] }
 0x2d7   :  { %v2150_v15 = vadd.f32 %v7234_v38, %v2120_v25  ;;  %v5495_v25 = vld [vmem:[%s9014_s7 + $0x188] sm:$0xf]  ;;  %v5297_v24 = vld [vmem:[%s9014_s7 + $0x20] sm:$0xf0] }
 0x2d8   :  { %v5496_v51 = vor.u32 %v6198_v26, %v5495_v25  ;;  %3067 = vmatpush.bf16.msra.mxu2 %v5488_v33  ;;  %3081 = vmatpush.bf16.msra.mxu3 %v5492_v46  ;;  %v5296_v33 = vor.u32 %v6149_v11, %v5295_v54  ;;  %v5303_v25 = vld [vmem:[%s9014_s7 + $0x8] sm:$0xf]  ;;  %v5300_v46 = vor.u32 %v6145_v8, %v5297_v24  ;;  %v6175_v54 = vld [vmem:[%s9014_s7 + $0xec] sm:$0xf0]  ;;  %v6171_v11 = vld [vmem:[%s9014_s7 + $0xd4] sm:$0xf] }
 0x2d9   :  { %5271 = vmatmul.msk.f32.vlgmr.msrb.gmra.mxu2 %vm2165_vm2, %v2150_v15  ;;  %v7716_v15 = vpop.f32.mrf.mxu1  ;;  %v6150_v26 = vld [vmem:[%s9014_s7 + $0x24] sm:$0xf0]  ;;  %v5409_v8 = vld [vmem:[%s9014_s7 + $0xf0] sm:$0xf0] }
 0x2da   :  { %3095 = vmatpush.bf16.msrb.mxu1 %v5496_v51  ;;  %v5304_v51 = vor.u32 %v6150_v26, %v5303_v25  ;;  %v5412_v25 = vor.u32 %v6171_v11, %v5409_v8  ;;  %v6162_v26 = vld [vmem:[%s9014_s7 + $0x8c] sm:$0xf] }
 0x2db   :  { %v5569_v11 = vld [vmem:[%s9013_s8 + $0x28] sm:$0xf0] }
 0x2dc   :  { %v2087_v4 = vpop.f32.mrf.mxu0  ;;  %v7782_v16 = vpop.f32.mrf.mxu3 }
 0x2dd   :  { %v2121_v59 = vmax.f32 %v1890_v3, %v2087_v4  ;;  %v6185_v3 = vld [vmem:[%s9014_s7 + $0x144] sm:$0xf]  ;;  %v5456_v4 = vor.u32 %v6189_v29, %v5455_v9  ;;  %v6202_v9 = vld [vmem:[%s9014_s7 + $0x1cc] sm:$0xf] }
 0x2de   :  { %v5460_v32 = vor.u32 %v6185_v3, %v5457_v49  ;;  %v5529_v29 = vld [vmem:[%s9014_s7 + $0x1e8] sm:$0xf0]  ;;  %v5535_v3 = vld [vmem:[%s9014_s7 + $0x1d0] sm:$0xf] }
 0x2df   :  { %v2151_v41 = vadd.f32 %v7234_v38, %v2121_v59  ;;  %v5463_v59 = vld [vmem:[%s9014_s7 + $0x148] sm:$0xf]  ;;  %3068 = vmatpush.bf16.msra.mxu2 %v5456_v4  ;;  %v5532_v4 = vor.u32 %v6202_v9, %v5529_v29  ;;  %v6207_v49 = vld [vmem:[%s9014_s7 + $0x1ec] sm:$0xf0] }
 0x2e0   :  { %3082 = vmatpush.bf16.msra.mxu3 %v5460_v32  ;;  %v5536_v32 = vor.u32 %v6207_v49, %v5535_v3  ;;  %v6167_v29 = vld [vmem:[%s9014_s7 + $0xac] sm:$0xf0]  ;;  %v6163_v3 = vld [vmem:[%s9014_s7 + $0x94] sm:$0xf] }
 0x2e1   :  { %5272 = vmatmul.msk.f32.gmra.mxu2 %vm2165_vm2, %v2151_v41  ;;  %v5464_v41 = vor.u32 %v6190_v5, %v5463_v59  ;;  %v7778_v61 = vpop.f32.mrf.mxu1  ;;  %v6203_v59 = vld [vmem:[%s9014_s7 + $0x1d4] sm:$0xf] }
 0x2e2   :  { %v5537_v5 = vld [vmem:[%s9014_s7 + $0x1f0] sm:$0xf0] }
 0x2e3   :  { %3096 = vmatpush.bf16.msrb.mxu1 %v5464_v41  ;;  %v5540_v41 = vor.u32 %v6203_v59, %v5537_v5  ;;  %v6236_v5 = vld [vmem:[%s9013_s8 + $0xcc] sm:$0xf] }
 0x2e4   :  { %v2090_v57 = vpop.f32.mrf.mxu0  ;;  %v7833_v63 = vpop.f32.mrf.mxu3 }
 0x2e5   :  { %v2122_v0 = vmax.f32 %v1891_v30, %v2090_v57  ;;  %v5729_v30 = vld [vmem:[%s9013_s8 + $0x168] sm:$0xf0] }
 0x2e6   :  { %v5732_v57 = vor.u32 %v6252_v40, %v5729_v30  ;;  %v6194_v40 = vld [vmem:[%s9014_s7 + $0x18c] sm:$0xf] }
 0x2e7   :  { %v2152_v39 = vadd.f32 %v7234_v38, %v2122_v0  ;;  %v6177_v0 = vld [vmem:[%s9014_s7 + $0x104] sm:$0xf]  ;;  %v5497_v30 = vld [vmem:[%s9014_s7 + $0x1a8] sm:$0xf0] }
 0x2e8   :  { %v5428_v21 = vor.u32 %v6177_v0, %v5425_v55  ;;  %v6195_v0 = vld [vmem:[%s9014_s7 + $0x194] sm:$0xf] }
 0x2e9   :  { %5281 = vmatmul.msk.f32.vlgmr.msrb.gmra.mxu3 %vm2165_vm2, %v2152_v39  ;;  %v5424_v39 = vor.u32 %v6181_v10, %v5423_v44  ;;  %v7820_v28 = vpop.f32.mrf.mxu1  ;;  %v5503_v44 = vld [vmem:[%s9014_s7 + $0x190] sm:$0xf]  ;;  %v5505_v55 = vld [vmem:[%s9014_s7 + $0x1b0] sm:$0xf0] }
 0x2ea   :  { %3083 = vmatpush.bf16.msra.mxu3 %v5428_v21  ;;  %v6199_v10 = vld [vmem:[%s9014_s7 + $0x1ac] sm:$0xf0]  ;;  %v5508_v21 = vor.u32 %v6195_v0, %v5505_v55 }
 0x2eb   :  { %3069 = vmatpush.bf16.msra.mxu2 %v5424_v39  ;;  %v5504_v39 = vor.u32 %v6199_v10, %v5503_v44  ;;  %v6154_v44 = vld [vmem:[%s9014_s7 + $0x4c] sm:$0xf]  ;;  %v5343_v10 = vld [vmem:[%s9014_s7 + $0x50] sm:$0xf] }
 0x2ec   :  { %v2092_v42 = vpop.f32.mrf.mxu0  ;;  %v6159_v55 = vld [vmem:[%s9014_s7 + $0x6c] sm:$0xf0] }
 0x2ed   :  { %v2123_v34 = vmax.f32 %v1892_v45, %v2092_v42  ;;  %v6182_v45 = vld [vmem:[%s9014_s7 + $0x124] sm:$0xf0]  ;;  %v5391_v42 = vld [vmem:[%s9014_s7 + $0xc0] sm:$0xf] }
 0x2ee   :  { %v5432_v6 = vor.u32 %v6182_v45, %v5431_v7  ;;  %3084 = vmatpush.bf16.msra.mxu3 %v5396_v18 }
 0x2ef   :  { %v2153_v17 = vadd.f32 %v7234_v38, %v2123_v34  ;;  %v6173_v34 = vld [vmem:[%s9014_s7 + $0xdc] sm:$0xf0] }
 0x2f0   :  { %3097 = vmatpush.bf16.msrb.mxu1 %v5432_v6  ;;  %v6186_v6 = vld [vmem:[%s9014_s7 + $0x14c] sm:$0xf] }
 0x2f1   :  { %5282 = vmatmul.msk.f32.gmra.mxu3 %vm2165_vm2, %v2153_v17  ;;  %v5399_v17 = vld [vmem:[%s9014_s7 + $0xc8] sm:$0xf]  ;;  %v7880_v7 = vpop.f32.mrf.mxu1 }
 0x2f4   :  { %v2095_v20 = vpop.f32.mrf.mxu0 }
 0x2f5   :  { %v2124_v19 = vmax.f32 %v1893_v47, %v2095_v20  ;;  %v5392_v47 = vor.u32 %v6173_v34, %v5391_v42  ;;  %v5400_v20 = vor.u32 %v6174_v58, %v5399_v17  ;;  %v5465_v34 = vld [vmem:[%s9014_s7 + $0x168] sm:$0xf0]  ;;  %v6191_v17 = vld [vmem:[%s9014_s7 + $0x16c] sm:$0xf0]  ;;  %v6187_v58 = vld [vmem:[%s9014_s7 + $0x154] sm:$0xf] }
 0x2f6   :  { %v5468_v56 = vor.u32 %v6186_v6, %v5465_v34  ;;  %v5472_v18 = vor.u32 %v6191_v17, %v5471_v31  ;;  %v5344_v34 = vor.u32 %v6159_v55, %v5343_v10  ;;  %v5633_v17 = vld [vmem:[%s9013_s8 + $0xa8] sm:$0xf0]  ;;  %v5865_v55 = vld [vmem:[%s9013_s8 + $0x270] sm:$0xf0] }
 0x2f7   :  { %v2154_v48 = vadd.f32 %v7234_v38, %v2124_v19  ;;  %v7780_v19 = vpop.f32.mrf.mxu2  ;;  %3070 = vmatpush.bf16.msra.mxu2 %v5392_v47  ;;  %3098 = vmatpush.bf16.msrb.mxu1 %v5400_v20  ;;  %v5473_v47 = vld [vmem:[%s9014_s7 + $0x170] sm:$0xf0] }
 0x2f8   :  { %v5476_v20 = vor.u32 %v6187_v58, %v5473_v47  ;;  %v6146_v47 = vld [vmem:[%s9014_s7 + $0xc] sm:$0xf] }
 0x2f9   :  { %5291 = vmatmul.msk.f32.vlgmr.msra.gmra.mxu1 %vm2165_vm2, %v2154_v48  ;;  %v5359_v48 = vld [vmem:[%s9014_s7 + $0x80] sm:$0xf] }
 0x2fc   :  { %v2097_v27 = vpop.f32.mrf.mxu0 }
 0x2fd   :  { %v2125_v43 = vmax.f32 %v1894_v14, %v2097_v27  ;;  %v6161_v14 = vld [vmem:[%s9014_s7 + $0x84] sm:$0xf]  ;;  %v5360_v27 = vor.u32 %v6165_v37, %v5359_v48  ;;  %v6244_v48 = vld [vmem:[%s9013_s8 + $0x10c] sm:$0xf] }
 0x2fe   :  { %v5697_v37 = vld [vmem:[%s9013_s8 + $0x128] sm:$0xf0] }
 0x2ff   :  { %v2155_v22 = vadd.f32 %v7234_v38, %v2125_v43  ;;  %v5761_v38 = vld [vmem:[%s9013_s8 + $0x1a8] sm:$0xf0]  ;;  %v5361_v43 = vld [vmem:[%s9014_s7 + $0xa0] sm:$0xf0]  ;;  %3071 = vmatpush.bf16.msra.mxu2 %v5360_v27  ;;  %v7822_v12 = vpop.f32.mrf.mxu2  ;;  %v5700_v27 = vor.u32 %v6244_v48, %v5697_v37  ;;  %v6151_v37 = vld [vmem:[%s9014_s7 + $0x2c] sm:$0xf0] }
 0x300   :  { %v5764_v13 = vor.u32 %v6260_v52, %v5761_v38  ;;  %v5364_v35 = vor.u32 %v6161_v14, %v5361_v43  ;;  %v5327_v52 = vld [vmem:[%s9014_s7 + $0x40] sm:$0xf]  ;;  %v6178_v14 = vld [vmem:[%s9014_s7 + $0x10c] sm:$0xf] }
 0x301   :  { %5292 = vmatmul.msk.f32.gmra.mxu1 %vm2165_vm2, %v2155_v22  ;;  %v5367_v22 = vld [vmem:[%s9014_s7 + $0x88] sm:$0xf]  ;;  %v6157_v38 = vld [vmem:[%s9014_s7 + $0x5c] sm:$0xf0]  ;;  %v5433_v43 = vld [vmem:[%s9014_s7 + $0x128] sm:$0xf0] }
 0x302   :  { %3936 = vmatpush.bf16.msrb.mxu0 %v5764_v13  ;;  %v5368_v23 = vor.u32 %v6166_v2, %v5367_v22  ;;  %v6153_v13 = vld [vmem:[%s9014_s7 + $0x44] sm:$0xf]  ;;  %v5328_v53 = vor.u32 %v6157_v38, %v5327_v52  ;;  %3085 = vmatpush.bf16.msra.mxu3 %v5364_v35  ;;  %v5439_v22 = vld [vmem:[%s9014_s7 + $0x110] sm:$0xf]  ;;  %v5436_v35 = vor.u32 %v6178_v14, %v5433_v43  ;;  %v5441_v52 = vld [vmem:[%s9014_s7 + $0x130] sm:$0xf0] }
 0x303   :  { %v5332_v60 = vor.u32 %v6153_v13, %v5329_v36  ;;  %v6183_v2 = vld [vmem:[%s9014_s7 + $0x12c] sm:$0xf0]  ;;  %v6147_v14 = vld [vmem:[%s9014_s7 + $0x14] sm:$0xf] }
 0x304   :  { %3099 = vmatpush.bf16.msrb.mxu1 %v5368_v23  ;;  %3072 = vmatpush.bf16.msra.mxu2 %v5328_v53  ;;  %v6179_v23 = vld [vmem:[%s9014_s7 + $0x114] sm:$0xf]  ;;  %v5440_v38 = vor.u32 %v6183_v2, %v5439_v22  ;;  %v6327_v2 = vld [vmem:[%s9012_s6] ss:$0 sm:$0xff] }
 0x305   :  { %v5444_v13 = vor.u32 %v6179_v23, %v5441_v52  ;;  %v6220_v23 = vld [vmem:[%s9013_s8 + $0x4c] sm:$0xf] }
 0x306   :  { %3937 = vmatpush.bf16.msrb.mxu0 %v5732_v57  ;;  %3086 = vmatpush.bf16.msra.mxu3 %v5332_v60  ;;  %v5500_v57 = vor.u32 %v6194_v40, %v5497_v30  ;;  %v5407_v60 = vld [vmem:[%s9014_s7 + $0xd0] sm:$0xf]  ;;  %v5601_v52 = vld [vmem:[%s9013_s8 + $0x68] sm:$0xf0] }
 0x307   :  { %v7882_v45 = vpop.f32.mrf.mxu2  ;;  %v5408_v24 = vor.u32 %v6175_v54, %v5407_v60  ;;  %v2198_v60 = vadd.f32 %v6327_v2, %v7716_v15  ;;  %v6212_v54 = vld [vmem:[%s9013_s8 + $0xc] sm:$0xf] }
 0x308   :  { %3100 = vmatpush.bf16.msrb.mxu1 %v5336_v50  ;;  %3073 = vmatpush.bf16.msra.mxu2 %v5296_v33  ;;  %v5404_v50 = vor.u32 %v6170_v62, %v5401_v1 }
 0x30a   :  { %3087 = vmatpush.bf16.msra.mxu3 %v5300_v46  ;;  %3938 = vmatpush.bf16.msrb.mxu0 %v5700_v27  ;;  %v5369_v46 = vld [vmem:[%s9014_s7 + $0xa8] sm:$0xf0]  ;;  %v5313_v27 = vld [vmem:[%s9014_s7 + $0x30] sm:$0xf0] }
 0x30b   :  { %v5372_v9 = vor.u32 %v6162_v26, %v5369_v46  ;;  %v5316_v22 = vor.u32 %v6147_v14, %v5313_v27  ;;  %v2238_v26 = vadd.f32 %v7780_v19, %v2198_v60  ;;  %v6301_v19 = vld [vmem:[%s9013_s8 + $0x2d4] sm:$0xf]  ;;  %v5543_v14 = vld [vmem:[%s9014_s7 + $0x1d8] sm:$0xf] }
 0x30c   :  { %3101 = vmatpush.bf16.msrb.mxu1 %v5304_v51  ;;  %3108 = vmatpush.bf16.msrb.mxu2 %v5532_v4  ;;  %v7884_v42 = vpop.f32.mrf.mxu3  ;;  %v5375_v51 = vld [vmem:[%s9014_s7 + $0x90] sm:$0xf]  ;;  %v5377_v4 = vld [vmem:[%s9014_s7 + $0xb0] sm:$0xf0]  ;;  %v6208_v27 = vld [vmem:[%s9014_s7 + $0x1f4] sm:$0xf0] }
 0x30d   :  { %v5376_v49 = vor.u32 %v6167_v29, %v5375_v51  ;;  %v5380_v59 = vor.u32 %v6163_v3, %v5377_v4  ;;  %v6210_v29 = vld [vmem:[%s9015_s1 + $0x4] sm:$0xf0] }
 0x30e   :  { %3122 = vmatpush.bf16.msrb.mxu3 %v5536_v32  ;;  %v5665_v32 = vld [vmem:[%s9013_s8 + $0xe8] sm:$0xf0] }
 0x30f   :  { %v7930_v36 = vpop.f32.mrf.mxu2 }
 0x310   :  { %3136 = vmatpush.bf16.msra.mxu1 %v5540_v41  ;;  %3109 = vmatpush.bf16.msrb.mxu2 %v5500_v57  ;;  %v5668_v41 = vor.u32 %v6236_v5, %v5665_v32  ;;  %v5337_v57 = vld [vmem:[%s9014_s7 + $0x68] sm:$0xf0] }
 0x311   :  { %v5340_v0 = vor.u32 %v6154_v44, %v5337_v57 }
 0x312   :  { %3123 = vmatpush.bf16.msrb.mxu3 %v5504_v39  ;;  %3939 = vmatpush.bf16.msrb.mxu0 %v5668_v41  ;;  %v6155_v39 = vld [vmem:[%s9014_s7 + $0x54] sm:$0xf] }
 0x314   :  { %3137 = vmatpush.bf16.msra.mxu1 %v5508_v21  ;;  %3110 = vmatpush.bf16.msrb.mxu2 %v5468_v56  ;;  %v7950_v33 = vpop.f32.mrf.mxu3  ;;  %v5345_v21 = vld [vmem:[%s9014_s7 + $0x70] sm:$0xf0]  ;;  %v6228_v56 = vld [vmem:[%s9013_s8 + $0x8c] sm:$0xf] }
 0x315   :  { %v5348_v31 = vor.u32 %v6155_v39, %v5345_v21  ;;  %v5636_v58 = vor.u32 %v6228_v56, %v5633_v17  ;;  %v6277_v56 = vld [vmem:[%s9013_s8 + $0x214] sm:$0xf] }
 0x316   :  { %3124 = vmatpush.bf16.msrb.mxu3 %v5472_v18  ;;  %v7928_v53 = vpop.f32.mrf.mxu1  ;;  %v5305_v18 = vld [vmem:[%s9014_s7 + $0x28] sm:$0xf0] }
 0x317   :  { %v5308_v48 = vor.u32 %v6146_v47, %v5305_v18  ;;  %3940 = vmatpush.bf16.msrb.mxu0 %v5636_v58 }
 0x318   :  { %3138 = vmatpush.bf16.msra.mxu1 %v5476_v20  ;;  %3111 = vmatpush.bf16.msrb.mxu2 %v5436_v35  ;;  %v5311_v20 = vld [vmem:[%s9014_s7 + $0x10] sm:$0xf] }
 0x319   :  { %v5312_v43 = vor.u32 %v6151_v37, %v5311_v20 }
 0x31a   :  { %3125 = vmatpush.bf16.msrb.mxu3 %v5440_v38  ;;  %v5604_v38 = vor.u32 %v6220_v23, %v5601_v52 }
 0x31c   :  { %3139 = vmatpush.bf16.msra.mxu1 %v5444_v13  ;;  %3112 = vmatpush.bf16.msrb.mxu2 %v5404_v50  ;;  %v8038_v13 = vld [vmem:[%s9013_s8 + $0x310] sm:$0xff]  ;;  %v2199_v50 = vadd.f32 %v6327_v2, %v7778_v61  ;;  %v2278_v61 = vadd.f32 %v7782_v16, %v2238_v26  ;;  %v6209_v2 = vld [vmem:[%s9015_s1 + $0x4] sm:$0xf]  ;;  %v5544_v26 = vor.u32 %v6208_v27, %v5543_v14  ;;  %v5417_v14 = vld [vmem:[%s9014_s7 + $0xf8] sm:$0xf0] }
 0x31d   :  { %v3619_v1 = vunpack.c.h.b16 %v8038_v13  ;;  %3941 = vmatpush.bf16.msrb.mxu0 %v5604_v38  ;;  %v5655_v27 = vld [vmem:[%s9013_s8 + $0xc0] sm:$0xf] }
 0x31e   :  { %3126 = vmatpush.bf16.msrb.mxu3 %v5408_v24  ;;  %v7976_v40 = vpop.f32.mrf.mxu1  ;;  %v5572_v24 = vor.u32 %v6212_v54, %v5569_v11  ;;  %v2239_v46 = vadd.f32 %v7822_v12, %v2199_v50  ;;  %v2318_v12 = vadd.f32 %v7820_v28, %v2278_v61  ;;  %v6293_v28 = vld [vmem:[%s9013_s8 + $0x294] sm:$0xf]  ;;  %v5545_v50 = vld [vmem:[%s9014_s7 + $0x1f8] sm:$0xf0]  ;;  %v5783_v54 = vld [vmem:[%s9013_s8 + $0x1c0] sm:$0xf] }
 0x31f   :  { %v6271_v11 = vld [vmem:[%s9013_s8 + $0x1dc] sm:$0xf0] }
 0x320   :  { %3140 = vmatpush.bf16.msra.mxu1 %v5412_v25  ;;  %3113 = vmatpush.bf16.msrb.mxu2 %v5372_v9  ;;  %v3723_v25 = vpack.c.b16 %v3619_v1, %v3619_v1  ;;  %v2279_v51 = vadd.f32 %v7833_v63, %v2239_v46  ;;  %v5551_v9 = vld [vmem:[%s9015_s1] sm:$0xf]  ;;  %v5929_v63 = vld [vmem:[%s9013_s8 + $0x2f0] sm:$0xf0]  ;;  %v2358_v5 = vadd.f32 %v7882_v45, %v2318_v12  ;;  %v6306_v1 = vld [vmem:[%s9013_s8 + $0x2f4] sm:$0xf0] }
 0x321   :  { %3942 = vmatpush.bf16.msrb.mxu0 %v5572_v24  ;;  %v8065_v3 = vor.u32 %v6210_v29, %v5551_v9  ;;  %v5511_v46 = vld [vmem:[%s9014_s7 + $0x198] sm:$0xf]  ;;  %v5784_v9 = vor.u32 %v6271_v11, %v5783_v54  ;;  %v6196_v29 = vld [vmem:[%s9014_s7 + $0x19c] sm:$0xf]  ;;  %v5751_v12 = vld [vmem:[%s9013_s8 + $0x180] sm:$0xf] }
 0x322   :  { %3127 = vmatpush.bf16.msrb.mxu3 %v5376_v49  ;;  %v3843_v15 = vsel %vm3826_vm3, %v3723_v25, 0  ;;  %v2319_v16 = vadd.f32 %v7880_v7, %v2279_v51  ;;  %v5897_v7 = vld [vmem:[%s9013_s8 + $0x2b0] sm:$0xf0]  ;;  %v2398_v44 = vadd.f32 %v7884_v42, %v2358_v5  ;;  %v5479_v5 = vld [vmem:[%s9014_s7 + $0x158] sm:$0xf]  ;;  %v3309_v54 = vld [vmem:[%s9013_s8 + $0x300] sm:$0xff] }
 0x323   :  { %v5900_v10 = vor.u32 %v6293_v28, %v5897_v7  ;;  %v6188_v7 = vld [vmem:[%s9014_s7 + $0x15c] sm:$0xf] }
 0x324   :  { %3141 = vmatpush.bf16.msra.mxu1 %v5380_v59  ;;  %3114 = vmatpush.bf16.msrb.mxu2 %v5340_v0  ;;  %v5932_v59 = vor.u32 %v6301_v19, %v5929_v63  ;;  %v2359_v32 = vadd.f32 %v7930_v36, %v2319_v16  ;;  %v2438_v45 = vadd.f32 %v7928_v53, %v2398_v44  ;;  %v6285_v0 = vld [vmem:[%s9013_s8 + $0x254] sm:$0xf]  ;;  %v8094_v53 = vld [vmem:[%s9013_s8 + $0x318] sm:$0xff]  ;;  %v6263_v16 = vld [vmem:[%s9013_s8 + $0x19c] sm:$0xf0] }
 0x325   :  { %4008 = vmatpush.bf16.msra.mxu0 %v3843_v15  ;;  %v5868_v42 = vor.u32 %v6285_v0, %v5865_v55  ;;  %v3620_v17 = vunpack.c.l.b16 %v8094_v53  ;;  %v6200_v15 = vld [vmem:[%s9014_s7 + $0x1b4] sm:$0xf0]  ;;  %v5513_v19 = vld [vmem:[%s9014_s7 + $0x1b8] sm:$0xf0]  ;;  %v5752_v28 = vor.u32 %v6263_v16, %v5751_v12  ;;  %v6320_v12 = vld [vmem:[%s9016_s9 + $0x5c] sm:$0x70] }
 0x326   :  { %3128 = vmatpush.bf16.msrb.mxu3 %v5344_v34  ;;  %3943 = vmatmul.bf16.vlgmr.msrb.gmra.mxu0 %v8065_v3  ;;  %v2399_v57 = vadd.f32 %v7950_v33, %v2359_v32  ;;  %v5903_v63 = vld [vmem:[%s9013_s8 + $0x298] sm:$0xf]  ;;  %v5481_v44 = vld [vmem:[%s9014_s7 + $0x178] sm:$0xf0] }
 0x327   :  { %v3724_v20 = vpack.c.b16 %v3620_v17, %v3620_v17  ;;  %v6192_v32 = vld [vmem:[%s9014_s7 + $0x174] sm:$0xf0] }
 0x328   :  { %3142 = vmatpush.bf16.msra.mxu1 %v5348_v31  ;;  %3115 = vmatpush.bf16.msrb.mxu2 %v5308_v48  ;;  %v2439_v36 = vadd.f32 %v7976_v40, %v2399_v57  ;;  %v5719_v57 = vld [vmem:[%s9013_s8 + $0x140] sm:$0xf]  ;;  %v5480_v55 = vor.u32 %v6192_v32, %v5479_v5  ;;  %v6282_v17 = vld [vmem:[%s9013_s8 + $0x234] sm:$0xf0]  ;;  %v6329_v5 = vmov 65535  }
 0x329   :  { %4009 = vmatpush.bf16.msra.mxu0 %v5932_v59  ;;  %v5512_v59 = vor.u32 %v6200_v15, %v5511_v46  ;;  %v6156_v15 = vld [vmem:[%s9014_s7 + $0x5c] sm:$0xf]  ;;  %v4192_v32 = vsel %vm4190_vm5, 4294967295, %v6329_v5  ;;  %v6272_v5 = vld [vmem:[%s9013_s8 + $0x1e4] sm:$0xf0] }
 0x32a   :  { %3129 = vmatpush.bf16.msrb.mxu3 %v5312_v43  ;;  %v6204_v43 = vld [vmem:[%s9014_s7 + $0x1dc] sm:$0xf] }
 0x32b   :  { %v5548_v51 = vor.u32 %v6204_v43, %v5545_v50  ;;  %v6239_v43 = vld [vmem:[%s9013_s8 + $0xdc] sm:$0xf0] }
 0x32c   :  { %v7978_v30 = vpop.f32.mrf.mxu2  ;;  %3143 = vmatpush.bf16.msra.mxu1 %v5316_v22  ;;  %v3846_v22 = vsel %vm3826_vm3, %v3724_v20, 0  ;;  %v5415_v20 = vld [vmem:[%s9014_s7 + $0xd8] sm:$0xf]  ;;  %v6231_v50 = vld [vmem:[%s9013_s8 + $0x9c] sm:$0xf0] }
 0x32d   :  { %4010 = vmatpush.bf16.msra.mxu0 %v5900_v10  ;;  %v2478_v39 = vadd.f32 %v7978_v30, %v2438_v45  ;;  %v5833_v30 = vld [vmem:[%s9013_s8 + $0x230] sm:$0xf0]  ;;  %v6255_v10 = vld [vmem:[%s9013_s8 + $0x15c] sm:$0xf0]  ;;  %v5871_v45 = vld [vmem:[%s9013_s8 + $0x258] sm:$0xf] }
 0x32e   :  { %v5836_v47 = vor.u32 %v6277_v56, %v5833_v30  ;;  %v6247_v56 = vld [vmem:[%s9013_s8 + $0x11c] sm:$0xf0]  ;;  %v5839_v30 = vld [vmem:[%s9013_s8 + $0x218] sm:$0xf] }
 0x331   :  { %4011 = vmatpush.bf16.msra.mxu0 %v5868_v42  ;;  %v5484_v42 = vor.u32 %v6188_v7, %v5481_v44  ;;  %v6148_v7 = vld [vmem:[%s9014_s7 + $0x1c] sm:$0xf] }
 0x332   :  { %v5321_v44 = vld [vmem:[%s9014_s7 + $0x38] sm:$0xf0] }
 0x334   :  { %v2475_v62 = vpop.f32.mrf.mxu2 }
 0x335   :  { %v2479_v21 = vadd.f32 %v2475_v62, %v2439_v36  ;;  %4012 = vmatpush.bf16.msra.mxu0 %v5836_v47  ;;  %v5935_v62 = vld [vmem:[%s9013_s8 + $0x2d8] sm:$0xf] }
 0x336   :  { %v6290_v36 = vld [vmem:[%s9013_s8 + $0x274] sm:$0xf0] }
 0x337   :  { %v5872_v0 = vor.u32 %v6290_v36, %v5871_v45  ;;  %v6215_v45 = vld [vmem:[%s9013_s8 + $0x1c] sm:$0xf0] }
 0x339   :  { %4036 = vmatpush.bf16.msrb.mxu0 %v3846_v22 }
 0x33c   :  { %v7998_v6 = vpop.f32.mrf.mxu3 }
 0x33d   :  { %v2518_v33 = vadd.f32 %v7998_v6, %v2478_v39  ;;  %v5447_v39 = vld [vmem:[%s9014_s7 + $0x118] sm:$0xf] }
 0x344   :  { %v2515_v8 = vpop.f32.mrf.mxu3 }
 0x345   :  { %v2519_v31 = vadd.f32 %v2515_v8, %v2479_v21  ;;  %v5936_v8 = vor.u32 %v6306_v1, %v5935_v62  ;;  %v6184_v21 = vld [vmem:[%s9014_s7 + $0x134] sm:$0xf0]  ;;  %v6164_v62 = vld [vmem:[%s9014_s7 + $0x9c] sm:$0xf] }
 0x346   :  { %v8027_v35 = vpop.f32.mrf.mxu1  ;;  %v5385_v1 = vld [vmem:[%s9014_s7 + $0xb8] sm:$0xf0] }
 0x347   :  { %v2558_v6 = vadd.f32 %v8027_v35, %v2518_v33  ;;  %v5553_v35 = vld [vmem:[%s9015_s1 + $0x8] sm:$0xf0]  ;;  %4037 = vmatpush.bf16.msrb.mxu0 %v5936_v8  ;;  %v6180_v33 = vld [vmem:[%s9014_s7 + $0x11c] sm:$0xf]  ;;  %v5351_v8 = vld [vmem:[%s9014_s7 + $0x58] sm:$0xf] }
 0x348   :  { %v8120_v38 = vor.u32 %v6209_v2, %v5553_v35  ;;  %v5656_v35 = vor.u32 %v6239_v43, %v5655_v27 }
 0x34a   :  { %5946 = vmatmul.msk.bf16.vlgmr.msra.gmra.mxu0 %vm3822_vm4, %v8120_v38 }
 0x34e   :  { %v2555_v4 = vpop.f32.mrf.mxu1 }
 0x34f   :  { %v2559_v58 = vadd.f32 %v2555_v4, %v2519_v31  ;;  %v6298_v4 = vld [vmem:[%s9013_s8 + $0x2b4] sm:$0xf0]  ;;  %v5449_v31 = vld [vmem:[%s9014_s7 + $0x138] sm:$0xf0] }
 0x350   :  { %v5452_v47 = vor.u32 %v6180_v33, %v5449_v31 }
 0x35c   :  { %v2592_v49 = vpop.f32.mrf.mxu2 }
 0x35d   :  { %v2598_v48 = vadd.f32 %v2592_v49, %v2558_v6  ;;  %v5904_v49 = vor.u32 %v6298_v4, %v5903_v63  ;;  %v5840_v6 = vor.u32 %v6282_v17, %v5839_v30  ;;  %v5319_v4 = vld [vmem:[%s9014_s7 + $0x18] sm:$0xf] }
 0x35f   :  { %4038 = vmatpush.bf16.msrb.mxu0 %v5904_v49  ;;  %v6152_v49 = vld [vmem:[%s9014_s7 + $0x34] sm:$0xf0] }
 0x363   :  { %4039 = vmatpush.bf16.msrb.mxu0 %v5872_v0 }
 0x364   :  { %v2595_v40 = vpop.f32.mrf.mxu2 }
 0x365   :  { %v2599_v37 = vadd.f32 %v2595_v40, %v2559_v58  ;;  %v5687_v40 = vld [vmem:[%s9013_s8 + $0x100] sm:$0xf]  ;;  %v5448_v58 = vor.u32 %v6184_v21, %v5447_v39  ;;  %v6267_v39 = vld [vmem:[%s9013_s8 + $0x1c4] sm:$0xf] }
 0x366   :  { %v5785_v21 = vld [vmem:[%s9013_s8 + $0x1e0] sm:$0xf0] }
 0x367   :  { %4040 = vmatpush.bf16.msrb.mxu0 %v5840_v6  ;;  %v5788_v17 = vor.u32 %v6267_v39, %v5785_v21  ;;  %v5911_v6 = vld [vmem:[%s9013_s8 + $0x2c0] sm:$0xf]  ;;  %v6300_v39 = vld [vmem:[%s9013_s8 + $0x2cc] sm:$0xf] }
 0x368   :  { %v5921_v21 = vld [vmem:[%s9013_s8 + $0x2e8] sm:$0xf0] }
 0x36a   :  { %5947 = vmatmul.msk.bf16.vlgmr.msrb.gmra.mxu0 %vm3822_vm4, %v8120_v38 }
 0x36c   :  { %v2632_v41 = vpop.f32.mrf.mxu3 }
 0x36d   :  { %v2638_v23 = vadd.f32 %v2632_v41, %v2598_v48  ;;  %v5516_v41 = vor.u32 %v6196_v29, %v5513_v19  ;;  %v6176_v48 = vld [vmem:[%s9014_s7 + $0xf4] sm:$0xf0]  ;;  %v6223_v29 = vld [vmem:[%s9013_s8 + $0x5c] sm:$0xf0]  ;;  %v3614_v19 = vunpack.c.l.b16 %v3309_v54 }
 0x36e   :  { %v5416_v22 = vor.u32 %v6176_v48, %v5415_v20  ;;  %v6299_v48 = vld [vmem:[%s9013_s8 + $0x2c4] sm:$0xf] }
 0x36f   :  { %v3718_v36 = vpack.c.b16 %v3614_v19, %v3614_v19  ;;  %v6279_v19 = vld [vmem:[%s9013_s8 + $0x21c] sm:$0xf0] }
 0x371   :  { %v3828_v30 = vsel %vm3826_vm3, %v3718_v36, 0  ;;  %v5759_v36 = vld [vmem:[%s9013_s8 + $0x188] sm:$0xf] }
 0x374   :  { %v2635_v18 = vpop.f32.mrf.mxu3 }
 0x375   :  { %v2639_v52 = vadd.f32 %v2635_v18, %v2599_v37  ;;  %v5688_v18 = vor.u32 %v6247_v56, %v5687_v40  ;;  %v6172_v37 = vld [vmem:[%s9014_s7 + $0xdc] sm:$0xf]  ;;  %v5324_v40 = vor.u32 %v6148_v7, %v5321_v44 }
 0x376   :  { %v2672_v34 = vpop.f32.mrf.mxu1  ;;  %v5420_v2 = vor.u32 %v6172_v37, %v5417_v14  ;;  %v5913_v37 = vld [vmem:[%s9013_s8 + $0x2e0] sm:$0xf0] }
 0x377   :  { %v2678_v24 = vadd.f32 %v2672_v34, %v2638_v23  ;;  %v5720_v34 = vor.u32 %v6255_v10, %v5719_v57  ;;  %v5383_v23 = vld [vmem:[%s9014_s7 + $0x98] sm:$0xf]  ;;  %v8296_v57 = vsel %vm4191_vm6, %v4192_v32, 0  ;;  %v5559_v10 = vld [vmem:[%s9013_s8] sm:$0xf] }
 0x378   :  { %v5560_v56 = vor.u32 %v6215_v45, %v5559_v10  ;;  %v8340_v14 = vld [vmem:[%s9017_s2] sm:$0xff] }
 0x379   :  { %v6227_v10 = vld [vmem:[%s9013_s8 + $0x84] sm:$0xf] }
 0x37a   :  { %v5625_v45 = vld [vmem:[%s9013_s8 + $0xa0] sm:$0xf0] }
 0x37e   :  { %v2675_v60 = vpop.f32.mrf.mxu1 }
 0x37f   :  { %v2679_v25 = vadd.f32 %v2675_v60, %v2639_v52  ;;  %v6168_v52 = vld [vmem:[%s9014_s7 + $0xb4] sm:$0xf0]  ;;  %v5623_v60 = vld [vmem:[%s9013_s8 + $0x80] sm:$0xf] }
 0x380   :  { %v5384_v11 = vor.u32 %v6168_v52, %v5383_v23  ;;  %v5624_v46 = vor.u32 %v6231_v50, %v5623_v60  ;;  %v6251_v23 = vld [vmem:[%s9013_s8 + $0x144] sm:$0xf] }
 0x381   :  { %v8145_v61 = vpack.c.bf16 %v2679_v25, %v2678_v24  ;;  %v6160_v24 = vld [vmem:[%s9014_s7 + $0x74] sm:$0xf0]  ;;  %v5987_v25 = vld [vmem:[%s9016_s9 + $0x40] sm:$0xf]  ;;  %v5721_v52 = vld [vmem:[%s9013_s8 + $0x160] sm:$0xf0] }
 0x382   :  { %v5988_v16 = vor.u32 %v6320_v12, %v5987_v25  ;;  %v5352_v63 = vor.u32 %v6160_v24, %v5351_v8  ;;  %v5724_v50 = vor.u32 %v6251_v23, %v5721_v52  ;;  %v6287_v8 = vld [vmem:[%s9013_s8 + $0x25c] sm:$0xf0]  ;;  %v6243_v24 = vld [vmem:[%s9013_s8 + $0x104] sm:$0xf] }
 0x383   :  { %3074 = vmatmul.bf16.vlgmr.msra.gmra.mxu2 %v8145_v61  ;;  %3088 = vmatmul.bf16.vlgmr.msra.gmra.mxu3 %v8145_v61  ;;  %v5689_v25 = vld [vmem:[%s9013_s8 + $0x120] sm:$0xf0] }
 0x384   :  { %3102 = vmatmul.bf16.vlgmr.msrb.gmra.mxu1 %v8145_v61  ;;  %3150 = vmatpush.bf16.msra.mxu2 %v5544_v26  ;;  %v5388_v26 = vor.u32 %v6164_v62, %v5385_v1  ;;  %v4195_v0 = vand.u32 %v5988_v16, %v8296_v57  ;;  %v6291_v62 = vld [vmem:[%s9013_s8 + $0x284] sm:$0xf] }
 0x385   :  { %3164 = vmatpush.bf16.msra.mxu3 %v5548_v51  ;;  %3851 = vmatpush.bf16.msrb.mxu1 %v5784_v9  ;;  %v5353_v51 = vld [vmem:[%s9014_s7 + $0x78] sm:$0xf0]  ;;  %v5591_v9 = vld [vmem:[%s9013_s8 + $0x40] sm:$0xf]  ;;  %v5881_v1 = vld [vmem:[%s9013_s8 + $0x2a0] sm:$0xf0] }
 0x386   :  { %4224 = vmatpush.bf16.msra.mxu0 %v4195_v0  ;;  %v6235_v16 = vld [vmem:[%s9013_s8 + $0xc4] sm:$0xf]  ;;  %v6264_v0 = vld [vmem:[%s9013_s8 + $0x1a4] sm:$0xf0] }
 0x388   :  { %3151 = vmatpush.bf16.msra.mxu2 %v5512_v59  ;;  %v3615_v59 = vunpack.c.h.b16 %v3309_v54  ;;  %v3310_v54 = vld [vmem:[%s9013_s8 + $0x308] sm:$0xff] }
 0x389   :  { %3165 = vmatpush.bf16.msra.mxu3 %v5516_v41  ;;  %3852 = vmatpush.bf16.msrb.mxu1 %v5752_v28  ;;  %v5356_v41 = vor.u32 %v6156_v15, %v5353_v51  ;;  %v5592_v28 = vor.u32 %v6223_v29, %v5591_v9  ;;  %v3617_v15 = vunpack.c.h.b16 %v3310_v54  ;;  %v5692_v9 = vor.u32 %v6243_v24, %v5689_v25  ;;  %v5815_v29 = vld [vmem:[%s9013_s8 + $0x200] sm:$0xf]  ;;  %v6269_v24 = vld [vmem:[%s9013_s8 + $0x1d4] sm:$0xf] }
 0x38a   :  { %v3719_v33 = vpack.c.b16 %v3615_v59, %v3615_v59  ;;  %v5791_v59 = vld [vmem:[%s9013_s8 + $0x1c8] sm:$0xf]  ;;  %v5801_v25 = vld [vmem:[%s9013_s8 + $0x1f0] sm:$0xf0] }
 0x38b   :  { %v3721_v32 = vpack.c.b16 %v3617_v15, %v3617_v15  ;;  %v5792_v44 = vor.u32 %v6272_v5, %v5791_v59  ;;  %v5599_v59 = vld [vmem:[%s9013_s8 + $0x48] sm:$0xf] }
 0x38c   :  { %3152 = vmatpush.bf16.msra.mxu2 %v5480_v55  ;;  %v5955_v55 = vld [vmem:[%s9016_s9] sm:$0xf]  ;;  %v3831_v20 = vsel %vm3826_vm3, %v3719_v33, 0  ;;  %v6219_v33 = vld [vmem:[%s9013_s8 + $0x44] sm:$0xf] }
 0x38d   :  { %3166 = vmatpush.bf16.msra.mxu3 %v5484_v42  ;;  %3853 = vmatpush.bf16.msrb.mxu1 %v5720_v34  ;;  %v6312_v42 = vld [vmem:[%s9016_s9 + $0x1c] sm:$0xf0]  ;;  %v5320_v34 = vor.u32 %v6152_v49, %v5319_v4  ;;  %v6275_v4 = vld [vmem:[%s9013_s8 + $0x204] sm:$0xf]  ;;  %v6224_v5 = vld [vmem:[%s9013_s8 + $0x64] sm:$0xf0] }
 0x38e   :  { %v5956_v31 = vor.u32 %v6312_v42, %v5955_v55  ;;  %v5817_v49 = vld [vmem:[%s9013_s8 + $0x220] sm:$0xf0]  ;;  %v3837_v55 = vsel %vm3826_vm3, %v3721_v32, 0  ;;  %v5628_v42 = vor.u32 %v6227_v10, %v5625_v45  ;;  %v3618_v32 = vunpack.c.l.b16 %v8038_v13  ;;  %v5737_v10 = vld [vmem:[%s9013_s8 + $0x170] sm:$0xf0] }
 0x38f   :  { %v5820_v7 = vor.u32 %v6275_v4, %v5817_v49  ;;  %v5600_v13 = vor.u32 %v6224_v5, %v5599_v59  ;;  %v5671_v5 = vld [vmem:[%s9013_s8 + $0xd0] sm:$0xf] }
 0x390   :  { %3153 = vmatpush.bf16.msra.mxu2 %v5448_v58  ;;  %v6303_v58 = vld [vmem:[%s9013_s8 + $0x2dc] sm:$0xf0]  ;;  %4225 = vmatpush.bf16.msra.mxu0 %v5956_v31  ;;  %v5593_v31 = vld [vmem:[%s9013_s8 + $0x60] sm:$0xf0] }
 0x391   :  { %3167 = vmatpush.bf16.msra.mxu3 %v5452_v47  ;;  %3854 = vmatpush.bf16.msrb.mxu1 %v5688_v18  ;;  %v6259_v47 = vld [vmem:[%s9013_s8 + $0x184] sm:$0xf]  ;;  %v5912_v27 = vor.u32 %v6303_v58, %v5911_v6  ;;  %v6292_v6 = vld [vmem:[%s9013_s8 + $0x28c] sm:$0xf] }
 0x392   :  { %v5753_v18 = vld [vmem:[%s9013_s8 + $0x1a0] sm:$0xf0]  ;;  %v5889_v58 = vld [vmem:[%s9013_s8 + $0x2a8] sm:$0xf0] }
 0x393   :  { %3116 = vmatmul.bf16.vlgmr.msrb.gmra.mxu2 %v8145_v61  ;;  %3130 = vmatmul.bf16.vlgmr.msrb.gmra.mxu3 %v8145_v61  ;;  %v5756_v43 = vor.u32 %v6259_v47, %v5753_v18  ;;  %v5596_v47 = vor.u32 %v6219_v33, %v5593_v31  ;;  %v6273_v33 = vld [vmem:[%s9013_s8 + $0x1ec] sm:$0xf0]  ;;  %v6245_v31 = vld [vmem:[%s9013_s8 + $0x114] sm:$0xf] }
 0x394   :  { %3144 = vmatmul.bf16.vlgmr.msra.gmra.mxu1 %v8145_v61  ;;  %3154 = vmatpush.bf16.msra.mxu2 %v5416_v22  ;;  %v5879_v22 = vld [vmem:[%s9013_s8 + $0x280] sm:$0xf] }
 0x395   :  { %3168 = vmatpush.bf16.msra.mxu3 %v5420_v2  ;;  %3855 = vmatpush.bf16.msrb.mxu1 %v5656_v35  ;;  %v5916_v2 = vor.u32 %v6299_v48, %v5913_v37  ;;  %v6295_v35 = vld [vmem:[%s9013_s8 + $0x29c] sm:$0xf0]  ;;  %v5561_v48 = vld [vmem:[%s9013_s8 + $0x20] sm:$0xf0] }
 0x396   :  { %6017 = vmatmul.msk.bf16.vlgmr.msra.gmra.mxu0 %vm4186_vm7, %v8340_v14  ;;  %v5880_v60 = vor.u32 %v6295_v35, %v5879_v22  ;;  %v6248_v22 = vld [vmem:[%s9013_s8 + $0x124] sm:$0xf0]  ;;  %v5857_v35 = vld [vmem:[%s9013_s8 + $0x268] sm:$0xf0] }
 0x398   :  { %3155 = vmatpush.bf16.msra.mxu2 %v5384_v11  ;;  %v5884_v11 = vor.u32 %v6291_v62, %v5881_v1  ;;  %v5663_v1 = vld [vmem:[%s9013_s8 + $0xc8] sm:$0xf] }
 0x399   :  { %3169 = vmatpush.bf16.msra.mxu3 %v5388_v26  ;;  %3856 = vmatpush.bf16.msrb.mxu1 %v5624_v46  ;;  %v6283_v26 = vld [vmem:[%s9013_s8 + $0x244] sm:$0xf] }
 0x39a   :  { %v5849_v46 = vld [vmem:[%s9013_s8 + $0x260] sm:$0xf0] }
 0x39b   :  { %v5852_v12 = vor.u32 %v6283_v26, %v5849_v46 }
 0x39c   :  { %3156 = vmatpush.bf16.msra.mxu2 %v5352_v63  ;;  %v5657_v63 = vld [vmem:[%s9013_s8 + $0xe0] sm:$0xf0] }
 0x39d   :  { %3170 = vmatpush.bf16.msra.mxu3 %v5356_v41  ;;  %3857 = vmatpush.bf16.msrb.mxu1 %v5592_v28  ;;  %v5816_v41 = vor.u32 %v6279_v19, %v5815_v29  ;;  %v5660_v28 = vor.u32 %v6235_v16, %v5657_v63  ;;  %v5804_v29 = vor.u32 %v6269_v24, %v5801_v25  ;;  %v5887_v19 = vld [vmem:[%s9013_s8 + $0x288] sm:$0xf]  ;;  %v6261_v16 = vld [vmem:[%s9013_s8 + $0x194] sm:$0xf]  ;;  %v5971_v24 = vld [vmem:[%s9016_s9 + $0x10] sm:$0xf] }
 0x39e   :  { %v5769_v63 = vld [vmem:[%s9013_s8 + $0x1b0] sm:$0xf0]  ;;  %v6314_v25 = vld [vmem:[%s9016_s9 + $0x2c] sm:$0xf0] }
 0x3a0   :  { %3157 = vmatpush.bf16.msra.mxu2 %v5320_v34  ;;  %v5760_v34 = vor.u32 %v6264_v0, %v5759_v36  ;;  %v5567_v36 = vld [vmem:[%s9013_s8 + $0x8] sm:$0xf] }
 0x3a1   :  { %3171 = vmatpush.bf16.msra.mxu3 %v5324_v40  ;;  %3858 = vmatpush.bf16.msrb.mxu1 %v5560_v56  ;;  %v3616_v40 = vunpack.c.l.b16 %v3310_v54  ;;  %v5924_v56 = vor.u32 %v6300_v39, %v5921_v21  ;;  %v6304_v54 = vld [vmem:[%s9013_s8 + $0x2e4] sm:$0xf0]  ;;  %v3722_v39 = vpack.c.b16 %v3618_v32, %v3618_v32  ;;  %v6241_v32 = vld [vmem:[%s9013_s8 + $0xec] sm:$0xf0] }
 0x3a2   :  { %v6216_v0 = vld [vmem:[%s9013_s8 + $0x24] sm:$0xf0] }
 0x3a3   :  { %3158 = vmatmul.bf16.vlgmr.msra.gmra.mxu2 %v8145_v61  ;;  %v3720_v37 = vpack.c.b16 %v3616_v40, %v3616_v40  ;;  %v5705_v40 = vld [vmem:[%s9013_s8 + $0x130] sm:$0xf0] }
 0x3a4   :  { %3868 = vmatpush.bf16.msrb.mxu2 %v3828_v30  ;;  %3172 = vmatmul.bf16.vlgmr.msra.gmra.mxu3 %v8145_v61  ;;  %v5847_v61 = vld [vmem:[%s9013_s8 + $0x240] sm:$0xf]  ;;  %v5727_v30 = vld [vmem:[%s9013_s8 + $0x148] sm:$0xf] }
 0x3a5   :  { %3879 = vmatpush.bf16.msrb.mxu3 %v5788_v17  ;;  %3896 = vmatpush.bf16.msra.mxu1 %v3831_v20  ;;  %v5848_v51 = vor.u32 %v6287_v8, %v5847_v61  ;;  %v6256_v17 = vld [vmem:[%s9013_s8 + $0x164] sm:$0xf0]  ;;  %v6211_v20 = vld [vmem:[%s9013_s8 + $0x4] sm:$0xf]  ;;  %v3834_v62 = vsel %vm3826_vm3, %v3720_v37, 0 }
 0x3a6   :  { %3859 = vmatmul.bf16.vlgmr.msrb.gmra.mxu1 %v8065_v3  ;;  %v5728_v18 = vor.u32 %v6256_v17, %v5727_v30  ;;  %v5564_v23 = vor.u32 %v6211_v20, %v5561_v48  ;;  %v5919_v61 = vld [vmem:[%s9013_s8 + $0x2c8] sm:$0xf]  ;;  %v5825_v8 = vld [vmem:[%s9013_s8 + $0x228] sm:$0xf0]  ;;  %v5927_v20 = vld [vmem:[%s9013_s8 + $0x2d0] sm:$0xf] }
 0x3a7   :  { %v5920_v46 = vor.u32 %v6304_v54, %v5919_v61  ;;  %v6305_v48 = vld [vmem:[%s9013_s8 + $0x2ec] sm:$0xf0]  ;;  %v6237_v37 = vld [vmem:[%s9013_s8 + $0xd4] sm:$0xf] }
 0x3a8   :  { %3869 = vmatpush.bf16.msrb.mxu2 %v5912_v27  ;;  %v5892_v27 = vor.u32 %v6292_v6, %v5889_v58  ;;  %v3840_v6 = vsel %vm3826_vm3, %v3722_v39, 0  ;;  %v5767_v58 = vld [vmem:[%s9013_s8 + $0x190] sm:$0xf]  ;;  %v6229_v54 = vld [vmem:[%s9013_s8 + $0x94] sm:$0xf] }
 0x3a9   :  { %3880 = vmatpush.bf16.msrb.mxu3 %v5756_v43  ;;  %3897 = vmatpush.bf16.msra.mxu1 %v5916_v2  ;;  %v5695_v43 = vld [vmem:[%s9013_s8 + $0x108] sm:$0xf]  ;;  %v6284_v2 = vld [vmem:[%s9013_s8 + $0x24c] sm:$0xf]  ;;  %v6297_v61 = vld [vmem:[%s9013_s8 + $0x2ac] sm:$0xf0] }
 0x3aa   :  { %v5696_v52 = vor.u32 %v6248_v22, %v5695_v43  ;;  %v6003_v43 = vld [vmem:[%s9016_s9 + $0x50] sm:$0xf] }
 0x3ab   :  { %v6322_v22 = vld [vmem:[%s9016_s9 + $0x6c] sm:$0x70] }
 0x3ac   :  { %3870 = vmatpush.bf16.msrb.mxu2 %v5880_v60  ;;  %v5860_v60 = vor.u32 %v6284_v2, %v5857_v35  ;;  %v6004_v2 = vor.u32 %v6322_v22, %v6003_v43  ;;  %v6233_v39 = vld [vmem:[%s9013_s8 + $0xac] sm:$0xf0] }
 0x3ad   :  { %3881 = vmatpush.bf16.msrb.mxu3 %v5724_v50  ;;  %3898 = vmatpush.bf16.msra.mxu1 %v5884_v11  ;;  %v6240_v50 = vld [vmem:[%s9013_s8 + $0xe4] sm:$0xf0]  ;;  %v6276_v11 = vld [vmem:[%s9013_s8 + $0x20c] sm:$0xf]  ;;  %v6217_v43 = vld [vmem:[%s9013_s8 + $0x2c] sm:$0xf0] }
 0x3ae   :  { %v5664_v26 = vor.u32 %v6240_v50, %v5663_v1  ;;  %v5828_v15 = vor.u32 %v6276_v11, %v5825_v8  ;;  %v6257_v1 = vld [vmem:[%s9013_s8 + $0x16c] sm:$0xf0]  ;;  %v4207_v50 = vand.u32 %v6004_v2, %v8296_v57  ;;  %v5641_v11 = vld [vmem:[%s9013_s8 + $0xb0] sm:$0xf0] }
 0x3b0   :  { %3871 = vmatpush.bf16.msrb.mxu2 %v5848_v51  ;;  %v5631_v51 = vld [vmem:[%s9013_s8 + $0x88] sm:$0xf]  ;;  %4280 = vmatpush.bf16.msrb.mxu0 %v4207_v50 }
 0x3b1   :  { %3882 = vmatpush.bf16.msrb.mxu3 %v5692_v9  ;;  %3899 = vmatpush.bf16.msra.mxu1 %v5852_v12  ;;  %v6232_v9 = vld [vmem:[%s9013_s8 + $0xa4] sm:$0xf0] }
 0x3b2   :  { %v6296_v12 = vld [vmem:[%s9013_s8 + $0x2a4] sm:$0xf0]  ;;  %v5632_v4 = vor.u32 %v6232_v9, %v5631_v51  ;;  %v6249_v51 = vld [vmem:[%s9013_s8 + $0x12c] sm:$0xf0] }
 0x3b3   :  { %v5888_v49 = vor.u32 %v6296_v12, %v5887_v19  ;;  %v5863_v9 = vld [vmem:[%s9013_s8 + $0x250] sm:$0xf]  ;;  %v6221_v12 = vld [vmem:[%s9013_s8 + $0x54] sm:$0xf] }
 0x3b4   :  { %3872 = vmatpush.bf16.msrb.mxu2 %v5816_v41  ;;  %v5772_v41 = vor.u32 %v6261_v16, %v5769_v63  ;;  %v6289_v19 = vld [vmem:[%s9013_s8 + $0x26c] sm:$0xf0]  ;;  %v5609_v16 = vld [vmem:[%s9013_s8 + $0x70] sm:$0xf0]  ;;  %v3621_v63 = vunpack.c.h.b16 %v8094_v53 }
 0x3b5   :  { %3883 = vmatpush.bf16.msrb.mxu3 %v5660_v28  ;;  %3900 = vmatpush.bf16.msra.mxu1 %v5820_v7  ;;  %v5855_v28 = vld [vmem:[%s9013_s8 + $0x248] sm:$0xf]  ;;  %v5612_v59 = vor.u32 %v6221_v12, %v5609_v16  ;;  %v6281_v53 = vld [vmem:[%s9013_s8 + $0x22c] sm:$0xf0]  ;;  %v6011_v12 = vld [vmem:[%s9016_s9 + $0x58] sm:$0xf] }
 0x3b6   :  { %v6288_v7 = vld [vmem:[%s9013_s8 + $0x264] sm:$0xf0]  ;;  %v6323_v16 = vld [vmem:[%s9016_s9 + $0x74] sm:$0x70] }
 0x3b7   :  { %5941 = vmatmul.msk.bf16.vlgmr.msrb.gmra.mxu2 %vm3822_vm4, %v8120_v38  ;;  %v5856_v45 = vor.u32 %v6288_v7, %v5855_v28  ;;  %v6213_v28 = vld [vmem:[%s9013_s8 + $0x14] sm:$0xf] }
 0x3b8   :  { %3907 = vmatpush.bf16.msra.mxu2 %v5792_v44  ;;  %5942 = vmatmul.msk.bf16.vlgmr.msra.gmra.mxu1 %vm3822_vm4, %v8120_v38  ;;  %v6253_v44 = vld [vmem:[%s9013_s8 + $0x154] sm:$0xf] }
 0x3b9   :  { %3952 = vmatpush.bf16.msrb.mxu1 %v3837_v55  ;;  %3884 = vmatpush.bf16.msrb.mxu3 %v5628_v42  ;;  %v5823_v55 = vld [vmem:[%s9013_s8 + $0x208] sm:$0xf]  ;;  %v5740_v21 = vor.u32 %v6253_v44, %v5737_v10  ;;  %v5577_v7 = vld [vmem:[%s9013_s8 + $0x30] sm:$0xf0]  ;;  %v3725_v44 = vpack.c.b16 %v3621_v63, %v3621_v63  ;;  %v5807_v10 = vld [vmem:[%s9013_s8 + $0x1d8] sm:$0xf] }
 0x3ba   :  { %v6280_v42 = vld [vmem:[%s9013_s8 + $0x224] sm:$0xf0] }
 0x3bb   :  { %v5824_v30 = vor.u32 %v6280_v42, %v5823_v55  ;;  %v5639_v55 = vld [vmem:[%s9013_s8 + $0x90] sm:$0xf]  ;;  %v3849_v42 = vsel %vm3826_vm3, %v3725_v44, 0 }
 0x3bc   :  { %3908 = vmatpush.bf16.msra.mxu2 %v5760_v34  ;;  %v5799_v34 = vld [vmem:[%s9013_s8 + $0x1d0] sm:$0xf] }
 0x3bd   :  { %3953 = vmatpush.bf16.msrb.mxu1 %v5924_v56  ;;  %3885 = vmatpush.bf16.msrb.mxu3 %v5596_v47  ;;  %v5568_v56 = vor.u32 %v6216_v0, %v5567_v36  ;;  %v5800_v17 = vor.u32 %v6273_v33, %v5799_v34  ;;  %v6265_v47 = vld [vmem:[%s9013_s8 + $0x1ac] sm:$0xf0]  ;;  %v5580_v0 = vor.u32 %v6213_v28, %v5577_v7  ;;  %v5775_v34 = vld [vmem:[%s9013_s8 + $0x198] sm:$0xf]  ;;  %v6313_v28 = vld [vmem:[%s9016_s9 + $0x24] sm:$0xf0] }
 0x3be   :  { %v5768_v35 = vor.u32 %v6265_v47, %v5767_v58  ;;  %v6266_v33 = vld [vmem:[%s9013_s8 + $0x1b4] sm:$0xf0]  ;;  %v6012_v7 = vor.u32 %v6323_v16, %v6011_v12  ;;  %v6319_v12 = vld [vmem:[%s9016_s9 + $0x5c] sm:$0xf] }
 0x3bf   :  { %v5743_v47 = vld [vmem:[%s9013_s8 + $0x158] sm:$0xf]  ;;  %v6013_v16 = vld [vmem:[%s9016_s9 + $0x78] sm:$0x70] }
 0x3c0   :  { %3909 = vmatpush.bf16.msra.mxu2 %v5728_v18  ;;  %v5708_v18 = vor.u32 %v6245_v31, %v5705_v40  ;;  %v6302_v31 = vld [vmem:[%s9013_s8 + $0x2dc] sm:$0xf] }
 0x3c1   :  { %3954 = vmatpush.bf16.msrb.mxu1 %v5892_v27  ;;  %3886 = vmatpush.bf16.msrb.mxu3 %v5564_v23  ;;  %v5673_v27 = vld [vmem:[%s9013_s8 + $0xf0] sm:$0xf0]  ;;  %v5928_v23 = vor.u32 %v6305_v48, %v5927_v20  ;;  %v5937_v40 = vld [vmem:[%s9013_s8 + $0x2f8] sm:$0xf0] }
 0x3c2   :  { %v5940_v58 = vor.u32 %v6302_v31, %v5937_v40  ;;  %v6294_v20 = vld [vmem:[%s9013_s8 + $0x29c] sm:$0xf]  ;;  %v6315_v31 = vld [vmem:[%s9016_s9 + $0x34] sm:$0xf0] }
 0x3c3   :  { %v5905_v48 = vld [vmem:[%s9013_s8 + $0x2b8] sm:$0xf0] }
 0x3c4   :  { %3910 = vmatpush.bf16.msra.mxu2 %v5696_v52  ;;  %3887 = vmatmul.bf16.vlgmr.msrb.gmra.mxu3 %v8065_v3  ;;  %v5676_v52 = vor.u32 %v6237_v37, %v5673_v27  ;;  %v5575_v27 = vld [vmem:[%s9013_s8 + $0x10] sm:$0xf]  ;;  %v5908_v2 = vor.u32 %v6294_v20, %v5905_v48  ;;  %v6005_v20 = vld [vmem:[%s9016_s9 + $0x70] sm:$0x70] }
 0x3c5   :  { %3924 = vmatpush.bf16.msra.mxu3 %v3834_v62  ;;  %3955 = vmatpush.bf16.msrb.mxu1 %v5860_v60  ;;  %v5735_v62 = vld [vmem:[%s9013_s8 + $0x150] sm:$0xf]  ;;  %v5576_v50 = vor.u32 %v6217_v43, %v5575_v27  ;;  %v5649_v27 = vld [vmem:[%s9013_s8 + $0xb8] sm:$0xf0]  ;;  %v8824_v43 = vld [vmem:[%s9018_s10] sm:$0xff] }
 0x3c6   :  { %v5895_v60 = vld [vmem:[%s9013_s8 + $0x290] sm:$0xf]  ;;  %v5736_v8 = vor.u32 %v6257_v1, %v5735_v62  ;;  %v6250_v62 = vld [vmem:[%s9013_s8 + $0x134] sm:$0xf0]  ;;  %v6286_v1 = vld [vmem:[%s9013_s8 + $0x25c] sm:$0xf] }
 0x3c8   :  { %3911 = vmatpush.bf16.msra.mxu2 %v5664_v26  ;;  %v5896_v26 = vor.u32 %v6297_v61, %v5895_v60  ;;  %v5873_v60 = vld [vmem:[%s9013_s8 + $0x278] sm:$0xf0]  ;;  %v5995_v61 = vld [vmem:[%s9016_s9 + $0x48] sm:$0xf] }
 0x3c9   :  { %3925 = vmatpush.bf16.msra.mxu3 %v5920_v46  ;;  %3956 = vmatpush.bf16.msrb.mxu1 %v5828_v15  ;;  %v5644_v46 = vor.u32 %v6229_v54, %v5641_v11  ;;  %v5703_v15 = vld [vmem:[%s9013_s8 + $0x110] sm:$0xf]  ;;  %v6321_v54 = vld [vmem:[%s9016_s9 + $0x64] sm:$0x70] }
 0x3cc   :  { %5944 = vmatmul.msk.bf16.vlgmr.msrb.gmra.mxu1 %vm3822_vm4, %v8120_v38  ;;  %3912 = vmatpush.bf16.msra.mxu2 %v5632_v4  ;;  %v5704_v4 = vor.u32 %v6249_v51, %v5703_v15  ;;  %v6242_v15 = vld [vmem:[%s9013_s8 + $0xf4] sm:$0xf0]  ;;  %v6278_v51 = vld [vmem:[%s9013_s8 + $0x21c] sm:$0xf] }
 0x3cd   :  { %3991 = vmatpush.bf16.msra.mxu1 %v5804_v29  ;;  %3926 = vmatpush.bf16.msra.mxu3 %v5888_v49  ;;  %v5972_v29 = vor.u32 %v6314_v25, %v5971_v24  ;;  %v5864_v49 = vor.u32 %v6289_v19, %v5863_v9  ;;  %v5876_v24 = vor.u32 %v6286_v1, %v5873_v60  ;;  %v5679_v25 = vld [vmem:[%s9013_s8 + $0xd8] sm:$0xf]  ;;  %v5841_v9 = vld [vmem:[%s9013_s8 + $0x238] sm:$0xf0]  ;;  %v3181_v1 = vperm.slane %v8824_v43, 2 }
 0x3ce   :  { %v5680_v63 = vor.u32 %v6242_v15, %v5679_v25  ;;  %v6222_v60 = vld [vmem:[%s9013_s8 + $0x5c] sm:$0xf] }
 0x3cf   :  { %4281 = vmatpush.bf16.msrb.mxu0 %v5972_v29  ;;  %v5996_v29 = vor.u32 %v6321_v54, %v5995_v61  ;;  %v6317_v61 = vld [vmem:[%s9016_s9 + $0x4c] sm:$0xf] }
 0x3d0   :  { %3913 = vmatpush.bf16.msra.mxu2 %v5600_v13  ;;  %v6274_v13 = vld [vmem:[%s9013_s8 + $0x1f4] sm:$0xf0]  ;;  %v5997_v54 = vld [vmem:[%s9016_s9 + $0x68] sm:$0x70] }
 0x3d1   :  { %3992 = vmatpush.bf16.msra.mxu1 %v5772_v41  ;;  %3927 = vmatpush.bf16.msra.mxu3 %v5856_v45  ;;  %v5831_v41 = vld [vmem:[%s9013_s8 + $0x210] sm:$0xf]  ;;  %v5672_v45 = vor.u32 %v6241_v32, %v5671_v5  ;;  %v5647_v5 = vld [vmem:[%s9013_s8 + $0x98] sm:$0xf] }
 0x3d2   :  { %6021 = vmatmul.msk.bf16.vlgmr.msrb.gmra.mxu0 %vm4186_vm7, %v8340_v14  ;;  %v5832_v36 = vor.u32 %v6281_v53, %v5831_v41  ;;  %v6234_v32 = vld [vmem:[%s9013_s8 + $0xb4] sm:$0xf0]  ;;  %v4201_v41 = vand.u32 %v5996_v29, %v8296_v57  ;;  %v5963_v53 = vld [vmem:[%s9016_s9 + $0x8] sm:$0xf]  ;;  %v6000_v29 = vor.u32 %v6317_v61, %v5997_v54 }
 0x3d4   :  { %3914 = vmatpush.bf16.msra.mxu2 %v5568_v56  ;;  %v5640_v56 = vor.u32 %v6233_v39, %v5639_v55  ;;  %v5964_v55 = vor.u32 %v6313_v28, %v5963_v53  ;;  %v6316_v39 = vld [vmem:[%s9016_s9 + $0x44] sm:$0xf]  ;;  %v6309_v53 = vld [vmem:[%s9016_s9 + $0xc] sm:$0xf] }
 0x3d5   :  { %3993 = vmatpush.bf16.msra.mxu1 %v5740_v21  ;;  %3928 = vmatpush.bf16.msra.mxu3 %v5824_v30  ;;  %v5808_v21 = vor.u32 %v6274_v13, %v5807_v10  ;;  %v5607_v30 = vld [vmem:[%s9013_s8 + $0x50] sm:$0xf]  ;;  %v5648_v10 = vor.u32 %v6234_v32, %v5647_v5  ;;  %v6246_v13 = vld [vmem:[%s9013_s8 + $0x11c] sm:$0xf]  ;;  %v4204_v32 = vand.u32 %v6000_v29, %v8296_v57  ;;  %v5965_v28 = vld [vmem:[%s9016_s9 + $0x28] sm:$0xf0] }
 0x3d7   :  { %3915 = vmatmul.bf16.vlgmr.msra.gmra.mxu2 %v8065_v3 }
 0x3d8   :  { %3963 = vmatpush.bf16.msrb.mxu2 %v5800_v17  ;;  %5943 = vmatmul.msk.bf16.vlgmr.msra.gmra.mxu3 %vm3822_vm4, %v8120_v38  ;;  %v6225_v17 = vld [vmem:[%s9013_s8 + $0x6c] sm:$0xf0] }
 0x3d9   :  { %3980 = vmatpush.bf16.msrb.mxu3 %v3840_v6  ;;  %3994 = vmatpush.bf16.msra.mxu1 %v5708_v18  ;;  %v5776_v6 = vor.u32 %v6266_v33, %v5775_v34  ;;  %v6258_v18 = vld [vmem:[%s9013_s8 + $0x174] sm:$0xf0]  ;;  %v5608_v37 = vor.u32 %v6225_v17, %v5607_v30 }
 0x3da   :  { %v5744_v22 = vor.u32 %v6258_v18, %v5743_v47  ;;  %v5979_v33 = vld [vmem:[%s9016_s9 + $0x18] sm:$0xf]  ;;  %v6318_v18 = vld [vmem:[%s9016_s9 + $0x54] sm:$0xf] }
 0x3db   :  { %v5583_v30 = vld [vmem:[%s9013_s8 + $0x18] sm:$0xf] }
 0x3dc   :  { %3964 = vmatpush.bf16.msrb.mxu2 %v5768_v35  ;;  %v5711_v35 = vld [vmem:[%s9013_s8 + $0x118] sm:$0xf] }
 0x3dd   :  { %3981 = vmatpush.bf16.msrb.mxu3 %v5928_v23  ;;  %3995 = vmatpush.bf16.msra.mxu1 %v5676_v52  ;;  %v6270_v23 = vld [vmem:[%s9013_s8 + $0x1dc] sm:$0xf]  ;;  %v6218_v17 = vld [vmem:[%s9013_s8 + $0x34] sm:$0xf0] }
 0x3de   :  { %v5809_v52 = vld [vmem:[%s9013_s8 + $0x1f8] sm:$0xf0]  ;;  %v5584_v48 = vor.u32 %v6218_v17, %v5583_v30 }
 0x3df   :  { %v5812_v11 = vor.u32 %v6270_v23, %v5809_v52  ;;  %v5957_v23 = vld [vmem:[%s9016_s9 + $0x20] sm:$0xf0]  ;;  %v6008_v52 = vor.u32 %v6318_v18, %v6005_v20 }
 0x3e0   :  { %3965 = vmatpush.bf16.msrb.mxu2 %v5736_v8  ;;  %v5712_v8 = vor.u32 %v6250_v62, %v5711_v35  ;;  %v6308_v35 = vld [vmem:[%s9016_s9 + $0x4] sm:$0xf] }
 0x3e1   :  { %3982 = vmatpush.bf16.msrb.mxu3 %v5896_v26  ;;  %3996 = vmatpush.bf16.msra.mxu1 %v5644_v46  ;;  %v6262_v26 = vld [vmem:[%s9013_s8 + $0x19c] sm:$0xf] }
 0x3e2   :  { %v5777_v46 = vld [vmem:[%s9013_s8 + $0x1b8] sm:$0xf0] }
 0x3e3   :  { %v5780_v19 = vor.u32 %v6262_v26, %v5777_v46  ;;  %v6310_v26 = vld [vmem:[%s9016_s9 + $0x14] sm:$0xf] }
 0x3e4   :  { %3966 = vmatpush.bf16.msrb.mxu2 %v5704_v4  ;;  %v5844_v4 = vor.u32 %v6278_v51, %v5841_v9  ;;  %v5973_v46 = vld [vmem:[%s9016_s9 + $0x30] sm:$0xf0]  ;;  %v6214_v51 = vld [vmem:[%s9013_s8 + $0x1c] sm:$0xf] }
 0x3e5   :  { %3983 = vmatpush.bf16.msrb.mxu3 %v5864_v49  ;;  %3997 = vmatpush.bf16.msra.mxu1 %v5612_v59  ;;  %v6254_v49 = vld [vmem:[%s9013_s8 + $0x15c] sm:$0xf] }
 0x3e6   :  { %v5745_v59 = vld [vmem:[%s9013_s8 + $0x178] sm:$0xf0] }
 0x3e7   :  { %v5748_v44 = vor.u32 %v6254_v49, %v5745_v59  ;;  %v5585_v9 = vld [vmem:[%s9013_s8 + $0x38] sm:$0xf0] }
 0x3e8   :  { %3967 = vmatpush.bf16.msrb.mxu2 %v5672_v45  ;;  %v5713_v45 = vld [vmem:[%s9013_s8 + $0x138] sm:$0xf0] }
 0x3e9   :  { %3984 = vmatpush.bf16.msrb.mxu3 %v5832_v36  ;;  %3998 = vmatpush.bf16.msra.mxu1 %v5580_v0  ;;  %v5615_v36 = vld [vmem:[%s9013_s8 + $0x58] sm:$0xf]  ;;  %v5716_v34 = vor.u32 %v6246_v13, %v5713_v45  ;;  %v5968_v13 = vor.u32 %v6309_v53, %v5965_v28 }
 0x3ea   :  { %v6226_v0 = vld [vmem:[%s9013_s8 + $0x74] sm:$0xf0] }
 0x3eb   :  { %v5616_v40 = vor.u32 %v6226_v0, %v5615_v36  ;;  %v6311_v36 = vld [vmem:[%s9016_s9 + $0x1c] sm:$0xf] }
 0x3ec   :  { %3999 = vmatmul.bf16.vlgmr.msra.gmra.mxu1 %v8065_v3  ;;  %3968 = vmatpush.bf16.msrb.mxu2 %v5640_v56  ;;  %v6238_v56 = vld [vmem:[%s9013_s8 + $0xdc] sm:$0xf] }
 0x3ed   :  { %4019 = vmatpush.bf16.msra.mxu3 %v5808_v21  ;;  %4064 = vmatpush.bf16.msrb.mxu1 %v3849_v42  ;;  %v5989_v21 = vld [vmem:[%s9016_s9 + $0x60] sm:$0x70]  ;;  %v4213_v42 = vand.u32 %v6012_v7, %v8296_v57  ;;  %v6016_v7 = vor.u32 %v6319_v12, %v6013_v16  ;;  %v5981_v0 = vld [vmem:[%s9016_s9 + $0x38] sm:$0xf0] }
 0x3ee   :  { %5945 = vmatmul.msk.bf16.vlgmr.msrb.gmra.mxu3 %vm3822_vm4, %v8120_v38 }
 0x3ef   :  { %v4216_v45 = vand.u32 %v6016_v7, %v8296_v57 }
 0x3f0   :  { %3969 = vmatpush.bf16.msrb.mxu2 %v5608_v37  ;;  %v6230_v37 = vld [vmem:[%s9013_s8 + $0x9c] sm:$0xf] }
 0x3f1   :  { %4020 = vmatpush.bf16.msra.mxu3 %v5776_v6  ;;  %4065 = vmatpush.bf16.msrb.mxu1 %v5940_v58  ;;  %v5992_v6 = vor.u32 %v6316_v39, %v5989_v21  ;;  %v5980_v58 = vor.u32 %v6315_v31, %v5979_v33  ;;  %v5652_v62 = vor.u32 %v6230_v37, %v5649_v27  ;;  %v3184_v21 = vperm.slane %v8824_v43, 5 }
 0x3f2   :  { %v3182_v31 = vperm.slane %v8824_v43, 3  ;;  %v3186_v37 = vperm.slane %v8824_v43, 7 }
 0x3f4   :  { %3970 = vmatpush.bf16.msrb.mxu2 %v5576_v50  ;;  %v5617_v50 = vld [vmem:[%s9013_s8 + $0x78] sm:$0xf0] }
 0x3f5   :  { %4021 = vmatpush.bf16.msra.mxu3 %v5744_v22  ;;  %4066 = vmatpush.bf16.msrb.mxu1 %v5908_v2  ;;  %v4198_v22 = vand.u32 %v5992_v6, %v8296_v57  ;;  %v8827_v2 = vpop.f32.mrf.mxu0  ;;  %v5620_v25 = vor.u32 %v6222_v60, %v5617_v50 }
 0x3f7   :  { %3971 = vmatmul.bf16.vlgmr.msrb.gmra.mxu2 %v8065_v3 }
 0x3f8   :  { %4047 = vmatpush.bf16.msra.mxu2 %v5812_v11  ;;  %v5960_v11 = vor.u32 %v6308_v35, %v5957_v23 }
 0x3f9   :  { %4022 = vmatpush.bf16.msra.mxu3 %v5712_v8  ;;  %4067 = vmatpush.bf16.msrb.mxu1 %v5876_v24  ;;  %v4210_v8 = vand.u32 %v6008_v52, %v8296_v57 }
 0x3fc   :  { %4048 = vmatpush.bf16.msra.mxu2 %v5780_v19  ;;  %v3180_v19 = vperm.slane %v8824_v43, 1 }
 0x3fd   :  { %4023 = vmatpush.bf16.msra.mxu3 %v5680_v63  ;;  %4068 = vmatpush.bf16.msrb.mxu1 %v5844_v4  ;;  %v5976_v63 = vor.u32 %v6310_v26, %v5973_v46  ;;  %v5588_v4 = vor.u32 %v6214_v51, %v5585_v9  ;;  %v8873_v49 = vpop.f32.mrf.mxu0 }
 0x400   :  { %5948 = vmatmul.msk.bf16.vlgmr.msrb.gmra.mxu1 %vm3822_vm4, %v8120_v38  ;;  %4049 = vmatpush.bf16.msra.mxu2 %v5748_v44  ;;  %v5681_v38 = vld [vmem:[%s9013_s8 + $0xf8] sm:$0xf0] }
 0x401   :  { %4252 = vmatpush.bf16.msra.mxu1 %v4201_v41  ;;  %4024 = vmatpush.bf16.msra.mxu3 %v5648_v10  ;;  %v5684_v47 = vor.u32 %v6238_v56, %v5681_v38  ;;  %v3103_v24 = vpop.f32.mrf.mxu1 }
 0x402   :  { %v8856_v15 = vadd.f32 %v3181_v1, %v3103_v24 }
 0x404   :  { %4050 = vmatpush.bf16.msra.mxu2 %v5716_v34  ;;  %v5984_v34 = vor.u32 %v6311_v36, %v5981_v0 }
 0x405   :  { %4253 = vmatpush.bf16.msra.mxu1 %v5964_v55  ;;  %4025 = vmatpush.bf16.msra.mxu3 %v5616_v40  ;;  %v8897_v57 = vpop.f32.mrf.mxu0 }
 0x406   :  { %v3075_v59 = vpop.f32.mrf.mxu2  ;;  %v3089_v5 = vpop.f32.mrf.mxu3 }
 0x407   :  { %v8876_v41 = vadd.f32 %v3180_v19, %v3089_v5 }
 0x408   :  { %4051 = vmatpush.bf16.msra.mxu2 %v5684_v47 }
 0x409   :  { %4308 = vmatpush.bf16.msrb.mxu1 %v4213_v42  ;;  %4026 = vmatpush.bf16.msra.mxu3 %v5584_v48  ;;  %v3105_v44 = vpop.f32.mrf.mxu1  ;;  %v3185_v48 = vperm.slane %v8824_v43, 6 }
 0x40a   :  { %v8884_v10 = vadd.f32 %v3181_v1, %v3105_v44 }
 0x40c   :  { %4027 = vmatmul.bf16.vlgmr.msra.gmra.mxu3 %v8065_v3  ;;  %4052 = vmatpush.bf16.msra.mxu2 %v5652_v62 }
 0x40d   :  { %4309 = vmatpush.bf16.msrb.mxu1 %v5980_v58  ;;  %4238 = vmatpush.bf16.msrb.mxu3 %v4198_v22  ;;  %v8910_v6 = vpop.f32.mrf.mxu0 }
 0x40e   :  { %v3077_v55 = vpop.f32.mrf.mxu2  ;;  %v3091_v39 = vpop.f32.mrf.mxu3 }
 0x40f   :  { %v8895_v42 = vadd.f32 %v3180_v19, %v3091_v39 }
 0x410   :  { %6019 = vmatmul.msk.bf16.vlgmr.msra.gmra.mxu1 %vm4186_vm7, %v8340_v14  ;;  %4053 = vmatpush.bf16.msra.mxu2 %v5620_v25 }
 0x411   :  { %4239 = vmatpush.bf16.msrb.mxu3 %v5960_v11 }
 0x414   :  { %4054 = vmatpush.bf16.msra.mxu2 %v5588_v4 }
 0x415   :  { %4294 = vmatpush.bf16.msra.mxu3 %v4210_v8  ;;  %v8920_v27 = vpop.f32.mrf.mxu0  ;;  %v3179_v8 = vperm.slane %v8824_v43, 0 }
 0x416   :  { %v3117_v40 = vpop.f32.mrf.mxu2  ;;  %v8906_v56 = vpop.f32.mrf.mxu3 }
 0x417   :  { %4055 = vmatmul.bf16.vlgmr.msra.gmra.mxu2 %v8065_v3  ;;  %v3145_v3 = vpop.f32.mrf.mxu1  ;;  %v3198_v38 = vadd.f32 %v3182_v31, %v3117_v40  ;;  %v3195_v26 = vadd.f32 %v3179_v8, %v3075_v59  ;;  %v3203_v19 = vadd.f32 %v3179_v8, %v3077_v55 }
 0x418   :  { %4266 = vmatpush.bf16.msrb.mxu2 %v4204_v32  ;;  %v8901_v33 = vadd.f32 %v3184_v21, %v3145_v3 }
 0x419   :  { %4295 = vmatpush.bf16.msra.mxu3 %v5976_v63 }
 0x41c   :  { %4267 = vmatpush.bf16.msrb.mxu2 %v5968_v13  ;;  %6018 = vmatmul.msk.bf16.vlgmr.msrb.gmra.mxu3 %vm4186_vm7, %v8340_v14 }
 0x41d   :  { %v8928_v60 = vpop.f32.mrf.mxu0 }
 0x41e   :  { %v3119_v58 = vpop.f32.mrf.mxu2  ;;  %v8914_v47 = vpop.f32.mrf.mxu3 }
 0x41f   :  { %v3147_v30 = vpop.f32.mrf.mxu1  ;;  %v3206_v18 = vadd.f32 %v3182_v31, %v3119_v58 }
 0x420   :  { %4322 = vmatpush.bf16.msra.mxu2 %v4216_v45  ;;  %6023 = vmatmul.msk.bf16.vlgmr.msrb.gmra.mxu1 %vm4186_vm7, %v8340_v14  ;;  %v8908_v17 = vadd.f32 %v3184_v21, %v3147_v30 }
 0x424   :  { %4323 = vmatpush.bf16.msra.mxu2 %v5984_v34 }
 0x425   :  { %v4227_v25 = vpop.f32.mrf.mxu0 }
 0x426   :  { %v3159_v22 = vpop.f32.mrf.mxu2 }
 0x427   :  { %6020 = vmatmul.msk.bf16.vlgmr.msrb.gmra.mxu2 %vm4186_vm7, %v8340_v14  ;;  %v3860_v20 = vpop.f32.mrf.mxu1  ;;  %v8922_v35 = vadd.f32 %v3185_v48, %v3159_v22  ;;  %v3173_v23 = vpop.f32.mrf.mxu3 }
 0x428   :  { %v8924_v52 = vadd.f32 %v3186_v37, %v3173_v23 }
 0x42c   :  { %6022 = vmatmul.msk.bf16.vlgmr.msra.gmra.mxu3 %vm4186_vm7, %v8340_v14 }
 0x42d   :  { %v4229_v16 = vpop.f32.mrf.mxu0 }
 0x42e   :  { %v3161_v1 = vpop.f32.mrf.mxu2 }
 0x42f   :  { %v3862_v62 = vpop.f32.mrf.mxu1  ;;  %v8930_v50 = vadd.f32 %v3185_v48, %v3161_v1  ;;  %v3175_v61 = vpop.f32.mrf.mxu3 }
 0x430   :  { %v8932_v54 = vadd.f32 %v3186_v37, %v3175_v61 }
 0x437   :  { %6024 = vmatmul.msk.bf16.vlgmr.msra.gmra.mxu2 %vm4186_vm7, %v8340_v14  ;;  %v3902_v11 = vpop.f32.mrf.mxu1 }
 0x43a   :  { %v3874_v24 = vpop.f32.mrf.mxu2 }
 0x43b   :  { %v3875_v46 = vadd.f32 %v3874_v24, %v3860_v20 }
 0x43d   :  { %v4075_v9 = vadd.f32 %v3875_v46, %v3195_v26 }
 0x43f   :  { %v3904_v51 = vpop.f32.mrf.mxu1  ;;  %v4330_v29 = vadd.f32 %v4227_v25, %v4075_v9 }
 0x441   :  { %4346 = vst [vmem:[%s9019_s11] sm:$0xff] %v4330_v29 }
 0x442   :  { %v3876_v14 = vpop.f32.mrf.mxu2 }
 0x443   :  { %v3877_v12 = vadd.f32 %v3876_v14, %v3862_v62 }
 0x445   :  { %v4083_v63 = vadd.f32 %v3877_v12, %v3203_v19 }
 0x447   :  { %v3888_v5 = vpop.f32.mrf.mxu3  ;;  %v4338_v28 = vadd.f32 %v4229_v16, %v4083_v63 }
 0x448   :  { %v3903_v53 = vadd.f32 %v3902_v11, %v3888_v5 }
 0x449   :  { %v3958_v4 = vpop.f32.mrf.mxu1  ;;  %4354 = vst [vmem:[%s9019_s11 + $0x40] sm:$0xff] %v4338_v28 }
 0x44a   :  { %v3959_v32 = vadd.f32 %v3958_v4, %v8827_v2  ;;  %v4076_v59 = vadd.f32 %v3903_v53, %v8876_v41  ;;  %v3183_v41 = vperm.slane %v8824_v43, 4 }
 0x44c   :  { %v8943_v7 = vadd.f32 %v3959_v32, %v3198_v38  ;;  %v3199_v20 = vadd.f32 %v3183_v41, %v8906_v56  ;;  %v3207_v23 = vadd.f32 %v3183_v41, %v8914_v47 }
 0x44f   :  { %v3890_v13 = vpop.f32.mrf.mxu3  ;;  %v4283_v38 = vpop.f32.mrf.mxu0 }
 0x450   :  { %v3905_v36 = vadd.f32 %v3904_v51, %v3890_v13 }
 0x451   :  { %v3960_v44 = vpop.f32.mrf.mxu1 }
 0x452   :  { %v3961_v45 = vadd.f32 %v3960_v44, %v8873_v49  ;;  %v4084_v0 = vadd.f32 %v3905_v36, %v8895_v42 }
 0x454   :  { %v8947_v55 = vadd.f32 %v3961_v45, %v3206_v18 }
 0x457   :  { %v4285_v1 = vpop.f32.mrf.mxu0 }
 0x45a   :  { %v3916_v39 = vpop.f32.mrf.mxu2 }
 0x45b   :  { %v3930_v2 = vpop.f32.mrf.mxu3 }
 0x45c   :  { %v3931_v43 = vadd.f32 %v3930_v2, %v3916_v39 }
 0x45e   :  { %v4077_v56 = vadd.f32 %v3931_v43, %v8856_v15 }
 0x462   :  { %v3918_v31 = vpop.f32.mrf.mxu2 }
 0x463   :  { %v3932_v34 = vpop.f32.mrf.mxu3 }
 0x464   :  { %v3933_v26 = vadd.f32 %v3932_v34, %v3918_v31 }
 0x466   :  { %v4085_v47 = vadd.f32 %v3933_v26, %v8884_v10 }
 0x469   :  { %v4000_v21 = vpop.f32.mrf.mxu1 }
 0x46a   :  { %v4015_v53 = vadd.f32 %v8897_v57, %v4000_v21 }
 0x471   :  { %v4002_v3 = vpop.f32.mrf.mxu1  ;;  %v3986_v40 = vpop.f32.mrf.mxu3 }
 0x472   :  { %v4017_v45 = vadd.f32 %v8910_v6, %v4002_v3 }
 0x479   :  { %v3988_v42 = vpop.f32.mrf.mxu3 }
 0x47a   :  { %v3972_v58 = vpop.f32.mrf.mxu2 }
 0x47b   :  { %v3987_v49 = vadd.f32 %v3986_v40, %v3972_v58 }
 0x47d   :  { %v4070_v30 = vpop.f32.mrf.mxu1  ;;  %v4079_v48 = vadd.f32 %v3987_v49, %v3199_v20 }
 0x47f   :  { %v4334_v37 = vadd.f32 %v4283_v38, %v4079_v48 }
 0x481   :  { %4350 = vst [vmem:[%s9019_s11 + $0x20] sm:$0xff] %v4334_v37 }
 0x482   :  { %v3974_v22 = vpop.f32.mrf.mxu2 }
 0x483   :  { %v3989_v62 = vadd.f32 %v3988_v42, %v3974_v22 }
 0x485   :  { %v4072_v18 = vpop.f32.mrf.mxu1  ;;  %v4087_v61 = vadd.f32 %v3989_v62, %v3207_v23 }
 0x487   :  { %v4342_v11 = vadd.f32 %v4285_v1, %v4087_v61 }
 0x489   :  { %4358 = vst [vmem:[%s9019_s11 + $0x60] sm:$0xff] %v4342_v11 }
 0x48d   :  { %v4255_v8 = vpop.f32.mrf.mxu1 }
 0x48e   :  { %v4332_v24 = vadd.f32 %v4255_v8, %v4077_v56 }
 0x48f   :  { %v4028_v25 = vpop.f32.mrf.mxu3 }
 0x490   :  { %4348 = vst [vmem:[%s9019_s11 + $0x10] sm:$0xff] %v4332_v24  ;;  %v4043_v29 = vadd.f32 %v8920_v27, %v4028_v25 }
 0x492   :  { %v4081_v14 = vadd.f32 %v4043_v29, %v8922_v35 }
 0x495   :  { %v4257_v46 = vpop.f32.mrf.mxu1 }
 0x496   :  { %v4340_v51 = vadd.f32 %v4257_v46, %v4085_v47 }
 0x497   :  { %v4030_v9 = vpop.f32.mrf.mxu3 }
 0x498   :  { %4356 = vst [vmem:[%s9019_s11 + $0x50] sm:$0xff] %v4340_v51  ;;  %v4045_v63 = vadd.f32 %v8928_v60, %v4030_v9 }
 0x49a   :  { %v4056_v15 = vpop.f32.mrf.mxu2  ;;  %v4089_v4 = vadd.f32 %v4045_v63, %v8930_v50  ;;  %v4080_v50 = vadd.f32 %v4015_v53, %v8901_v33 }
 0x49d   :  { %v4311_v19 = vpop.f32.mrf.mxu1 }
 0x49e   :  { %v4336_v12 = vadd.f32 %v4311_v19, %v4081_v14 }
 0x49f   :  { %v4241_v16 = vpop.f32.mrf.mxu3 }
 0x4a0   :  { %4352 = vst [vmem:[%s9019_s11 + $0x30] sm:$0xff] %v4336_v12  ;;  %v4331_v10 = vadd.f32 %v4241_v16, %v4076_v59 }
 0x4a2   :  { %4347 = vst [vmem:[%s9019_s11 + $0x8] sm:$0xff] %v4331_v10  ;;  %v4058_v27 = vpop.f32.mrf.mxu2 }
 0x4a3   :  { %v4073_v34 = vadd.f32 %v4072_v18, %v4058_v27 }
 0x4a5   :  { %v4313_v5 = vpop.f32.mrf.mxu1 }
 0x4a6   :  { %v4344_v32 = vadd.f32 %v4313_v5, %v4089_v4 }
 0x4a7   :  { %v4243_v35 = vpop.f32.mrf.mxu3 }
 0x4a8   :  { %4360 = vst [vmem:[%s9019_s11 + $0x70] sm:$0xff] %v4344_v32  ;;  %v4339_v60 = vadd.f32 %v4243_v35, %v4084_v0  ;;  %v4071_v0 = vadd.f32 %v4070_v30, %v4056_v15 }
 0x4aa   :  { %4355 = vst [vmem:[%s9019_s11 + $0x48] sm:$0xff] %v4339_v60  ;;  %v4269_v28 = vpop.f32.mrf.mxu2  ;;  %v4082_v39 = vadd.f32 %v4071_v0, %v8924_v52 }
 0x4ab   :  { %v4333_v59 = vadd.f32 %v4269_v28, %v8943_v7  ;;  %v4088_v7 = vadd.f32 %v4017_v45, %v8908_v17 }
 0x4ad   :  { %4349 = vst [vmem:[%s9019_s11 + $0x18] sm:$0xff] %v4333_v59 }
 0x4af   :  { %v4297_v44 = vpop.f32.mrf.mxu3 }
 0x4b0   :  { %v4335_v13 = vadd.f32 %v4297_v44, %v4080_v50 }
 0x4b2   :  { %4351 = vst [vmem:[%s9019_s11 + $0x28] sm:$0xff] %v4335_v13  ;;  %v4271_v57 = vpop.f32.mrf.mxu2 }
 0x4b3   :  { %v4341_v36 = vadd.f32 %v4271_v57, %v8947_v55  ;;  %v4090_v55 = vadd.f32 %v4073_v34, %v8932_v54 }
 0x4b5   :  { %4357 = vst [vmem:[%s9019_s11 + $0x58] sm:$0xff] %v4341_v36 }
 0x4b7   :  { %v4299_v2 = vpop.f32.mrf.mxu3 }
 0x4b8   :  { %v4343_v33 = vadd.f32 %v4299_v2, %v4088_v7 }
 0x4ba   :  { %4359 = vst [vmem:[%s9019_s11 + $0x68] sm:$0xff] %v4343_v33  ;;  %v4325_v6 = vpop.f32.mrf.mxu2 }
 0x4bb   :  { %v4337_v21 = vadd.f32 %v4325_v6, %v4082_v39 }
 0x4bd   :  { %4353 = vst [vmem:[%s9019_s11 + $0x38] sm:$0xff] %v4337_v21 }
 0x4c2   :  { %v4327_v3 = vpop.f32.mrf.mxu2 }
 0x4c3   :  { %v4345_v31 = vadd.f32 %v4327_v3, %v4090_v55 }
 0x4c5   :  { %4361 = vst [vmem:[%s9019_s11 + $0x78] sm:$0xff] %v4345_v31 }

</bundles_post_ra>
